<compile_context>
chip_gen: v7x
topology: tpu7x:2x2x1
jax: 0.10.0
libtpu: 0.0.40
codegen_flags: <defaults>
</compile_context>

<pallas_src>
import jax
import jax.numpy as jnp
from jax import lax
from jax.experimental import pallas as pl
from jax.experimental.pallas import tpu as pltpu

CHANNEL = 16
NEG_SLOPE = 0.01          # F.leaky_relu default negative_slope
B_BLK = 16                # samples per grid step (= one bf16 sublane tile)
OUT_PAD = 128             # lane padding for down5's single output channel


# ---------------------------------------------------------------------------
# Fused forward kernel (whole Discriminator, one grid step = B_BLK samples)
# ---------------------------------------------------------------------------
def _fused_kernel(x_ref, g0, b0, g1, b1, g2, b2, g3, b3, w4, b4, w5, b5,
                  out_ref, x1_ref, x2_ref, x3_ref, x4_ref,
                  p1, p2, p3):
    B = B_BLK
    f32 = jnp.float32

    def leaky(v):
        return jnp.where(v >= 0.0, v, NEG_SLOPE * v)

    # Zero ONLY the two H-padding row slabs of each stride-2 input buffer;
    # interiors are fully rewritten below and W padding is folded into weights.
    for buf, hq in ((p1, 9), (p2, 5), (p3, 3)):
        zero = jnp.zeros((B, buf.shape[-1]), buf.dtype)
        buf[0, 0:B, :] = zero                          # padded row 0
        buf[1, (hq - 1) * B:hq * B, :] = zero          # padded row 2*hq-1

    def scatter_rows(dst, a_bf16, ho):
        # write output row i (all B samples) into padded row i+1 of dst
        for i in range(ho):
            r = i + 1
            dst[r % 2, (r // 2) * B:(r // 2) * B + B, :] = a_bf16[i * B:(i + 1) * B, :]

    # ---- layer 0: merged d0_0|d0_1, 3x3 s1 p1, 6 -> 16 (block-diagonal) -----
    acc = jnp.zeros((16 * B, 16 * CHANNEL), f32)
    for du in range(3):                                # one matmul per kernel row
        slab = x_ref[du * B:(du + 16) * B, :]          # (16B, 96) bf16
        acc = acc + jnp.dot(slab, g0[du], preferred_element_type=f32)
    acc = leaky(acc + b0[...])
    scatter_rows(p1, acc.astype(jnp.bfloat16), 16)

    # ---- generic 4x4 stride-2 layer over a parity-split padded buffer -------
    def down_layer(src, g, b, ho, out_dst, pad_dst):
        acc = jnp.zeros((ho * B, g.shape[-1]), f32)
        for du in range(4):
            a_, p_ = du // 2, du % 2                   # padded row 2i+du -> pair i+a_, parity p_
            slab = src[p_, a_ * B:(a_ + ho) * B, :]    # static contiguous slice
            acc = acc + jnp.dot(slab, g[du], preferred_element_type=f32)
        acc = leaky(acc + b[...])
        out_dst[...] = acc                             # lane-dense f32 slab store
        a_bf16 = acc.astype(jnp.bfloat16)              # single cast per layer
        if pad_dst is not None:
            scatter_rows(pad_dst, a_bf16, ho)
        return a_bf16

    down_layer(p1, g1, b1, 8, x1_ref, p2)              # down1: 16x16x16 -> 8x8x32
    down_layer(p2, g2, b2, 4, x2_ref, p3)              # down2: 8x8x32  -> 4x4x64
    a3 = down_layer(p3, g3, b3, 2, x3_ref, None)       # down3: 4x4x64  -> 2x2x128

    # ---- down4: 4x4 s2 p1 on a 2x2 input -> 1x1x256 (only interior taps) ----
    acc = (jnp.dot(a3[0:B, :], w4[0], preferred_element_type=f32) +
           jnp.dot(a3[B:2 * B, :], w4[1], preferred_element_type=f32) + b4[...])
    acc = leaky(acc)
    x4_ref[...] = acc
    a4 = acc.astype(jnp.bfloat16)

    # ---- down5: 3x3 s1 p1 on a 1x1 input -> only the centre tap contributes -
    out_ref[...] = jnp.dot(a4, w5[...], preferred_element_type=f32) + b5[...]


def _build_forward(nb):
    B = B_BLK
    f32, bf16 = jnp.float32, jnp.bfloat16

    def full_spec(shape):
        return pl.BlockSpec(shape, lambda g, _s=len(shape): (0,) * _s)

    in_specs = [
        pl.BlockSpec((None, 18 * B, 96), lambda g: (g, 0, 0)),   # padded input
        full_spec((3, 96, 256)),  full_spec((1, 256)),           # merged d0_0|d0_1
        full_spec((4, 256, 256)), full_spec((1, 256)),           # down1
        full_spec((4, 256, 256)), full_spec((1, 256)),           # down2
        full_spec((4, 256, 256)), full_spec((1, 256)),           # down3
        full_spec((2, 256, 256)), full_spec((1, 256)),           # down4
        full_spec((256, OUT_PAD)), full_spec((1, OUT_PAD)),      # down5
    ]
    out_shapes = (
        jax.ShapeDtypeStruct((nb, B, OUT_PAD), f32),             # out (lanes padded)
        jax.ShapeDtypeStruct((nb, 8 * B, 256), f32),             # x1
        jax.ShapeDtypeStruct((nb, 4 * B, 256), f32),             # x2
        jax.ShapeDtypeStruct((nb, 2 * B, 256), f32),             # x3
        jax.ShapeDtypeStruct((nb, B, 256), f32),                 # x4
    )
    out_specs = tuple(
        pl.BlockSpec((None,) + s.shape[1:], lambda g: (g, 0, 0)) for s in out_shapes)

    scratch = [
        pltpu.VMEM((2, 9 * B, 256), bf16),   # down1 padded input (parity, rowpair*B, w*c)
        pltpu.VMEM((2, 5 * B, 256), bf16),   # down2 padded input
        pltpu.VMEM((2, 3 * B, 256), bf16),   # down3 padded input
    ]

    flops_blk = 2 * (3 * (16 * B) * 96 * 256 + 4 * (8 * B) * 256 * 256
                     + 4 * (4 * B) * 256 * 256 + 4 * (2 * B) * 256 * 256
                     + 2 * B * 256 * 256 + B * 256 * OUT_PAD)
    bytes_blk = (18 * B * 96 * 2                                    # input
                 + (3 * 96 + 12 * 256 + 2 * 256 + 256) * 256 * 2    # weights (bf16)
                 + (5 * 256 + OUT_PAD) * 4                          # biases
                 + 4 * (B * OUT_PAD + 15 * B * 256))                # outputs

    return pl.pallas_call(
        _fused_kernel,
        out_shape=out_shapes,
        grid=(nb,),
        in_specs=in_specs,
        out_specs=out_specs,
        scratch_shapes=scratch,
        compiler_params=pltpu.CompilerParams(
            dimension_semantics=("parallel",)),
        cost_estimate=pl.CostEstimate(
            flops=nb * flops_blk, transcendentals=0,
            bytes_accessed=nb * bytes_blk),
    )


# ---------------------------------------------------------------------------
# Parameters (deterministic synthetic init, shapes from Discriminator.__init__)
# ---------------------------------------------------------------------------
def _spectral_normalize(w_oihw):
    # nn.utils.spectral_norm divides by the largest singular value (power
    # iteration in torch); the exact sigma is used here at init time.
    cout = w_oihw.shape[0]
    sigma = jnp.linalg.svd(w_oihw.reshape(cout, -1), compute_uv=False)[0]
    return w_oihw / sigma


def init_params(key):
    specs = {
        "d0_0":  (CHANNEL // 2, 1, 3, 3),
        "d0_1":  (CHANNEL // 2, 5, 3, 3),
        "down1": (CHANNEL * 2, CHANNEL, 4, 4),
        "down2": (CHANNEL * 4, CHANNEL * 2, 4, 4),
        "down3": (CHANNEL * 8, CHANNEL * 4, 4, 4),
        "down4": (CHANNEL * 16, CHANNEL * 8, 4, 4),
        "down5": (1, CHANNEL * 16, 3, 3),
    }
    params = {}
    for name, shape in specs.items():
        key, kw_, kb_ = jax.random.split(key, 3)
        params[name] = {
            "w": 0.05 * jax.random.normal(kw_, shape, dtype=jnp.float32),
            "b": 0.01 * jax.random.normal(kb_, (shape[0],), dtype=jnp.float32),
        }
    for name in ("down1", "down2", "down3", "down4"):       # DCR(sample='down')
        params[name]["w"] = _spectral_normalize(params[name]["w"])
    return params


def _hwio(w_oihw):
    return jnp.transpose(w_oihw, (2, 3, 1, 0))              # (kh, kw, cin, cout)


def _fold_conv_weight(w_oihw, stride, wi, wo, pad=1):
    """OIHW weight -> (kh, wi*cin, wo*cout) bf16 folded matmul weights.

    For row slabs S_du[(i,b), w*cin+c] = X[b, stride*i+du (padded row), w, c]
    (unpadded columns), sum_du S_du @ G[du] equals the conv with spatial W
    padding folded away."""
    cout, cin, kh, kw = w_oihw.shape
    w = _hwio(w_oihw.astype(jnp.bfloat16))
    g = jnp.zeros((kh, wi, cin, wo, cout), jnp.bfloat16)
    for j in range(wo):
        for dv in range(kw):
            col = stride * j + dv - pad
            if 0 <= col < wi:
                g = g.at[:, col, :, j, :].set(w[:, dv, :, :])
    return g.reshape(kh, wi * cin, wo * cout)


def _tile_bias(b, wo):
    return jnp.tile(b.astype(jnp.float32), wo).reshape(1, -1)


def prepare_params(params):
    half = CHANNEL // 2
    # merged d0_0|d0_1 as one block-diagonal 3x3 conv over the 6-channel concat
    w0 = jnp.zeros((CHANNEL, 6, 3, 3), jnp.float32)
    w0 = w0.at[:half, 0:1].set(params["d0_0"]["w"])
    w0 = w0.at[half:, 1:6].set(params["d0_1"]["w"])
    b0 = jnp.concatenate([params["d0_0"]["b"], params["d0_1"]["b"]])

    prep = [
        _fold_conv_weight(w0, 1, 16, 16), _tile_bias(b0, 16),
        _fold_conv_weight(params["down1"]["w"], 2, 16, 8), _tile_bias(params["down1"]["b"], 8),
        _fold_conv_weight(params["down2"]["w"], 2, 8, 4), _tile_bias(params["down2"]["b"], 4),
        _fold_conv_weight(params["down3"]["w"], 2, 4, 2), _tile_bias(params["down3"]["b"], 2),
    ]
    # down4: only kernel taps (1..2, 1..2) hit the 2x2 input (rest see zeros)
    w4 = _hwio(params["down4"]["w"].astype(jnp.bfloat16))            # (4,4,128,256)
    w4f = jnp.stack([w4[1, 1:3].reshape(2 * 128, 256),
                     w4[2, 1:3].reshape(2 * 128, 256)])              # (2, 256, 256)
    prep += [w4f, _tile_bias(params["down4"]["b"], 1)]
    # down5: only the centre tap hits the 1x1 input; pad cout 1 -> 128 lanes
    w5 = _hwio(params["down5"]["w"].astype(jnp.bfloat16))[1, 1]      # (256, 1)
    w5 = jnp.concatenate(
        [w5, jnp.zeros((CHANNEL * 16, OUT_PAD - 1), jnp.bfloat16)], axis=1)
    b5 = jnp.concatenate([params["down5"]["b"].astype(jnp.float32),
                          jnp.zeros((OUT_PAD - 1,), jnp.float32)]).reshape(1, -1)
    prep += [w5, b5]
    return prep


# ---------------------------------------------------------------------------
# Discriminator forward (attention2 is None branch)
# ---------------------------------------------------------------------------
@jax.jit
def discriminator_forward(params, y1_nchw, y2_nchw):
    n, _, hh, ww = y1_nchw.shape
    assert hh == 16 and ww == 16, "fused kernel is specialised to 16x16 patches"
    # TODO(synk): generalise to other spatial sizes (the down4/down5 tail is
    # specialised to the 1x1 bottleneck that a 16x16 input produces).

    to_nhwc = lambda t: jnp.transpose(t, (0, 2, 3, 1))
    ycat = jnp.concatenate([to_nhwc(y1_nchw), to_nhwc(y2_nchw)], axis=-1)  # (n,16,16,6)

    B = B_BLK
    n_pad = -(-n // B) * B
    nb = n_pad // B
    # pad batch to a multiple of B_BLK and H by 1 (W padding is folded into the
    # weights); per-block row layout = padded_row * B + sample.
    x = jnp.pad(ycat, ((0, n_pad - n), (1, 1), (0, 0), (0, 0)))
    x = x.reshape(nb, B, 18, 16 * 6).transpose(0, 2, 1, 3).reshape(nb, 18 * B, 96)
    x = x.astype(jnp.bfloat16)

    out_k, x1_k, x2_k, x3_k, x4_k = _build_forward(nb)(*([x] + prepare_params(params)))

    def unpack(t, ho, c):    # (nb, ho*B, ho*c) -> (n, c, ho, ho) NCHW
        t = t.reshape(nb, ho, B, ho, c).transpose(0, 2, 1, 3, 4)
        t = t.reshape(n_pad, ho, ho, c)[:n]
        return jnp.transpose(t, (0, 3, 1, 2))

    x1 = unpack(x1_k, 8, CHANNEL * 2)
    x2 = unpack(x2_k, 4, CHANNEL * 4)
    x3 = unpack(x3_k, 2, CHANNEL * 8)
    x4 = x4_k.reshape(n_pad, 1, 1, CHANNEL * 16)[:n].transpose(0, 3, 1, 2)
    out = out_k.reshape(n_pad, OUT_PAD)[:n, :1].reshape(n, 1, 1, 1)
    # TODO(synk): F.dropout(p=0.25) after down1..down4 is training-mode
    # stochastic dropout in the PyTorch code; identity here (eval semantics).
    return out, x1, x2, x3, x4


# ---------------------------------------------------------------------------
# Pure-JAX (XLA) reference mirroring the kernel's bf16 operand rounding
# ---------------------------------------------------------------------------
def reference_forward(params, y1_nchw, y2_nchw):
    f32, bf16 = jnp.float32, jnp.bfloat16
    to_nhwc = lambda t: jnp.transpose(t, (0, 2, 3, 1))

    def conv(x, w_oihw, b, stride):
        w = jnp.transpose(w_oihw, (2, 3, 1, 0)).astype(bf16).astype(f32)   # HWIO
        x = x.astype(bf16).astype(f32)
        y = lax.conv_general_dilated(
            x, w, (stride, stride), [(1, 1), (1, 1)],
            dimension_numbers=("NHWC", "HWIO", "NHWC"))
        return y + b.reshape(1, 1, 1, -1).astype(f32)

    leaky = lambda v: jnp.where(v >= 0.0, v, NEG_SLOPE * v)
    y1 = to_nhwc(y1_nchw).astype(f32)
    y2 = to_nhwc(y2_nchw).astype(f32)
    x = jnp.concatenate(
        [leaky(conv(y1, params["d0_0"]["w"], params["d0_0"]["b"], 1)),
         leaky(conv(y2, params["d0_1"]["w"], params["d0_1"]["b"], 1))], axis=-1)
    x1 = leaky(conv(x,  params["down1"]["w"], params["down1"]["b"], 2))
    x2 = leaky(conv(x1, params["down2"]["w"], params["down2"]["b"], 2))
    x3 = leaky(conv(x2, params["down3"]["w"], params["down3"]["b"], 2))
    x4 = leaky(conv(x3, params["down4"]["w"], params["down4"]["b"], 2))
    out = conv(x4, params["down5"]["w"], params["down5"]["b"], 1)
    to_nchw = lambda t: jnp.transpose(t, (0, 3, 1, 2))
    return tuple(map(to_nchw, (out, x1, x2, x3, x4)))


if __name__ == "__main__":
    key = jax.random.PRNGKey(0)
    k1, k2, kp = jax.random.split(key, 3)
    n = 32        # 2 batch blocks of 16 -> grid length 2 (both v7x cores busy)
    y1 = jax.random.normal(k1, (n, 1, 16, 16), dtype=jnp.float32)
    y2 = jax.random.normal(k2, (n, 5, 16, 16), dtype=jnp.float32)
    params = init_params(kp)

    outs = jax.block_until_ready(discriminator_forward(params, y1, y2))
    ref = jax.block_until_ready(reference_forward(params, y1, y2))

    expected = [(n, 1, 1, 1), (n, 32, 8, 8), (n, 64, 4, 4),
                (n, 128, 2, 2), (n, 256, 1, 1)]
    assert [tuple(o.shape) for o in outs] == expected, [o.shape for o in outs]
    for o, r in zip(outs, ref):
        assert bool(jnp.all(jnp.isfinite(o)))
        err = float(jnp.max(jnp.abs(o - r)))
        assert bool(jnp.allclose(o, r, rtol=1e-2, atol=1e-3)), err
    print("KERNEL_OK")
</pallas_src>

<mosaic_0001>
module attributes {stable_mosaic.version = 11 : i64} {
  func.func @_fused_kernel(%arg0: i32, %arg1: memref<1x288x96xbf16, #tpu.memory_space<vmem>>, %arg2: memref<3x96x256xbf16, #tpu.memory_space<vmem>>, %arg3: memref<1x256xf32, #tpu.memory_space<vmem>>, %arg4: memref<4x256x256xbf16, #tpu.memory_space<vmem>>, %arg5: memref<1x256xf32, #tpu.memory_space<vmem>>, %arg6: memref<4x256x256xbf16, #tpu.memory_space<vmem>>, %arg7: memref<1x256xf32, #tpu.memory_space<vmem>>, %arg8: memref<4x256x256xbf16, #tpu.memory_space<vmem>>, %arg9: memref<1x256xf32, #tpu.memory_space<vmem>>, %arg10: memref<2x256x256xbf16, #tpu.memory_space<vmem>>, %arg11: memref<1x256xf32, #tpu.memory_space<vmem>>, %arg12: memref<256x128xbf16, #tpu.memory_space<vmem>>, %arg13: memref<1x128xf32, #tpu.memory_space<vmem>>, %arg14: memref<1x16x128xf32, #tpu.memory_space<vmem>>, %arg15: memref<1x128x256xf32, #tpu.memory_space<vmem>>, %arg16: memref<1x64x256xf32, #tpu.memory_space<vmem>>, %arg17: memref<1x32x256xf32, #tpu.memory_space<vmem>>, %arg18: memref<1x16x256xf32, #tpu.memory_space<vmem>>, %arg19: memref<2x144x256xbf16, #tpu.memory_space<vmem>>, %arg20: memref<2x80x256xbf16, #tpu.memory_space<vmem>>, %arg21: memref<2x48x256xbf16, #tpu.memory_space<vmem>>) attributes {dimension_semantics = [#tpu.dimension_semantics<parallel>], iteration_bounds = array<i64: 2>, scalar_prefetch = 0 : i64, scratch_operands = 3 : i64, tpu.core_type = #tpu.core_type<tc>, window_params = [{transform_indices = @transform_0, window_bounds = array<i64: 1, 288, 96>}, {pipeline_mode = #tpu.pipeline_mode<synchronous>, transform_indices = @transform_1, window_bounds = array<i64: 3, 96, 256>}, {pipeline_mode = #tpu.pipeline_mode<synchronous>, transform_indices = @transform_2, window_bounds = array<i64: 1, 256>}, {pipeline_mode = #tpu.pipeline_mode<synchronous>, transform_indices = @transform_3, window_bounds = array<i64: 4, 256, 256>}, {pipeline_mode = #tpu.pipeline_mode<synchronous>, transform_indices = @transform_4, window_bounds = array<i64: 1, 256>}, {pipeline_mode = #tpu.pipeline_mode<synchronous>, transform_indices = @transform_5, window_bounds = array<i64: 4, 256, 256>}, {pipeline_mode = #tpu.pipeline_mode<synchronous>, transform_indices = @transform_6, window_bounds = array<i64: 1, 256>}, {pipeline_mode = #tpu.pipeline_mode<synchronous>, transform_indices = @transform_7, window_bounds = array<i64: 4, 256, 256>}, {pipeline_mode = #tpu.pipeline_mode<synchronous>, transform_indices = @transform_8, window_bounds = array<i64: 1, 256>}, {pipeline_mode = #tpu.pipeline_mode<synchronous>, transform_indices = @transform_9, window_bounds = array<i64: 2, 256, 256>}, {pipeline_mode = #tpu.pipeline_mode<synchronous>, transform_indices = @transform_10, window_bounds = array<i64: 1, 256>}, {pipeline_mode = #tpu.pipeline_mode<synchronous>, transform_indices = @transform_11, window_bounds = array<i64: 256, 128>}, {pipeline_mode = #tpu.pipeline_mode<synchronous>, transform_indices = @transform_12, window_bounds = array<i64: 1, 128>}, {transform_indices = @transform_13, window_bounds = array<i64: 1, 16, 128>}, {transform_indices = @transform_14, window_bounds = array<i64: 1, 128, 256>}, {transform_indices = @transform_15, window_bounds = array<i64: 1, 64, 256>}, {transform_indices = @transform_16, window_bounds = array<i64: 1, 32, 256>}, {transform_indices = @transform_17, window_bounds = array<i64: 1, 16, 256>}]} {
    %cst = arith.constant 0.000000e+00 : bf16
    %0 = vector.broadcast %cst : bf16 to vector<16x256xbf16>
    %c0 = arith.constant 0 : index
    %c0_0 = arith.constant 0 : index
    %c0_1 = arith.constant 0 : index
    %1 = vector.load %arg19[%c0, %c0_0, %c0_1] : memref<2x144x256xbf16, #tpu.memory_space<vmem>>, vector<1x16x256xbf16>
    %2 = vector.shape_cast %1 : vector<1x16x256xbf16> to vector<16x256xbf16>
    %3 = vector.shape_cast %0 : vector<16x256xbf16> to vector<1x16x256xbf16>
    tpu.vector_store %arg19[%c0, %c0_0, %c0_1], %3 {strides = array<i32>} : memref<2x144x256xbf16, #tpu.memory_space<vmem>>, vector<1x16x256xbf16>,
    %c1 = arith.constant 1 : index
    %c128 = arith.constant 128 : index
    %c0_2 = arith.constant 0 : index
    %4 = vector.load %arg19[%c1, %c128, %c0_2] : memref<2x144x256xbf16, #tpu.memory_space<vmem>>, vector<1x16x256xbf16>
    %5 = vector.shape_cast %4 : vector<1x16x256xbf16> to vector<16x256xbf16>
    %6 = vector.shape_cast %0 : vector<16x256xbf16> to vector<1x16x256xbf16>
    tpu.vector_store %arg19[%c1, %c128, %c0_2], %6 {strides = array<i32>} : memref<2x144x256xbf16, #tpu.memory_space<vmem>>, vector<1x16x256xbf16>,
    %cst_3 = arith.constant 0.000000e+00 : bf16
    %7 = vector.broadcast %cst_3 : bf16 to vector<16x256xbf16>
    %c0_4 = arith.constant 0 : index
    %c0_5 = arith.constant 0 : index
    %c0_6 = arith.constant 0 : index
    %8 = vector.load %arg20[%c0_4, %c0_5, %c0_6] : memref<2x80x256xbf16, #tpu.memory_space<vmem>>, vector<1x16x256xbf16>
    %9 = vector.shape_cast %8 : vector<1x16x256xbf16> to vector<16x256xbf16>
    %10 = vector.shape_cast %7 : vector<16x256xbf16> to vector<1x16x256xbf16>
    tpu.vector_store %arg20[%c0_4, %c0_5, %c0_6], %10 {strides = array<i32>} : memref<2x80x256xbf16, #tpu.memory_space<vmem>>, vector<1x16x256xbf16>,
    %c1_7 = arith.constant 1 : index
    %c64 = arith.constant 64 : index
    %c0_8 = arith.constant 0 : index
    %11 = vector.load %arg20[%c1_7, %c64, %c0_8] : memref<2x80x256xbf16, #tpu.memory_space<vmem>>, vector<1x16x256xbf16>
    %12 = vector.shape_cast %11 : vector<1x16x256xbf16> to vector<16x256xbf16>
    %13 = vector.shape_cast %7 : vector<16x256xbf16> to vector<1x16x256xbf16>
    tpu.vector_store %arg20[%c1_7, %c64, %c0_8], %13 {strides = array<i32>} : memref<2x80x256xbf16, #tpu.memory_space<vmem>>, vector<1x16x256xbf16>,
    %cst_9 = arith.constant 0.000000e+00 : bf16
    %14 = vector.broadcast %cst_9 : bf16 to vector<16x256xbf16>
    %c0_10 = arith.constant 0 : index
    %c0_11 = arith.constant 0 : index
    %c0_12 = arith.constant 0 : index
    %15 = vector.load %arg21[%c0_10, %c0_11, %c0_12] : memref<2x48x256xbf16, #tpu.memory_space<vmem>>, vector<1x16x256xbf16>
    %16 = vector.shape_cast %15 : vector<1x16x256xbf16> to vector<16x256xbf16>
    %17 = vector.shape_cast %14 : vector<16x256xbf16> to vector<1x16x256xbf16>
    tpu.vector_store %arg21[%c0_10, %c0_11, %c0_12], %17 {strides = array<i32>} : memref<2x48x256xbf16, #tpu.memory_space<vmem>>, vector<1x16x256xbf16>,
    %c1_13 = arith.constant 1 : index
    %c32 = arith.constant 32 : index
    %c0_14 = arith.constant 0 : index
    %18 = vector.load %arg21[%c1_13, %c32, %c0_14] : memref<2x48x256xbf16, #tpu.memory_space<vmem>>, vector<1x16x256xbf16>
    %19 = vector.shape_cast %18 : vector<1x16x256xbf16> to vector<16x256xbf16>
    %20 = vector.shape_cast %14 : vector<16x256xbf16> to vector<1x16x256xbf16>
    tpu.vector_store %arg21[%c1_13, %c32, %c0_14], %20 {strides = array<i32>} : memref<2x48x256xbf16, #tpu.memory_space<vmem>>, vector<1x16x256xbf16>,
    %cst_15 = arith.constant 0.000000e+00 : f32
    %21 = vector.broadcast %cst_15 : f32 to vector<256x256xf32>
    %c0_16 = arith.constant 0 : index
    %c0_17 = arith.constant 0 : index
    %c0_18 = arith.constant 0 : index
    %22 = vector.load %arg1[%c0_16, %c0_17, %c0_18] : memref<1x288x96xbf16, #tpu.memory_space<vmem>>, vector<1x256x96xbf16>
    %23 = vector.shape_cast %22 : vector<1x256x96xbf16> to vector<256x96xbf16>
    %c0_19 = arith.constant 0 : index
    %c0_20 = arith.constant 0 : index
    %c0_21 = arith.constant 0 : index
    %24 = vector.load %arg2[%c0_19, %c0_20, %c0_21] : memref<3x96x256xbf16, #tpu.memory_space<vmem>>, vector<1x96x256xbf16>
    %25 = vector.shape_cast %24 : vector<1x96x256xbf16> to vector<96x256xbf16>
    %cst_22 = arith.constant dense<0.000000e+00> : vector<256x256xf32>
    %26 = tpu.matmul %23, %25, %cst_22 {dimension_numbers = #tpu.dot_dimension_numbers<[1], [0], [0], [1], [0, 0, 1, 1], [], []>} : vector<256x96xbf16>, vector<96x256xbf16>, vector<256x256xf32> -> vector<256x256xf32>
    %27 = arith.addf %21, %26 : vector<256x256xf32>
    %c0_23 = arith.constant 0 : index
    %c16 = arith.constant 16 : index
    %c0_24 = arith.constant 0 : index
    %28 = vector.load %arg1[%c0_23, %c16, %c0_24] : memref<1x288x96xbf16, #tpu.memory_space<vmem>>, vector<1x256x96xbf16>
    %29 = vector.shape_cast %28 : vector<1x256x96xbf16> to vector<256x96xbf16>
    %c1_25 = arith.constant 1 : index
    %c0_26 = arith.constant 0 : index
    %c0_27 = arith.constant 0 : index
    %30 = vector.load %arg2[%c1_25, %c0_26, %c0_27] : memref<3x96x256xbf16, #tpu.memory_space<vmem>>, vector<1x96x256xbf16>
    %31 = vector.shape_cast %30 : vector<1x96x256xbf16> to vector<96x256xbf16>
    %cst_28 = arith.constant dense<0.000000e+00> : vector<256x256xf32>
    %32 = tpu.matmul %29, %31, %cst_28 {dimension_numbers = #tpu.dot_dimension_numbers<[1], [0], [0], [1], [0, 0, 1, 1], [], []>} : vector<256x96xbf16>, vector<96x256xbf16>, vector<256x256xf32> -> vector<256x256xf32>
    %33 = arith.addf %27, %32 : vector<256x256xf32>
    %c0_29 = arith.constant 0 : index
    %c32_30 = arith.constant 32 : index
    %c0_31 = arith.constant 0 : index
    %34 = vector.load %arg1[%c0_29, %c32_30, %c0_31] : memref<1x288x96xbf16, #tpu.memory_space<vmem>>, vector<1x256x96xbf16>
    %35 = vector.shape_cast %34 : vector<1x256x96xbf16> to vector<256x96xbf16>
    %c2 = arith.constant 2 : index
    %c0_32 = arith.constant 0 : index
    %c0_33 = arith.constant 0 : index
    %36 = vector.load %arg2[%c2, %c0_32, %c0_33] : memref<3x96x256xbf16, #tpu.memory_space<vmem>>, vector<1x96x256xbf16>
    %37 = vector.shape_cast %36 : vector<1x96x256xbf16> to vector<96x256xbf16>
    %cst_34 = arith.constant dense<0.000000e+00> : vector<256x256xf32>
    %38 = tpu.matmul %35, %37, %cst_34 {dimension_numbers = #tpu.dot_dimension_numbers<[1], [0], [0], [1], [0, 0, 1, 1], [], []>} : vector<256x96xbf16>, vector<96x256xbf16>, vector<256x256xf32> -> vector<256x256xf32>
    %39 = arith.addf %33, %38 : vector<256x256xf32>
    %c0_35 = arith.constant 0 : index
    %c0_36 = arith.constant 0 : index
    %40 = vector.load %arg3[%c0_35, %c0_36] : memref<1x256xf32, #tpu.memory_space<vmem>>, vector<1x256xf32>
    %41 = vector.broadcast %40 : vector<1x256xf32> to vector<256x256xf32>
    %42 = arith.addf %39, %41 : vector<256x256xf32>
    %cst_37 = arith.constant 0.000000e+00 : f32
    %43 = vector.broadcast %cst_37 : f32 to vector<256x256xf32>
    %44 = arith.cmpf oge, %42, %43 : vector<256x256xf32>
    %cst_38 = arith.constant 0.00999999977 : f32
    %45 = vector.broadcast %cst_38 : f32 to vector<256x256xf32>
    %46 = arith.mulf %45, %42 : vector<256x256xf32>
    %47 = arith.select %44, %42, %46 : vector<256x256xi1>, vector<256x256xf32>
    %48 = arith.truncf %47 : vector<256x256xf32> to vector<256x256xbf16>
    %49 = vector.extract_strided_slice %48 {offsets = [0, 0], sizes = [16, 256], strides = [1, 1]} : vector<256x256xbf16> to vector<16x256xbf16>
    %c1_39 = arith.constant 1 : index
    %c0_40 = arith.constant 0 : index
    %c0_41 = arith.constant 0 : index
    %50 = vector.load %arg19[%c1_39, %c0_40, %c0_41] : memref<2x144x256xbf16, #tpu.memory_space<vmem>>, vector<1x16x256xbf16>
    %51 = vector.shape_cast %50 : vector<1x16x256xbf16> to vector<16x256xbf16>
    %52 = vector.shape_cast %49 : vector<16x256xbf16> to vector<1x16x256xbf16>
    tpu.vector_store %arg19[%c1_39, %c0_40, %c0_41], %52 {strides = array<i32>} : memref<2x144x256xbf16, #tpu.memory_space<vmem>>, vector<1x16x256xbf16>,
    %53 = vector.extract_strided_slice %48 {offsets = [16, 0], sizes = [16, 256], strides = [1, 1]} : vector<256x256xbf16> to vector<16x256xbf16>
    %c0_42 = arith.constant 0 : index
    %c16_43 = arith.constant 16 : index
    %c0_44 = arith.constant 0 : index
    %54 = vector.load %arg19[%c0_42, %c16_43, %c0_44] : memref<2x144x256xbf16, #tpu.memory_space<vmem>>, vector<1x16x256xbf16>
    %55 = vector.shape_cast %54 : vector<1x16x256xbf16> to vector<16x256xbf16>
    %56 = vector.shape_cast %53 : vector<16x256xbf16> to vector<1x16x256xbf16>
    tpu.vector_store %arg19[%c0_42, %c16_43, %c0_44], %56 {strides = array<i32>} : memref<2x144x256xbf16, #tpu.memory_space<vmem>>, vector<1x16x256xbf16>,
    %57 = vector.extract_strided_slice %48 {offsets = [32, 0], sizes = [16, 256], strides = [1, 1]} : vector<256x256xbf16> to vector<16x256xbf16>
    %c1_45 = arith.constant 1 : index
    %c16_46 = arith.constant 16 : index
    %c0_47 = arith.constant 0 : index
    %58 = vector.load %arg19[%c1_45, %c16_46, %c0_47] : memref<2x144x256xbf16, #tpu.memory_space<vmem>>, vector<1x16x256xbf16>
    %59 = vector.shape_cast %58 : vector<1x16x256xbf16> to vector<16x256xbf16>
    %60 = vector.shape_cast %57 : vector<16x256xbf16> to vector<1x16x256xbf16>
    tpu.vector_store %arg19[%c1_45, %c16_46, %c0_47], %60 {strides = array<i32>} : memref<2x144x256xbf16, #tpu.memory_space<vmem>>, vector<1x16x256xbf16>,
    %61 = vector.extract_strided_slice %48 {offsets = [48, 0], sizes = [16, 256], strides = [1, 1]} : vector<256x256xbf16> to vector<16x256xbf16>
    %c0_48 = arith.constant 0 : index
    %c32_49 = arith.constant 32 : index
    %c0_50 = arith.constant 0 : index
    %62 = vector.load %arg19[%c0_48, %c32_49, %c0_50] : memref<2x144x256xbf16, #tpu.memory_space<vmem>>, vector<1x16x256xbf16>
    %63 = vector.shape_cast %62 : vector<1x16x256xbf16> to vector<16x256xbf16>
    %64 = vector.shape_cast %61 : vector<16x256xbf16> to vector<1x16x256xbf16>
    tpu.vector_store %arg19[%c0_48, %c32_49, %c0_50], %64 {strides = array<i32>} : memref<2x144x256xbf16, #tpu.memory_space<vmem>>, vector<1x16x256xbf16>,
    %65 = vector.extract_strided_slice %48 {offsets = [64, 0], sizes = [16, 256], strides = [1, 1]} : vector<256x256xbf16> to vector<16x256xbf16>
    %c1_51 = arith.constant 1 : index
    %c32_52 = arith.constant 32 : index
    %c0_53 = arith.constant 0 : index
    %66 = vector.load %arg19[%c1_51, %c32_52, %c0_53] : memref<2x144x256xbf16, #tpu.memory_space<vmem>>, vector<1x16x256xbf16>
    %67 = vector.shape_cast %66 : vector<1x16x256xbf16> to vector<16x256xbf16>
    %68 = vector.shape_cast %65 : vector<16x256xbf16> to vector<1x16x256xbf16>
    tpu.vector_store %arg19[%c1_51, %c32_52, %c0_53], %68 {strides = array<i32>} : memref<2x144x256xbf16, #tpu.memory_space<vmem>>, vector<1x16x256xbf16>,
    %69 = vector.extract_strided_slice %48 {offsets = [80, 0], sizes = [16, 256], strides = [1, 1]} : vector<256x256xbf16> to vector<16x256xbf16>
    %c0_54 = arith.constant 0 : index
    %c48 = arith.constant 48 : index
    %c0_55 = arith.constant 0 : index
    %70 = vector.load %arg19[%c0_54, %c48, %c0_55] : memref<2x144x256xbf16, #tpu.memory_space<vmem>>, vector<1x16x256xbf16>
    %71 = vector.shape_cast %70 : vector<1x16x256xbf16> to vector<16x256xbf16>
    %72 = vector.shape_cast %69 : vector<16x256xbf16> to vector<1x16x256xbf16>
    tpu.vector_store %arg19[%c0_54, %c48, %c0_55], %72 {strides = array<i32>} : memref<2x144x256xbf16, #tpu.memory_space<vmem>>, vector<1x16x256xbf16>,
    %73 = vector.extract_strided_slice %48 {offsets = [96, 0], sizes = [16, 256], strides = [1, 1]} : vector<256x256xbf16> to vector<16x256xbf16>
    %c1_56 = arith.constant 1 : index
    %c48_57 = arith.constant 48 : index
    %c0_58 = arith.constant 0 : index
    %74 = vector.load %arg19[%c1_56, %c48_57, %c0_58] : memref<2x144x256xbf16, #tpu.memory_space<vmem>>, vector<1x16x256xbf16>
    %75 = vector.shape_cast %74 : vector<1x16x256xbf16> to vector<16x256xbf16>
    %76 = vector.shape_cast %73 : vector<16x256xbf16> to vector<1x16x256xbf16>
    tpu.vector_store %arg19[%c1_56, %c48_57, %c0_58], %76 {strides = array<i32>} : memref<2x144x256xbf16, #tpu.memory_space<vmem>>, vector<1x16x256xbf16>,
    %77 = vector.extract_strided_slice %48 {offsets = [112, 0], sizes = [16, 256], strides = [1, 1]} : vector<256x256xbf16> to vector<16x256xbf16>
    %c0_59 = arith.constant 0 : index
    %c64_60 = arith.constant 64 : index
    %c0_61 = arith.constant 0 : index
    %78 = vector.load %arg19[%c0_59, %c64_60, %c0_61] : memref<2x144x256xbf16, #tpu.memory_space<vmem>>, vector<1x16x256xbf16>
    %79 = vector.shape_cast %78 : vector<1x16x256xbf16> to vector<16x256xbf16>
    %80 = vector.shape_cast %77 : vector<16x256xbf16> to vector<1x16x256xbf16>
    tpu.vector_store %arg19[%c0_59, %c64_60, %c0_61], %80 {strides = array<i32>} : memref<2x144x256xbf16, #tpu.memory_space<vmem>>, vector<1x16x256xbf16>,
    %81 = vector.extract_strided_slice %48 {offsets = [128, 0], sizes = [16, 256], strides = [1, 1]} : vector<256x256xbf16> to vector<16x256xbf16>
    %c1_62 = arith.constant 1 : index
    %c64_63 = arith.constant 64 : index
    %c0_64 = arith.constant 0 : index
    %82 = vector.load %arg19[%c1_62, %c64_63, %c0_64] : memref<2x144x256xbf16, #tpu.memory_space<vmem>>, vector<1x16x256xbf16>
    %83 = vector.shape_cast %82 : vector<1x16x256xbf16> to vector<16x256xbf16>
    %84 = vector.shape_cast %81 : vector<16x256xbf16> to vector<1x16x256xbf16>
    tpu.vector_store %arg19[%c1_62, %c64_63, %c0_64], %84 {strides = array<i32>} : memref<2x144x256xbf16, #tpu.memory_space<vmem>>, vector<1x16x256xbf16>,
    %85 = vector.extract_strided_slice %48 {offsets = [144, 0], sizes = [16, 256], strides = [1, 1]} : vector<256x256xbf16> to vector<16x256xbf16>
    %c0_65 = arith.constant 0 : index
    %c80 = arith.constant 80 : index
    %c0_66 = arith.constant 0 : index
    %86 = vector.load %arg19[%c0_65, %c80, %c0_66] : memref<2x144x256xbf16, #tpu.memory_space<vmem>>, vector<1x16x256xbf16>
    %87 = vector.shape_cast %86 : vector<1x16x256xbf16> to vector<16x256xbf16>
    %88 = vector.shape_cast %85 : vector<16x256xbf16> to vector<1x16x256xbf16>
    tpu.vector_store %arg19[%c0_65, %c80, %c0_66], %88 {strides = array<i32>} : memref<2x144x256xbf16, #tpu.memory_space<vmem>>, vector<1x16x256xbf16>,
    %89 = vector.extract_strided_slice %48 {offsets = [160, 0], sizes = [16, 256], strides = [1, 1]} : vector<256x256xbf16> to vector<16x256xbf16>
    %c1_67 = arith.constant 1 : index
    %c80_68 = arith.constant 80 : index
    %c0_69 = arith.constant 0 : index
    %90 = vector.load %arg19[%c1_67, %c80_68, %c0_69] : memref<2x144x256xbf16, #tpu.memory_space<vmem>>, vector<1x16x256xbf16>
    %91 = vector.shape_cast %90 : vector<1x16x256xbf16> to vector<16x256xbf16>
    %92 = vector.shape_cast %89 : vector<16x256xbf16> to vector<1x16x256xbf16>
    tpu.vector_store %arg19[%c1_67, %c80_68, %c0_69], %92 {strides = array<i32>} : memref<2x144x256xbf16, #tpu.memory_space<vmem>>, vector<1x16x256xbf16>,
    %93 = vector.extract_strided_slice %48 {offsets = [176, 0], sizes = [16, 256], strides = [1, 1]} : vector<256x256xbf16> to vector<16x256xbf16>
    %c0_70 = arith.constant 0 : index
    %c96 = arith.constant 96 : index
    %c0_71 = arith.constant 0 : index
    %94 = vector.load %arg19[%c0_70, %c96, %c0_71] : memref<2x144x256xbf16, #tpu.memory_space<vmem>>, vector<1x16x256xbf16>
    %95 = vector.shape_cast %94 : vector<1x16x256xbf16> to vector<16x256xbf16>
    %96 = vector.shape_cast %93 : vector<16x256xbf16> to vector<1x16x256xbf16>
    tpu.vector_store %arg19[%c0_70, %c96, %c0_71], %96 {strides = array<i32>} : memref<2x144x256xbf16, #tpu.memory_space<vmem>>, vector<1x16x256xbf16>,
    %97 = vector.extract_strided_slice %48 {offsets = [192, 0], sizes = [16, 256], strides = [1, 1]} : vector<256x256xbf16> to vector<16x256xbf16>
    %c1_72 = arith.constant 1 : index
    %c96_73 = arith.constant 96 : index
    %c0_74 = arith.constant 0 : index
    %98 = vector.load %arg19[%c1_72, %c96_73, %c0_74] : memref<2x144x256xbf16, #tpu.memory_space<vmem>>, vector<1x16x256xbf16>
    %99 = vector.shape_cast %98 : vector<1x16x256xbf16> to vector<16x256xbf16>
    %100 = vector.shape_cast %97 : vector<16x256xbf16> to vector<1x16x256xbf16>
    tpu.vector_store %arg19[%c1_72, %c96_73, %c0_74], %100 {strides = array<i32>} : memref<2x144x256xbf16, #tpu.memory_space<vmem>>, vector<1x16x256xbf16>,
    %101 = vector.extract_strided_slice %48 {offsets = [208, 0], sizes = [16, 256], strides = [1, 1]} : vector<256x256xbf16> to vector<16x256xbf16>
    %c0_75 = arith.constant 0 : index
    %c112 = arith.constant 112 : index
    %c0_76 = arith.constant 0 : index
    %102 = vector.load %arg19[%c0_75, %c112, %c0_76] : memref<2x144x256xbf16, #tpu.memory_space<vmem>>, vector<1x16x256xbf16>
    %103 = vector.shape_cast %102 : vector<1x16x256xbf16> to vector<16x256xbf16>
    %104 = vector.shape_cast %101 : vector<16x256xbf16> to vector<1x16x256xbf16>
    tpu.vector_store %arg19[%c0_75, %c112, %c0_76], %104 {strides = array<i32>} : memref<2x144x256xbf16, #tpu.memory_space<vmem>>, vector<1x16x256xbf16>,
    %105 = vector.extract_strided_slice %48 {offsets = [224, 0], sizes = [16, 256], strides = [1, 1]} : vector<256x256xbf16> to vector<16x256xbf16>
    %c1_77 = arith.constant 1 : index
    %c112_78 = arith.constant 112 : index
    %c0_79 = arith.constant 0 : index
    %106 = vector.load %arg19[%c1_77, %c112_78, %c0_79] : memref<2x144x256xbf16, #tpu.memory_space<vmem>>, vector<1x16x256xbf16>
    %107 = vector.shape_cast %106 : vector<1x16x256xbf16> to vector<16x256xbf16>
    %108 = vector.shape_cast %105 : vector<16x256xbf16> to vector<1x16x256xbf16>
    tpu.vector_store %arg19[%c1_77, %c112_78, %c0_79], %108 {strides = array<i32>} : memref<2x144x256xbf16, #tpu.memory_space<vmem>>, vector<1x16x256xbf16>,
    %109 = vector.extract_strided_slice %48 {offsets = [240, 0], sizes = [16, 256], strides = [1, 1]} : vector<256x256xbf16> to vector<16x256xbf16>
    %c0_80 = arith.constant 0 : index
    %c128_81 = arith.constant 128 : index
    %c0_82 = arith.constant 0 : index
    %110 = vector.load %arg19[%c0_80, %c128_81, %c0_82] : memref<2x144x256xbf16, #tpu.memory_space<vmem>>, vector<1x16x256xbf16>
    %111 = vector.shape_cast %110 : vector<1x16x256xbf16> to vector<16x256xbf16>
    %112 = vector.shape_cast %109 : vector<16x256xbf16> to vector<1x16x256xbf16>
    tpu.vector_store %arg19[%c0_80, %c128_81, %c0_82], %112 {strides = array<i32>} : memref<2x144x256xbf16, #tpu.memory_space<vmem>>, vector<1x16x256xbf16>,
    %cst_83 = arith.constant 0.000000e+00 : f32
    %113 = vector.broadcast %cst_83 : f32 to vector<128x256xf32>
    %c0_84 = arith.constant 0 : index
    %c0_85 = arith.constant 0 : index
    %c0_86 = arith.constant 0 : index
    %114 = vector.load %arg19[%c0_84, %c0_85, %c0_86] : memref<2x144x256xbf16, #tpu.memory_space<vmem>>, vector<1x128x256xbf16>
    %115 = vector.shape_cast %114 : vector<1x128x256xbf16> to vector<128x256xbf16>
    %c0_87 = arith.constant 0 : index
    %c0_88 = arith.constant 0 : index
    %c0_89 = arith.constant 0 : index
    %116 = vector.load %arg4[%c0_87, %c0_88, %c0_89] : memref<4x256x256xbf16, #tpu.memory_space<vmem>>, vector<1x256x256xbf16>
    %117 = vector.shape_cast %116 : vector<1x256x256xbf16> to vector<256x256xbf16>
    %cst_90 = arith.constant dense<0.000000e+00> : vector<128x256xf32>
    %118 = tpu.matmul %115, %117, %cst_90 {dimension_numbers = #tpu.dot_dimension_numbers<[1], [0], [0], [1], [0, 0, 1, 1], [], []>} : vector<128x256xbf16>, vector<256x256xbf16>, vector<128x256xf32> -> vector<128x256xf32>
    %119 = arith.addf %113, %118 : vector<128x256xf32>
    %c1_91 = arith.constant 1 : index
    %c0_92 = arith.constant 0 : index
    %c0_93 = arith.constant 0 : index
    %120 = vector.load %arg19[%c1_91, %c0_92, %c0_93] : memref<2x144x256xbf16, #tpu.memory_space<vmem>>, vector<1x128x256xbf16>
    %121 = vector.shape_cast %120 : vector<1x128x256xbf16> to vector<128x256xbf16>
    %c1_94 = arith.constant 1 : index
    %c0_95 = arith.constant 0 : index
    %c0_96 = arith.constant 0 : index
    %122 = vector.load %arg4[%c1_94, %c0_95, %c0_96] : memref<4x256x256xbf16, #tpu.memory_space<vmem>>, vector<1x256x256xbf16>
    %123 = vector.shape_cast %122 : vector<1x256x256xbf16> to vector<256x256xbf16>
    %cst_97 = arith.constant dense<0.000000e+00> : vector<128x256xf32>
    %124 = tpu.matmul %121, %123, %cst_97 {dimension_numbers = #tpu.dot_dimension_numbers<[1], [0], [0], [1], [0, 0, 1, 1], [], []>} : vector<128x256xbf16>, vector<256x256xbf16>, vector<128x256xf32> -> vector<128x256xf32>
    %125 = arith.addf %119, %124 : vector<128x256xf32>
    %c0_98 = arith.constant 0 : index
    %c16_99 = arith.constant 16 : index
    %c0_100 = arith.constant 0 : index
    %126 = vector.load %arg19[%c0_98, %c16_99, %c0_100] : memref<2x144x256xbf16, #tpu.memory_space<vmem>>, vector<1x128x256xbf16>
    %127 = vector.shape_cast %126 : vector<1x128x256xbf16> to vector<128x256xbf16>
    %c2_101 = arith.constant 2 : index
    %c0_102 = arith.constant 0 : index
    %c0_103 = arith.constant 0 : index
    %128 = vector.load %arg4[%c2_101, %c0_102, %c0_103] : memref<4x256x256xbf16, #tpu.memory_space<vmem>>, vector<1x256x256xbf16>
    %129 = vector.shape_cast %128 : vector<1x256x256xbf16> to vector<256x256xbf16>
    %cst_104 = arith.constant dense<0.000000e+00> : vector<128x256xf32>
    %130 = tpu.matmul %127, %129, %cst_104 {dimension_numbers = #tpu.dot_dimension_numbers<[1], [0], [0], [1], [0, 0, 1, 1], [], []>} : vector<128x256xbf16>, vector<256x256xbf16>, vector<128x256xf32> -> vector<128x256xf32>
    %131 = arith.addf %125, %130 : vector<128x256xf32>
    %c1_105 = arith.constant 1 : index
    %c16_106 = arith.constant 16 : index
    %c0_107 = arith.constant 0 : index
    %132 = vector.load %arg19[%c1_105, %c16_106, %c0_107] : memref<2x144x256xbf16, #tpu.memory_space<vmem>>, vector<1x128x256xbf16>
    %133 = vector.shape_cast %132 : vector<1x128x256xbf16> to vector<128x256xbf16>
    %c3 = arith.constant 3 : index
    %c0_108 = arith.constant 0 : index
    %c0_109 = arith.constant 0 : index
    %134 = vector.load %arg4[%c3, %c0_108, %c0_109] : memref<4x256x256xbf16, #tpu.memory_space<vmem>>, vector<1x256x256xbf16>
    %135 = vector.shape_cast %134 : vector<1x256x256xbf16> to vector<256x256xbf16>
    %cst_110 = arith.constant dense<0.000000e+00> : vector<128x256xf32>
    %136 = tpu.matmul %133, %135, %cst_110 {dimension_numbers = #tpu.dot_dimension_numbers<[1], [0], [0], [1], [0, 0, 1, 1], [], []>} : vector<128x256xbf16>, vector<256x256xbf16>, vector<128x256xf32> -> vector<128x256xf32>
    %137 = arith.addf %131, %136 : vector<128x256xf32>
    %c0_111 = arith.constant 0 : index
    %c0_112 = arith.constant 0 : index
    %138 = vector.load %arg5[%c0_111, %c0_112] : memref<1x256xf32, #tpu.memory_space<vmem>>, vector<1x256xf32>
    %139 = vector.broadcast %138 : vector<1x256xf32> to vector<128x256xf32>
    %140 = arith.addf %137, %139 : vector<128x256xf32>
    %cst_113 = arith.constant 0.000000e+00 : f32
    %141 = vector.broadcast %cst_113 : f32 to vector<128x256xf32>
    %142 = arith.cmpf oge, %140, %141 : vector<128x256xf32>
    %cst_114 = arith.constant 0.00999999977 : f32
    %143 = vector.broadcast %cst_114 : f32 to vector<128x256xf32>
    %144 = arith.mulf %143, %140 : vector<128x256xf32>
    %145 = arith.select %142, %140, %144 : vector<128x256xi1>, vector<128x256xf32>
    %c0_115 = arith.constant 0 : index
    %c0_116 = arith.constant 0 : index
    %c0_117 = arith.constant 0 : index
    %146 = vector.load %arg15[%c0_115, %c0_116, %c0_117] : memref<1x128x256xf32, #tpu.memory_space<vmem>>, vector<1x128x256xf32>
    %147 = vector.shape_cast %146 : vector<1x128x256xf32> to vector<128x256xf32>
    %148 = vector.shape_cast %145 : vector<128x256xf32> to vector<1x128x256xf32>
    tpu.vector_store %arg15[%c0_115, %c0_116, %c0_117], %148 {strides = array<i32>} : memref<1x128x256xf32, #tpu.memory_space<vmem>>, vector<1x128x256xf32>,
    %149 = arith.truncf %145 : vector<128x256xf32> to vector<128x256xbf16>
    %150 = vector.extract_strided_slice %149 {offsets = [0, 0], sizes = [16, 256], strides = [1, 1]} : vector<128x256xbf16> to vector<16x256xbf16>
    %c1_118 = arith.constant 1 : index
    %c0_119 = arith.constant 0 : index
    %c0_120 = arith.constant 0 : index
    %151 = vector.load %arg20[%c1_118, %c0_119, %c0_120] : memref<2x80x256xbf16, #tpu.memory_space<vmem>>, vector<1x16x256xbf16>
    %152 = vector.shape_cast %151 : vector<1x16x256xbf16> to vector<16x256xbf16>
    %153 = vector.shape_cast %150 : vector<16x256xbf16> to vector<1x16x256xbf16>
    tpu.vector_store %arg20[%c1_118, %c0_119, %c0_120], %153 {strides = array<i32>} : memref<2x80x256xbf16, #tpu.memory_space<vmem>>, vector<1x16x256xbf16>,
    %154 = vector.extract_strided_slice %149 {offsets = [16, 0], sizes = [16, 256], strides = [1, 1]} : vector<128x256xbf16> to vector<16x256xbf16>
    %c0_121 = arith.constant 0 : index
    %c16_122 = arith.constant 16 : index
    %c0_123 = arith.constant 0 : index
    %155 = vector.load %arg20[%c0_121, %c16_122, %c0_123] : memref<2x80x256xbf16, #tpu.memory_space<vmem>>, vector<1x16x256xbf16>
    %156 = vector.shape_cast %155 : vector<1x16x256xbf16> to vector<16x256xbf16>
    %157 = vector.shape_cast %154 : vector<16x256xbf16> to vector<1x16x256xbf16>
    tpu.vector_store %arg20[%c0_121, %c16_122, %c0_123], %157 {strides = array<i32>} : memref<2x80x256xbf16, #tpu.memory_space<vmem>>, vector<1x16x256xbf16>,
    %158 = vector.extract_strided_slice %149 {offsets = [32, 0], sizes = [16, 256], strides = [1, 1]} : vector<128x256xbf16> to vector<16x256xbf16>
    %c1_124 = arith.constant 1 : index
    %c16_125 = arith.constant 16 : index
    %c0_126 = arith.constant 0 : index
    %159 = vector.load %arg20[%c1_124, %c16_125, %c0_126] : memref<2x80x256xbf16, #tpu.memory_space<vmem>>, vector<1x16x256xbf16>
    %160 = vector.shape_cast %159 : vector<1x16x256xbf16> to vector<16x256xbf16>
    %161 = vector.shape_cast %158 : vector<16x256xbf16> to vector<1x16x256xbf16>
    tpu.vector_store %arg20[%c1_124, %c16_125, %c0_126], %161 {strides = array<i32>} : memref<2x80x256xbf16, #tpu.memory_space<vmem>>, vector<1x16x256xbf16>,
    %162 = vector.extract_strided_slice %149 {offsets = [48, 0], sizes = [16, 256], strides = [1, 1]} : vector<128x256xbf16> to vector<16x256xbf16>
    %c0_127 = arith.constant 0 : index
    %c32_128 = arith.constant 32 : index
    %c0_129 = arith.constant 0 : index
    %163 = vector.load %arg20[%c0_127, %c32_128, %c0_129] : memref<2x80x256xbf16, #tpu.memory_space<vmem>>, vector<1x16x256xbf16>
    %164 = vector.shape_cast %163 : vector<1x16x256xbf16> to vector<16x256xbf16>
    %165 = vector.shape_cast %162 : vector<16x256xbf16> to vector<1x16x256xbf16>
    tpu.vector_store %arg20[%c0_127, %c32_128, %c0_129], %165 {strides = array<i32>} : memref<2x80x256xbf16, #tpu.memory_space<vmem>>, vector<1x16x256xbf16>,
    %166 = vector.extract_strided_slice %149 {offsets = [64, 0], sizes = [16, 256], strides = [1, 1]} : vector<128x256xbf16> to vector<16x256xbf16>
    %c1_130 = arith.constant 1 : index
    %c32_131 = arith.constant 32 : index
    %c0_132 = arith.constant 0 : index
    %167 = vector.load %arg20[%c1_130, %c32_131, %c0_132] : memref<2x80x256xbf16, #tpu.memory_space<vmem>>, vector<1x16x256xbf16>
    %168 = vector.shape_cast %167 : vector<1x16x256xbf16> to vector<16x256xbf16>
    %169 = vector.shape_cast %166 : vector<16x256xbf16> to vector<1x16x256xbf16>
    tpu.vector_store %arg20[%c1_130, %c32_131, %c0_132], %169 {strides = array<i32>} : memref<2x80x256xbf16, #tpu.memory_space<vmem>>, vector<1x16x256xbf16>,
    %170 = vector.extract_strided_slice %149 {offsets = [80, 0], sizes = [16, 256], strides = [1, 1]} : vector<128x256xbf16> to vector<16x256xbf16>
    %c0_133 = arith.constant 0 : index
    %c48_134 = arith.constant 48 : index
    %c0_135 = arith.constant 0 : index
    %171 = vector.load %arg20[%c0_133, %c48_134, %c0_135] : memref<2x80x256xbf16, #tpu.memory_space<vmem>>, vector<1x16x256xbf16>
    %172 = vector.shape_cast %171 : vector<1x16x256xbf16> to vector<16x256xbf16>
    %173 = vector.shape_cast %170 : vector<16x256xbf16> to vector<1x16x256xbf16>
    tpu.vector_store %arg20[%c0_133, %c48_134, %c0_135], %173 {strides = array<i32>} : memref<2x80x256xbf16, #tpu.memory_space<vmem>>, vector<1x16x256xbf16>,
    %174 = vector.extract_strided_slice %149 {offsets = [96, 0], sizes = [16, 256], strides = [1, 1]} : vector<128x256xbf16> to vector<16x256xbf16>
    %c1_136 = arith.constant 1 : index
    %c48_137 = arith.constant 48 : index
    %c0_138 = arith.constant 0 : index
    %175 = vector.load %arg20[%c1_136, %c48_137, %c0_138] : memref<2x80x256xbf16, #tpu.memory_space<vmem>>, vector<1x16x256xbf16>
    %176 = vector.shape_cast %175 : vector<1x16x256xbf16> to vector<16x256xbf16>
    %177 = vector.shape_cast %174 : vector<16x256xbf16> to vector<1x16x256xbf16>
    tpu.vector_store %arg20[%c1_136, %c48_137, %c0_138], %177 {strides = array<i32>} : memref<2x80x256xbf16, #tpu.memory_space<vmem>>, vector<1x16x256xbf16>,
    %178 = vector.extract_strided_slice %149 {offsets = [112, 0], sizes = [16, 256], strides = [1, 1]} : vector<128x256xbf16> to vector<16x256xbf16>
    %c0_139 = arith.constant 0 : index
    %c64_140 = arith.constant 64 : index
    %c0_141 = arith.constant 0 : index
    %179 = vector.load %arg20[%c0_139, %c64_140, %c0_141] : memref<2x80x256xbf16, #tpu.memory_space<vmem>>, vector<1x16x256xbf16>
    %180 = vector.shape_cast %179 : vector<1x16x256xbf16> to vector<16x256xbf16>
    %181 = vector.shape_cast %178 : vector<16x256xbf16> to vector<1x16x256xbf16>
    tpu.vector_store %arg20[%c0_139, %c64_140, %c0_141], %181 {strides = array<i32>} : memref<2x80x256xbf16, #tpu.memory_space<vmem>>, vector<1x16x256xbf16>,
    %cst_142 = arith.constant 0.000000e+00 : f32
    %182 = vector.broadcast %cst_142 : f32 to vector<64x256xf32>
    %c0_143 = arith.constant 0 : index
    %c0_144 = arith.constant 0 : index
    %c0_145 = arith.constant 0 : index
    %183 = vector.load %arg20[%c0_143, %c0_144, %c0_145] : memref<2x80x256xbf16, #tpu.memory_space<vmem>>, vector<1x64x256xbf16>
    %184 = vector.shape_cast %183 : vector<1x64x256xbf16> to vector<64x256xbf16>
    %c0_146 = arith.constant 0 : index
    %c0_147 = arith.constant 0 : index
    %c0_148 = arith.constant 0 : index
    %185 = vector.load %arg6[%c0_146, %c0_147, %c0_148] : memref<4x256x256xbf16, #tpu.memory_space<vmem>>, vector<1x256x256xbf16>
    %186 = vector.shape_cast %185 : vector<1x256x256xbf16> to vector<256x256xbf16>
    %cst_149 = arith.constant dense<0.000000e+00> : vector<64x256xf32>
    %187 = tpu.matmul %184, %186, %cst_149 {dimension_numbers = #tpu.dot_dimension_numbers<[1], [0], [0], [1], [0, 0, 1, 1], [], []>} : vector<64x256xbf16>, vector<256x256xbf16>, vector<64x256xf32> -> vector<64x256xf32>
    %188 = arith.addf %182, %187 : vector<64x256xf32>
    %c1_150 = arith.constant 1 : index
    %c0_151 = arith.constant 0 : index
    %c0_152 = arith.constant 0 : index
    %189 = vector.load %arg20[%c1_150, %c0_151, %c0_152] : memref<2x80x256xbf16, #tpu.memory_space<vmem>>, vector<1x64x256xbf16>
    %190 = vector.shape_cast %189 : vector<1x64x256xbf16> to vector<64x256xbf16>
    %c1_153 = arith.constant 1 : index
    %c0_154 = arith.constant 0 : index
    %c0_155 = arith.constant 0 : index
    %191 = vector.load %arg6[%c1_153, %c0_154, %c0_155] : memref<4x256x256xbf16, #tpu.memory_space<vmem>>, vector<1x256x256xbf16>
    %192 = vector.shape_cast %191 : vector<1x256x256xbf16> to vector<256x256xbf16>
    %cst_156 = arith.constant dense<0.000000e+00> : vector<64x256xf32>
    %193 = tpu.matmul %190, %192, %cst_156 {dimension_numbers = #tpu.dot_dimension_numbers<[1], [0], [0], [1], [0, 0, 1, 1], [], []>} : vector<64x256xbf16>, vector<256x256xbf16>, vector<64x256xf32> -> vector<64x256xf32>
    %194 = arith.addf %188, %193 : vector<64x256xf32>
    %c0_157 = arith.constant 0 : index
    %c16_158 = arith.constant 16 : index
    %c0_159 = arith.constant 0 : index
    %195 = vector.load %arg20[%c0_157, %c16_158, %c0_159] : memref<2x80x256xbf16, #tpu.memory_space<vmem>>, vector<1x64x256xbf16>
    %196 = vector.shape_cast %195 : vector<1x64x256xbf16> to vector<64x256xbf16>
    %c2_160 = arith.constant 2 : index
    %c0_161 = arith.constant 0 : index
    %c0_162 = arith.constant 0 : index
    %197 = vector.load %arg6[%c2_160, %c0_161, %c0_162] : memref<4x256x256xbf16, #tpu.memory_space<vmem>>, vector<1x256x256xbf16>
    %198 = vector.shape_cast %197 : vector<1x256x256xbf16> to vector<256x256xbf16>
    %cst_163 = arith.constant dense<0.000000e+00> : vector<64x256xf32>
    %199 = tpu.matmul %196, %198, %cst_163 {dimension_numbers = #tpu.dot_dimension_numbers<[1], [0], [0], [1], [0, 0, 1, 1], [], []>} : vector<64x256xbf16>, vector<256x256xbf16>, vector<64x256xf32> -> vector<64x256xf32>
    %200 = arith.addf %194, %199 : vector<64x256xf32>
    %c1_164 = arith.constant 1 : index
    %c16_165 = arith.constant 16 : index
    %c0_166 = arith.constant 0 : index
    %201 = vector.load %arg20[%c1_164, %c16_165, %c0_166] : memref<2x80x256xbf16, #tpu.memory_space<vmem>>, vector<1x64x256xbf16>
    %202 = vector.shape_cast %201 : vector<1x64x256xbf16> to vector<64x256xbf16>
    %c3_167 = arith.constant 3 : index
    %c0_168 = arith.constant 0 : index
    %c0_169 = arith.constant 0 : index
    %203 = vector.load %arg6[%c3_167, %c0_168, %c0_169] : memref<4x256x256xbf16, #tpu.memory_space<vmem>>, vector<1x256x256xbf16>
    %204 = vector.shape_cast %203 : vector<1x256x256xbf16> to vector<256x256xbf16>
    %cst_170 = arith.constant dense<0.000000e+00> : vector<64x256xf32>
    %205 = tpu.matmul %202, %204, %cst_170 {dimension_numbers = #tpu.dot_dimension_numbers<[1], [0], [0], [1], [0, 0, 1, 1], [], []>} : vector<64x256xbf16>, vector<256x256xbf16>, vector<64x256xf32> -> vector<64x256xf32>
    %206 = arith.addf %200, %205 : vector<64x256xf32>
    %c0_171 = arith.constant 0 : index
    %c0_172 = arith.constant 0 : index
    %207 = vector.load %arg7[%c0_171, %c0_172] : memref<1x256xf32, #tpu.memory_space<vmem>>, vector<1x256xf32>
    %208 = vector.broadcast %207 : vector<1x256xf32> to vector<64x256xf32>
    %209 = arith.addf %206, %208 : vector<64x256xf32>
    %cst_173 = arith.constant 0.000000e+00 : f32
    %210 = vector.broadcast %cst_173 : f32 to vector<64x256xf32>
    %211 = arith.cmpf oge, %209, %210 : vector<64x256xf32>
    %cst_174 = arith.constant 0.00999999977 : f32
    %212 = vector.broadcast %cst_174 : f32 to vector<64x256xf32>
    %213 = arith.mulf %212, %209 : vector<64x256xf32>
    %214 = arith.select %211, %209, %213 : vector<64x256xi1>, vector<64x256xf32>
    %c0_175 = arith.constant 0 : index
    %c0_176 = arith.constant 0 : index
    %c0_177 = arith.constant 0 : index
    %215 = vector.load %arg16[%c0_175, %c0_176, %c0_177] : memref<1x64x256xf32, #tpu.memory_space<vmem>>, vector<1x64x256xf32>
    %216 = vector.shape_cast %215 : vector<1x64x256xf32> to vector<64x256xf32>
    %217 = vector.shape_cast %214 : vector<64x256xf32> to vector<1x64x256xf32>
    tpu.vector_store %arg16[%c0_175, %c0_176, %c0_177], %217 {strides = array<i32>} : memref<1x64x256xf32, #tpu.memory_space<vmem>>, vector<1x64x256xf32>,
    %218 = arith.truncf %214 : vector<64x256xf32> to vector<64x256xbf16>
    %219 = vector.extract_strided_slice %218 {offsets = [0, 0], sizes = [16, 256], strides = [1, 1]} : vector<64x256xbf16> to vector<16x256xbf16>
    %c1_178 = arith.constant 1 : index
    %c0_179 = arith.constant 0 : index
    %c0_180 = arith.constant 0 : index
    %220 = vector.load %arg21[%c1_178, %c0_179, %c0_180] : memref<2x48x256xbf16, #tpu.memory_space<vmem>>, vector<1x16x256xbf16>
    %221 = vector.shape_cast %220 : vector<1x16x256xbf16> to vector<16x256xbf16>
    %222 = vector.shape_cast %219 : vector<16x256xbf16> to vector<1x16x256xbf16>
    tpu.vector_store %arg21[%c1_178, %c0_179, %c0_180], %222 {strides = array<i32>} : memref<2x48x256xbf16, #tpu.memory_space<vmem>>, vector<1x16x256xbf16>,
    %223 = vector.extract_strided_slice %218 {offsets = [16, 0], sizes = [16, 256], strides = [1, 1]} : vector<64x256xbf16> to vector<16x256xbf16>
    %c0_181 = arith.constant 0 : index
    %c16_182 = arith.constant 16 : index
    %c0_183 = arith.constant 0 : index
    %224 = vector.load %arg21[%c0_181, %c16_182, %c0_183] : memref<2x48x256xbf16, #tpu.memory_space<vmem>>, vector<1x16x256xbf16>
    %225 = vector.shape_cast %224 : vector<1x16x256xbf16> to vector<16x256xbf16>
    %226 = vector.shape_cast %223 : vector<16x256xbf16> to vector<1x16x256xbf16>
    tpu.vector_store %arg21[%c0_181, %c16_182, %c0_183], %226 {strides = array<i32>} : memref<2x48x256xbf16, #tpu.memory_space<vmem>>, vector<1x16x256xbf16>,
    %227 = vector.extract_strided_slice %218 {offsets = [32, 0], sizes = [16, 256], strides = [1, 1]} : vector<64x256xbf16> to vector<16x256xbf16>
    %c1_184 = arith.constant 1 : index
    %c16_185 = arith.constant 16 : index
    %c0_186 = arith.constant 0 : index
    %228 = vector.load %arg21[%c1_184, %c16_185, %c0_186] : memref<2x48x256xbf16, #tpu.memory_space<vmem>>, vector<1x16x256xbf16>
    %229 = vector.shape_cast %228 : vector<1x16x256xbf16> to vector<16x256xbf16>
    %230 = vector.shape_cast %227 : vector<16x256xbf16> to vector<1x16x256xbf16>
    tpu.vector_store %arg21[%c1_184, %c16_185, %c0_186], %230 {strides = array<i32>} : memref<2x48x256xbf16, #tpu.memory_space<vmem>>, vector<1x16x256xbf16>,
    %231 = vector.extract_strided_slice %218 {offsets = [48, 0], sizes = [16, 256], strides = [1, 1]} : vector<64x256xbf16> to vector<16x256xbf16>
    %c0_187 = arith.constant 0 : index
    %c32_188 = arith.constant 32 : index
    %c0_189 = arith.constant 0 : index
    %232 = vector.load %arg21[%c0_187, %c32_188, %c0_189] : memref<2x48x256xbf16, #tpu.memory_space<vmem>>, vector<1x16x256xbf16>
    %233 = vector.shape_cast %232 : vector<1x16x256xbf16> to vector<16x256xbf16>
    %234 = vector.shape_cast %231 : vector<16x256xbf16> to vector<1x16x256xbf16>
    tpu.vector_store %arg21[%c0_187, %c32_188, %c0_189], %234 {strides = array<i32>} : memref<2x48x256xbf16, #tpu.memory_space<vmem>>, vector<1x16x256xbf16>,
    %cst_190 = arith.constant 0.000000e+00 : f32
    %235 = vector.broadcast %cst_190 : f32 to vector<32x256xf32>
    %c0_191 = arith.constant 0 : index
    %c0_192 = arith.constant 0 : index
    %c0_193 = arith.constant 0 : index
    %236 = vector.load %arg21[%c0_191, %c0_192, %c0_193] : memref<2x48x256xbf16, #tpu.memory_space<vmem>>, vector<1x32x256xbf16>
    %237 = vector.shape_cast %236 : vector<1x32x256xbf16> to vector<32x256xbf16>
    %c0_194 = arith.constant 0 : index
    %c0_195 = arith.constant 0 : index
    %c0_196 = arith.constant 0 : index
    %238 = vector.load %arg8[%c0_194, %c0_195, %c0_196] : memref<4x256x256xbf16, #tpu.memory_space<vmem>>, vector<1x256x256xbf16>
    %239 = vector.shape_cast %238 : vector<1x256x256xbf16> to vector<256x256xbf16>
    %cst_197 = arith.constant dense<0.000000e+00> : vector<32x256xf32>
    %240 = tpu.matmul %237, %239, %cst_197 {dimension_numbers = #tpu.dot_dimension_numbers<[1], [0], [0], [1], [0, 0, 1, 1], [], []>} : vector<32x256xbf16>, vector<256x256xbf16>, vector<32x256xf32> -> vector<32x256xf32>
    %241 = arith.addf %235, %240 : vector<32x256xf32>
    %c1_198 = arith.constant 1 : index
    %c0_199 = arith.constant 0 : index
    %c0_200 = arith.constant 0 : index
    %242 = vector.load %arg21[%c1_198, %c0_199, %c0_200] : memref<2x48x256xbf16, #tpu.memory_space<vmem>>, vector<1x32x256xbf16>
    %243 = vector.shape_cast %242 : vector<1x32x256xbf16> to vector<32x256xbf16>
    %c1_201 = arith.constant 1 : index
    %c0_202 = arith.constant 0 : index
    %c0_203 = arith.constant 0 : index
    %244 = vector.load %arg8[%c1_201, %c0_202, %c0_203] : memref<4x256x256xbf16, #tpu.memory_space<vmem>>, vector<1x256x256xbf16>
    %245 = vector.shape_cast %244 : vector<1x256x256xbf16> to vector<256x256xbf16>
    %cst_204 = arith.constant dense<0.000000e+00> : vector<32x256xf32>
    %246 = tpu.matmul %243, %245, %cst_204 {dimension_numbers = #tpu.dot_dimension_numbers<[1], [0], [0], [1], [0, 0, 1, 1], [], []>} : vector<32x256xbf16>, vector<256x256xbf16>, vector<32x256xf32> -> vector<32x256xf32>
    %247 = arith.addf %241, %246 : vector<32x256xf32>
    %c0_205 = arith.constant 0 : index
    %c16_206 = arith.constant 16 : index
    %c0_207 = arith.constant 0 : index
    %248 = vector.load %arg21[%c0_205, %c16_206, %c0_207] : memref<2x48x256xbf16, #tpu.memory_space<vmem>>, vector<1x32x256xbf16>
    %249 = vector.shape_cast %248 : vector<1x32x256xbf16> to vector<32x256xbf16>
    %c2_208 = arith.constant 2 : index
    %c0_209 = arith.constant 0 : index
    %c0_210 = arith.constant 0 : index
    %250 = vector.load %arg8[%c2_208, %c0_209, %c0_210] : memref<4x256x256xbf16, #tpu.memory_space<vmem>>, vector<1x256x256xbf16>
    %251 = vector.shape_cast %250 : vector<1x256x256xbf16> to vector<256x256xbf16>
    %cst_211 = arith.constant dense<0.000000e+00> : vector<32x256xf32>
    %252 = tpu.matmul %249, %251, %cst_211 {dimension_numbers = #tpu.dot_dimension_numbers<[1], [0], [0], [1], [0, 0, 1, 1], [], []>} : vector<32x256xbf16>, vector<256x256xbf16>, vector<32x256xf32> -> vector<32x256xf32>
    %253 = arith.addf %247, %252 : vector<32x256xf32>
    %c1_212 = arith.constant 1 : index
    %c16_213 = arith.constant 16 : index
    %c0_214 = arith.constant 0 : index
    %254 = vector.load %arg21[%c1_212, %c16_213, %c0_214] : memref<2x48x256xbf16, #tpu.memory_space<vmem>>, vector<1x32x256xbf16>
    %255 = vector.shape_cast %254 : vector<1x32x256xbf16> to vector<32x256xbf16>
    %c3_215 = arith.constant 3 : index
    %c0_216 = arith.constant 0 : index
    %c0_217 = arith.constant 0 : index
    %256 = vector.load %arg8[%c3_215, %c0_216, %c0_217] : memref<4x256x256xbf16, #tpu.memory_space<vmem>>, vector<1x256x256xbf16>
    %257 = vector.shape_cast %256 : vector<1x256x256xbf16> to vector<256x256xbf16>
    %cst_218 = arith.constant dense<0.000000e+00> : vector<32x256xf32>
    %258 = tpu.matmul %255, %257, %cst_218 {dimension_numbers = #tpu.dot_dimension_numbers<[1], [0], [0], [1], [0, 0, 1, 1], [], []>} : vector<32x256xbf16>, vector<256x256xbf16>, vector<32x256xf32> -> vector<32x256xf32>
    %259 = arith.addf %253, %258 : vector<32x256xf32>
    %c0_219 = arith.constant 0 : index
    %c0_220 = arith.constant 0 : index
    %260 = vector.load %arg9[%c0_219, %c0_220] : memref<1x256xf32, #tpu.memory_space<vmem>>, vector<1x256xf32>
    %261 = vector.broadcast %260 : vector<1x256xf32> to vector<32x256xf32>
    %262 = arith.addf %259, %261 : vector<32x256xf32>
    %cst_221 = arith.constant 0.000000e+00 : f32
    %263 = vector.broadcast %cst_221 : f32 to vector<32x256xf32>
    %264 = arith.cmpf oge, %262, %263 : vector<32x256xf32>
    %cst_222 = arith.constant 0.00999999977 : f32
    %265 = vector.broadcast %cst_222 : f32 to vector<32x256xf32>
    %266 = arith.mulf %265, %262 : vector<32x256xf32>
    %267 = arith.select %264, %262, %266 : vector<32x256xi1>, vector<32x256xf32>
    %c0_223 = arith.constant 0 : index
    %c0_224 = arith.constant 0 : index
    %c0_225 = arith.constant 0 : index
    %268 = vector.load %arg17[%c0_223, %c0_224, %c0_225] : memref<1x32x256xf32, #tpu.memory_space<vmem>>, vector<1x32x256xf32>
    %269 = vector.shape_cast %268 : vector<1x32x256xf32> to vector<32x256xf32>
    %270 = vector.shape_cast %267 : vector<32x256xf32> to vector<1x32x256xf32>
    tpu.vector_store %arg17[%c0_223, %c0_224, %c0_225], %270 {strides = array<i32>} : memref<1x32x256xf32, #tpu.memory_space<vmem>>, vector<1x32x256xf32>,
    %271 = arith.truncf %267 : vector<32x256xf32> to vector<32x256xbf16>
    %272 = vector.extract_strided_slice %271 {offsets = [0, 0], sizes = [16, 256], strides = [1, 1]} : vector<32x256xbf16> to vector<16x256xbf16>
    %c0_226 = arith.constant 0 : index
    %c0_227 = arith.constant 0 : index
    %c0_228 = arith.constant 0 : index
    %273 = vector.load %arg10[%c0_226, %c0_227, %c0_228] : memref<2x256x256xbf16, #tpu.memory_space<vmem>>, vector<1x256x256xbf16>
    %274 = vector.shape_cast %273 : vector<1x256x256xbf16> to vector<256x256xbf16>
    %cst_229 = arith.constant dense<0.000000e+00> : vector<16x256xf32>
    %275 = tpu.matmul %272, %274, %cst_229 {dimension_numbers = #tpu.dot_dimension_numbers<[1], [0], [0], [1], [0, 0, 1, 1], [], []>} : vector<16x256xbf16>, vector<256x256xbf16>, vector<16x256xf32> -> vector<16x256xf32>
    %276 = vector.extract_strided_slice %271 {offsets = [16, 0], sizes = [16, 256], strides = [1, 1]} : vector<32x256xbf16> to vector<16x256xbf16>
    %c1_230 = arith.constant 1 : index
    %c0_231 = arith.constant 0 : index
    %c0_232 = arith.constant 0 : index
    %277 = vector.load %arg10[%c1_230, %c0_231, %c0_232] : memref<2x256x256xbf16, #tpu.memory_space<vmem>>, vector<1x256x256xbf16>
    %278 = vector.shape_cast %277 : vector<1x256x256xbf16> to vector<256x256xbf16>
    %cst_233 = arith.constant dense<0.000000e+00> : vector<16x256xf32>
    %279 = tpu.matmul %276, %278, %cst_233 {dimension_numbers = #tpu.dot_dimension_numbers<[1], [0], [0], [1], [0, 0, 1, 1], [], []>} : vector<16x256xbf16>, vector<256x256xbf16>, vector<16x256xf32> -> vector<16x256xf32>
    %280 = arith.addf %275, %279 : vector<16x256xf32>
    %c0_234 = arith.constant 0 : index
    %c0_235 = arith.constant 0 : index
    %281 = vector.load %arg11[%c0_234, %c0_235] : memref<1x256xf32, #tpu.memory_space<vmem>>, vector<1x256xf32>
    %282 = vector.broadcast %281 : vector<1x256xf32> to vector<16x256xf32>
    %283 = arith.addf %280, %282 : vector<16x256xf32>
    %cst_236 = arith.constant 0.000000e+00 : f32
    %284 = vector.broadcast %cst_236 : f32 to vector<16x256xf32>
    %285 = arith.cmpf oge, %283, %284 : vector<16x256xf32>
    %cst_237 = arith.constant 0.00999999977 : f32
    %286 = vector.broadcast %cst_237 : f32 to vector<16x256xf32>
    %287 = arith.mulf %286, %283 : vector<16x256xf32>
    %288 = arith.select %285, %283, %287 : vector<16x256xi1>, vector<16x256xf32>
    %c0_238 = arith.constant 0 : index
    %c0_239 = arith.constant 0 : index
    %c0_240 = arith.constant 0 : index
    %289 = vector.load %arg18[%c0_238, %c0_239, %c0_240] : memref<1x16x256xf32, #tpu.memory_space<vmem>>, vector<1x16x256xf32>
    %290 = vector.shape_cast %289 : vector<1x16x256xf32> to vector<16x256xf32>
    %291 = vector.shape_cast %288 : vector<16x256xf32> to vector<1x16x256xf32>
    tpu.vector_store %arg18[%c0_238, %c0_239, %c0_240], %291 {strides = array<i32>} : memref<1x16x256xf32, #tpu.memory_space<vmem>>, vector<1x16x256xf32>,
    %292 = arith.truncf %288 : vector<16x256xf32> to vector<16x256xbf16>
    %c0_241 = arith.constant 0 : index
    %c0_242 = arith.constant 0 : index
    %293 = vector.load %arg12[%c0_241, %c0_242] : memref<256x128xbf16, #tpu.memory_space<vmem>>, vector<256x128xbf16>
    %cst_243 = arith.constant dense<0.000000e+00> : vector<16x128xf32>
    %294 = tpu.matmul %292, %293, %cst_243 {dimension_numbers = #tpu.dot_dimension_numbers<[1], [0], [0], [1], [0, 0, 1, 1], [], []>} : vector<16x256xbf16>, vector<256x128xbf16>, vector<16x128xf32> -> vector<16x128xf32>
    %c0_244 = arith.constant 0 : index
    %c0_245 = arith.constant 0 : index
    %295 = vector.load %arg13[%c0_244, %c0_245] : memref<1x128xf32, #tpu.memory_space<vmem>>, vector<1x128xf32>
    %296 = vector.broadcast %295 : vector<1x128xf32> to vector<16x128xf32>
    %297 = arith.addf %294, %296 : vector<16x128xf32>
    %c0_246 = arith.constant 0 : index
    %c0_247 = arith.constant 0 : index
    %c0_248 = arith.constant 0 : index
    %298 = vector.load %arg14[%c0_246, %c0_247, %c0_248] : memref<1x16x128xf32, #tpu.memory_space<vmem>>, vector<1x16x128xf32>
    %299 = vector.shape_cast %298 : vector<1x16x128xf32> to vector<16x128xf32>
    %300 = vector.shape_cast %297 : vector<16x128xf32> to vector<1x16x128xf32>
    tpu.vector_store %arg14[%c0_246, %c0_247, %c0_248], %300 {strides = array<i32>} : memref<1x16x128xf32, #tpu.memory_space<vmem>>, vector<1x16x128xf32>,
    return
  }
  func.func @transform_0(%arg0: i32) -> (i32, i32, i32) {
    %c0_i32 = arith.constant 0 : i32
    %c0_i32_0 = arith.constant 0 : i32
    %c0_i32_1 = arith.constant 0 : i32
    return %arg0, %c0_i32, %c0_i32_0 : i32, i32, i32
  }
  func.func @transform_1(%arg0: i32) -> (i32, i32, i32) {
    %c0_i32 = arith.constant 0 : i32
    %c0_i32_0 = arith.constant 0 : i32
    %c0_i32_1 = arith.constant 0 : i32
    %c0_i32_2 = arith.constant 0 : i32
    return %c0_i32, %c0_i32_0, %c0_i32_1 : i32, i32, i32
  }
  func.func @transform_2(%arg0: i32) -> (i32, i32) {
    %c0_i32 = arith.constant 0 : i32
    %c0_i32_0 = arith.constant 0 : i32
    %c0_i32_1 = arith.constant 0 : i32
    return %c0_i32, %c0_i32_0 : i32, i32
  }
  func.func @transform_3(%arg0: i32) -> (i32, i32, i32) {
    %c0_i32 = arith.constant 0 : i32
    %c0_i32_0 = arith.constant 0 : i32
    %c0_i32_1 = arith.constant 0 : i32
    %c0_i32_2 = arith.constant 0 : i32
    return %c0_i32, %c0_i32_0, %c0_i32_1 : i32, i32, i32
  }
  func.func @transform_4(%arg0: i32) -> (i32, i32) {
    %c0_i32 = arith.constant 0 : i32
    %c0_i32_0 = arith.constant 0 : i32
    %c0_i32_1 = arith.constant 0 : i32
    return %c0_i32, %c0_i32_0 : i32, i32
  }
  func.func @transform_5(%arg0: i32) -> (i32, i32, i32) {
    %c0_i32 = arith.constant 0 : i32
    %c0_i32_0 = arith.constant 0 : i32
    %c0_i32_1 = arith.constant 0 : i32
    %c0_i32_2 = arith.constant 0 : i32
    return %c0_i32, %c0_i32_0, %c0_i32_1 : i32, i32, i32
  }
  func.func @transform_6(%arg0: i32) -> (i32, i32) {
    %c0_i32 = arith.constant 0 : i32
    %c0_i32_0 = arith.constant 0 : i32
    %c0_i32_1 = arith.constant 0 : i32
    return %c0_i32, %c0_i32_0 : i32, i32
  }
  func.func @transform_7(%arg0: i32) -> (i32, i32, i32) {
    %c0_i32 = arith.constant 0 : i32
    %c0_i32_0 = arith.constant 0 : i32
    %c0_i32_1 = arith.constant 0 : i32
    %c0_i32_2 = arith.constant 0 : i32
    return %c0_i32, %c0_i32_0, %c0_i32_1 : i32, i32, i32
  }
  func.func @transform_8(%arg0: i32) -> (i32, i32) {
    %c0_i32 = arith.constant 0 : i32
    %c0_i32_0 = arith.constant 0 : i32
    %c0_i32_1 = arith.constant 0 : i32
    return %c0_i32, %c0_i32_0 : i32, i32
  }
  func.func @transform_9(%arg0: i32) -> (i32, i32, i32) {
    %c0_i32 = arith.constant 0 : i32
    %c0_i32_0 = arith.constant 0 : i32
    %c0_i32_1 = arith.constant 0 : i32
    %c0_i32_2 = arith.constant 0 : i32
    return %c0_i32, %c0_i32_0, %c0_i32_1 : i32, i32, i32
  }
  func.func @transform_10(%arg0: i32) -> (i32, i32) {
    %c0_i32 = arith.constant 0 : i32
    %c0_i32_0 = arith.constant 0 : i32
    %c0_i32_1 = arith.constant 0 : i32
    return %c0_i32, %c0_i32_0 : i32, i32
  }
  func.func @transform_11(%arg0: i32) -> (i32, i32) {
    %c0_i32 = arith.constant 0 : i32
    %c0_i32_0 = arith.constant 0 : i32
    %c0_i32_1 = arith.constant 0 : i32
    return %c0_i32, %c0_i32_0 : i32, i32
  }
  func.func @transform_12(%arg0: i32) -> (i32, i32) {
    %c0_i32 = arith.constant 0 : i32
    %c0_i32_0 = arith.constant 0 : i32
    %c0_i32_1 = arith.constant 0 : i32
    return %c0_i32, %c0_i32_0 : i32, i32
  }
  func.func @transform_13(%arg0: i32) -> (i32, i32, i32) {
    %c0_i32 = arith.constant 0 : i32
    %c0_i32_0 = arith.constant 0 : i32
    %c0_i32_1 = arith.constant 0 : i32
    return %arg0, %c0_i32, %c0_i32_0 : i32, i32, i32
  }
  func.func @transform_14(%arg0: i32) -> (i32, i32, i32) {
    %c0_i32 = arith.constant 0 : i32
    %c0_i32_0 = arith.constant 0 : i32
    %c0_i32_1 = arith.constant 0 : i32
    return %arg0, %c0_i32, %c0_i32_0 : i32, i32, i32
  }
  func.func @transform_15(%arg0: i32) -> (i32, i32, i32) {
    %c0_i32 = arith.constant 0 : i32
    %c0_i32_0 = arith.constant 0 : i32
    %c0_i32_1 = arith.constant 0 : i32
    return %arg0, %c0_i32, %c0_i32_0 : i32, i32, i32
  }
  func.func @transform_16(%arg0: i32) -> (i32, i32, i32) {
    %c0_i32 = arith.constant 0 : i32
    %c0_i32_0 = arith.constant 0 : i32
    %c0_i32_1 = arith.constant 0 : i32
    return %arg0, %c0_i32, %c0_i32_0 : i32, i32, i32
  }
  func.func @transform_17(%arg0: i32) -> (i32, i32, i32) {
    %c0_i32 = arith.constant 0 : i32
    %c0_i32_0 = arith.constant 0 : i32
    %c0_i32_1 = arith.constant 0 : i32
    return %arg0, %c0_i32, %c0_i32_0 : i32, i32, i32
  }
}

</mosaic_0001>

<bundles_post_ra>
// kernel: tile.24
= control target key start
LH: loop header
LB: loop body
LE: loop exit
PB: predicated region body
PF: predicated region fallthrough
CT: control target
= control target key end

     0   :  { %s28_s0 = inlined_call_operand.vmem [shape: f32[16], index: 0, kind: input, shape index: {}]   ;;  %s29_s1 = inlined_call_operand.vmem [shape: f32[16,16], index: 1, kind: output, shape index: {}]  }
   0x1   :  { %v4_v0 = vld [vmem:[%s28_s0] ss:$0 sm:$0xff] }
   0x2   :  { %5 = vst [vmem:[%s29_s1] sm:$0xff] %v4_v0  ;;  %8 = vst [vmem:[%s29_s1 + $0x8] sm:$0xff] %v4_v0 }

// kernel: tile.25
= control target key start
LH: loop header
LB: loop body
LE: loop exit
PB: predicated region body
PF: predicated region fallthrough
CT: control target
= control target key end

     0   :  { %s7_s6 = smov 3  ;;  %s21_s9 = smov 3  ;;  %vm4_vm0 = vcmask 130048   ;;  %vm11_vm1 = vcmask 1048448   ;;  %vm18_vm2 = vcmask 917248   ;;  %vm25_vm3 = vcmask 786048   ;;  %s128_s0 = inlined_call_operand.vmem [shape: f32[16,16], index: 0, kind: input, shape index: {}]   ;;  %s129_s1 = inlined_call_operand.vmem [shape: f32[1,256], index: 1, kind: output, shape index: {}]  }
   0x1   :  { %v66_v0 = vld [vmem:[%s128_s0 + $0x7] ss:$8 sm:%s7_s6]   ;;  %s81_s10 = smov 112   ;;  %v68_v1 = vld [vmem:[%s128_s0 + $0x5] ss:$8 sm:%s21_s9]   ;;  %s14_s13 = smov 3 }
   0x2   :  { %9 = vrot.lane.b32.xlu0 %v66_v0, %s81_s10  ;;  %s82_s14 = smov 80   ;;  %v67_v2 = vld [vmem:[%s128_s0 + $0x6] ss:$8 sm:%s14_s13]   ;;  %s28_s17 = smov 3  ;;  %vm32_vm4 = vcmask 654848   ;;  %vm39_vm5 = vcmask 523648  }
   0x3   :  { %23 = vrot.lane.b32.xlu1 %v68_v1, %s82_s14  ;;  %v69_v3 = vld [vmem:[%s128_s0 + $0x4] ss:$8 sm:%s28_s17]   ;;  %s35_s20 = smov 3  ;;  %s42_s21 = smov 3  ;;  %vm46_vm6 = vcmask 392448   ;;  %vm53_vm7 = vcmask 261248  }
   0x4   :  { %s83_s22 = smov 96   ;;  %s84_s23 = smov 64   ;;  %v70_v4 = vld [vmem:[%s128_s0 + $0x3] ss:$8 sm:%s35_s20]   ;;  %v71_v5 = vld [vmem:[%s128_s0 + $0x2] ss:$8 sm:%s42_s21]  }
   0x5   :  { %s2_s26 = smov 3  ;;  %s49_s29 = smov 3 }
   0x6   :  { %16 = vrot.lane.b32.xlu0 %v67_v2, %s83_s22  ;;  %v3_v6 = vld [vmem:[%s128_s0] ss:$8 sm:%s2_s26]   ;;  %s85_s3 = smov 48   ;;  %s86_s4 = smov 32  }
   0x7   :  { %30 = vrot.lane.b32.xlu1 %v69_v3, %s84_s23  ;;  %5 = vst.msk [vmem:[#allocation0] ss:$8 sm:$0x3] %vm4_vm0, %v3_v6   ;;  %v72_v7 = vld [vmem:[%s128_s0 + $0x1] ss:$8 sm:%s49_s29]   ;;  %s87_s0 = smov 16  }
   0xa   :  { %37 = vrot.lane.b32.xlu0 %v70_v4, %s85_s3 }
   0xb   :  { %44 = vrot.lane.b32.xlu1 %v71_v5, %s86_s4 }
   0xe   :  { %51 = vrot.lane.b32.xlu0 %v72_v7, %s87_s0 }
  0x74   :  { %v10_v8 = vpop.permute.xlu0 %9  }
  0x75   :  { %12 = vst.msk [vmem:[#allocation0] ss:$8 sm:$0x3] %vm11_vm1, %v10_v8   ;;  %v24_v9 = vpop.permute.xlu1 %23  }
  0x78   :  { %v17_v10 = vpop.permute.xlu0 %16  }
  0x79   :  { %19 = vst.msk [vmem:[#allocation0] ss:$8 sm:$0x3] %vm18_vm2, %v17_v10   ;;  %v31_v11 = vpop.permute.xlu1 %30  }
  0x7a   :  { %26 = vst.msk [vmem:[#allocation0] ss:$8 sm:$0x3] %vm25_vm3, %v24_v9  }
  0x7b   :  { %33 = vst.msk [vmem:[#allocation0] ss:$8 sm:$0x3] %vm32_vm4, %v31_v11  }
  0x7c   :  { %v38_v12 = vpop.permute.xlu0 %37  }
  0x7d   :  { %40 = vst.msk [vmem:[#allocation0] ss:$8 sm:$0x3] %vm39_vm5, %v38_v12   ;;  %v45_v13 = vpop.permute.xlu1 %44  }
  0x7e   :  { %47 = vst.msk [vmem:[#allocation0] ss:$8 sm:$0x3] %vm46_vm6, %v45_v13  }
  0x80   :  { %v52_v14 = vpop.permute.xlu0 %51  }
  0x81   :  { %54 = vst.msk [vmem:[#allocation0] ss:$8 sm:$0x3] %vm53_vm7, %v52_v14  }
  0x88   :  { %v58_v15 = vld [vmem:[#allocation0] sm:$0x1]  ;;  %v62_v16 = vld [vmem:[#allocation0 + $0x8] sm:$0x1] }
  0x89   :  { %60 = vst [vmem:[%s129_s1] sm:$0x1] %v58_v15  ;;  %73 = vst [vmem:[%s129_s1 + $0x1] sm:$0x1] %v62_v16 }

// kernel: tile.29
= control target key start
LH: loop header
LB: loop body
LE: loop exit
PB: predicated region body
PF: predicated region fallthrough
CT: control target
= control target key end

     0   :  { %s22_s0 = inlined_call_operand.vmem [shape: f32[32], index: 0, kind: input, shape index: {}]   ;;  %s23_s1 = inlined_call_operand.vmem [shape: f32[8,32], index: 1, kind: output, shape index: {}]  }
   0x1   :  { %v4_v0 = vld [vmem:[%s22_s0] ss:$0 sm:$0xff] }
   0x2   :  { %5 = vst [vmem:[%s23_s1] sm:$0xff] %v4_v0 }

// kernel: tile.30
= control target key start
LH: loop header
LB: loop body
LE: loop exit
PB: predicated region body
PF: predicated region fallthrough
CT: control target
= control target key end

     0   :  { %s7_s6 = smov 3  ;;  %s14_s9 = smov 3  ;;  %vm4_vm0 = vcmask 261120   ;;  %vm11_vm1 = vcmask 1048320   ;;  %vm18_vm2 = vcmask 785920   ;;  %vm25_vm3 = vcmask 523520   ;;  %s76_s0 = inlined_call_operand.vmem [shape: f32[8,32], index: 0, kind: input, shape index: {}]   ;;  %s77_s1 = inlined_call_operand.vmem [shape: f32[1,256], index: 1, kind: output, shape index: {}]  }
   0x1   :  { %v38_v0 = vld [vmem:[%s76_s0 + $0x3] ss:$4 sm:%s7_s6]   ;;  %s45_s10 = smov 96   ;;  %s21_s11 = smov 3  ;;  %v39_v1 = vld [vmem:[%s76_s0 + $0x2] ss:$4 sm:%s14_s9]  }
   0x2   :  { %9 = vrot.lane.b32.xlu0 %v38_v0, %s45_s10  ;;  %v40_v2 = vld [vmem:[%s76_s0 + $0x1] ss:$4 sm:%s21_s11]   ;;  %s2_s16 = smov 3  ;;  %s46_s17 = smov 32  }
   0x3   :  { %23 = vrot.lane.b32.xlu1 %v40_v2, %s46_s17  ;;  %v3_v3 = vld [vmem:[%s76_s0] ss:$4 sm:%s2_s16]   ;;  %s47_s0 = smov 64  }
   0x4   :  { %5 = vst.msk [vmem:[#allocation0] ss:$8 sm:$0x3] %vm4_vm0, %v3_v3  }
   0x6   :  { %16 = vrot.lane.b32.xlu0 %v39_v1, %s47_s0 }
  0x74   :  { %v10_v4 = vpop.permute.xlu0 %9  }
  0x75   :  { %12 = vst.msk [vmem:[#allocation0] ss:$8 sm:$0x3] %vm11_vm1, %v10_v4   ;;  %v24_v5 = vpop.permute.xlu1 %23  }
  0x78   :  { %v17_v6 = vpop.permute.xlu0 %16  }
  0x79   :  { %19 = vst.msk [vmem:[#allocation0] ss:$8 sm:$0x3] %vm18_vm2, %v17_v6  }
  0x7a   :  { %26 = vst.msk [vmem:[#allocation0] ss:$8 sm:$0x3] %vm25_vm3, %v24_v5  }
  0x81   :  { %v30_v7 = vld [vmem:[#allocation0] sm:$0x1]  ;;  %v34_v8 = vld [vmem:[#allocation0 + $0x8] sm:$0x1] }
  0x82   :  { %32 = vst [vmem:[%s77_s1] sm:$0x1] %v30_v7  ;;  %41 = vst [vmem:[%s77_s1 + $0x1] sm:$0x1] %v34_v8 }

// kernel: tile.34
= control target key start
LH: loop header
LB: loop body
LE: loop exit
PB: predicated region body
PF: predicated region fallthrough
CT: control target
= control target key end

     0   :  { %s22_s0 = inlined_call_operand.vmem [shape: f32[64], index: 0, kind: input, shape index: {}]   ;;  %s23_s1 = inlined_call_operand.vmem [shape: f32[4,64], index: 1, kind: output, shape index: {}]  }
   0x1   :  { %v4_v0 = vld [vmem:[%s22_s0] ss:$0 sm:$0xff] }
   0x2   :  { %5 = vst [vmem:[%s23_s1] sm:$0xf] %v4_v0 }

// kernel: tile.35
= control target key start
LH: loop header
LB: loop body
LE: loop exit
PB: predicated region body
PF: predicated region fallthrough
CT: control target
= control target key end

     0   :  { %s6_s8 = smov 3  ;;  %vm8_vm0 = vcmask 523264   ;;  %s30_s9 = smov 64   ;;  %vm15_vm1 = vcmask 1048064   ;;  %s50_s0 = inlined_call_operand.vmem [shape: f32[4,64], index: 0, kind: input, shape index: {}]   ;;  %s51_s1 = inlined_call_operand.vmem [shape: f32[1,256], index: 1, kind: output, shape index: {}]  }
   0x1   :  { %v4_v0 = vld [vmem:[%s50_s0] sm:$0xf]  ;;  %s11_s0 = smov 3 }
   0x2   :  { %5 = vst [vmem:[#allocation1] sm:$0xf] %v4_v0 }
   0x9   :  { %v12_v1 = vld [vmem:[#allocation1 + $0x1] ss:$2 sm:%s11_s0]   ;;  %v7_v2 = vld [vmem:[#allocation1] ss:$2 sm:%s6_s8]  }
   0xa   :  { %13 = vrot.lane.b32.xlu0 %v12_v1, %s30_s9  ;;  %9 = vst.msk [vmem:[#allocation0] ss:$8 sm:$0x3] %vm8_vm0, %v7_v2  }
  0x7c   :  { %v14_v3 = vpop.permute.xlu0 %13  }
  0x7d   :  { %16 = vst.msk [vmem:[#allocation0] ss:$8 sm:$0x3] %vm15_vm1, %v14_v3  }
  0x84   :  { %v20_v4 = vld [vmem:[#allocation0] sm:$0x1]  ;;  %v24_v5 = vld [vmem:[#allocation0 + $0x8] sm:$0x1] }
  0x85   :  { %22 = vst [vmem:[%s51_s1] sm:$0x1] %v20_v4  ;;  %28 = vst [vmem:[%s51_s1 + $0x1] sm:$0x1] %v24_v5 }

// kernel: tile.39
= control target key start
LH: loop header
LB: loop body
LE: loop exit
PB: predicated region body
PF: predicated region fallthrough
CT: control target
= control target key end

     0   :  { %s22_s0 = inlined_call_operand.vmem [shape: f32[128], index: 0, kind: input, shape index: {}]   ;;  %s23_s1 = inlined_call_operand.vmem [shape: f32[2,128], index: 1, kind: output, shape index: {}]  }
   0x1   :  { %v4_v0 = vld [vmem:[%s22_s0] ss:$0 sm:$0xff] }
   0x2   :  { %5 = vst [vmem:[%s23_s1] sm:$0x3] %v4_v0 }

// kernel: discriminator_forward.1
= control target key start
LH: loop header
LB: loop body
LE: loop exit
PB: predicated region body
PF: predicated region fallthrough
CT: control target
= control target key end

     0   :  { %s9024_s24 = smov 0   ;;  %s11215_s0 = inlined_call_operand.vmem [shape: bf16[2,288,96], index: 0, kind: input, shape index: {}]   ;;  %s11216_s1 = inlined_call_operand.vmem [shape: bf16[3,96,256], index: 1, kind: input, shape index: {}]   ;;  %s11217_s2 = inlined_call_operand.vmem [shape: f32[1,256], index: 2, kind: input, shape index: {}]   ;;  %s11218_s3 = inlined_call_operand.vmem [shape: bf16[4,256,256], index: 3, kind: input, shape index: {}]   ;;  %s11219_s4 = inlined_call_operand.vmem [shape: f32[1,256], index: 4, kind: input, shape index: {}]   ;;  %s11220_s5 = inlined_call_operand.vmem [shape: bf16[4,256,256], index: 5, kind: input, shape index: {}]   ;;  %s11221_s6 = inlined_call_operand.vmem [shape: f32[1,256], index: 6, kind: input, shape index: {}]   ;;  %s11222_s7 = inlined_call_operand.vmem [shape: bf16[4,256,256], index: 7, kind: input, shape index: {}]   ;;  %s11223_s8 = inlined_call_operand.vmem [shape: f32[1,256], index: 8, kind: input, shape index: {}]   ;;  %s11224_s9 = inlined_call_operand.vmem [shape: bf16[2,256,256], index: 9, kind: input, shape index: {}]   ;;  %s11225_s10 = inlined_call_operand.vmem [shape: f32[1,256], index: 10, kind: input, shape index: {}]   ;;  %s11226_s11 = inlined_call_operand.vmem [shape: bf16[256,128], index: 11, kind: input, shape index: {}]   ;;  %s11227_s12 = inlined_call_operand.vmem [shape: f32[1,128], index: 12, kind: input, shape index: {}]   ;;  %s11228_s13 = inlined_call_operand.vmem [shape: f32[2,16,128], index: 13, kind: output, shape index: {0}]   ;;  %s11229_s14 = inlined_call_operand.vmem [shape: f32[2,128,256], index: 14, kind: output, shape index: {1}]   ;;  %s11230_s15 = inlined_call_operand.vmem [shape: f32[2,64,256], index: 15, kind: output, shape index: {2}]   ;;  %s11231_s16 = inlined_call_operand.vmem [shape: f32[2,32,256], index: 16, kind: output, shape index: {3}]   ;;  %s11232_s17 = inlined_call_operand.vmem [shape: f32[2,16,256], index: 17, kind: output, shape index: {4}]  }
   0x1   :  { %11234 = sst [smem:[#allocation5_spill]] %s11215_s0 }
   0x2   :  { %11235 = sst [smem:[#allocation6_spill]] %s11216_s1 }
   0x3 LB: > { %s6869_s25 = sadd.s32 4294967295, %s8931_s24   ;;  %p6873_p0 = scmp.ge.s32.totalorder %s8931_s24, 1  ;;  %s8931_s24 = sphi %s9024_s24, %s28_s24  }
   0x4   : > { %p496_p1 = scmp.lt.s32.totalorder %s8931_s24, 3 }
   0x6   : > { %p497_p2 = pnand %p6873_p0, %p496_p1 }
   0x7   : > { %s11236_s28 = sld [smem:[#allocation6_spill]] (!%p497_p2)  ;;  %p568_p3 = scmp.lt.s32.totalorder (!%p497_p2), %s6869_s25, 1  ;;  %v8933_v2 = vmov (!%p497_p2), 0   ;;  %vm813_vm0 = vcmask (!%p497_p2), 785408   ;;  %v8237_v54 = vld [vmem:[%s11218_s3 + $0x104] ss:$8 sps:$4 sm:$0xff] (!%p497_p2)  }
   0x8   : > { %500 = sbr.rel (%p497_p2) target bundleno = 2333 (0x91d), region = 72  ;;  %894 = vmatprep.mubr.bf16.mxu0 (!%p497_p2), %v8933_v2  ;;  %s11237_s0 = sld [smem:[#allocation5_spill]] (!%p497_p2)  ;;  %v8239_v55 = vld [vmem:[%s11218_s3 + $0x100] ss:$8 sps:$4 sm:$0xff] (!%p497_p2)   ;;  %v8240_v56 = vld [vmem:[%s11218_s3 + $0x114] ss:$8 sps:$4 sm:$0xff] (!%p497_p2)   ;;  %2395 = vmatprep.subr.bf16.mxu1 (!%p497_p2), %v8237_v54 }
   0x9   : > { %2396 = vmatpush1.bf16.msra.mxu1 (!%p497_p2), %v8239_v55  ;;  %v8242_v57 = vld [vmem:[%s11218_s3 + $0x110] ss:$8 sps:$4 sm:$0xff] (!%p497_p2)   ;;  %v8243_v59 = vld [vmem:[%s11218_s3 + $0x124] ss:$8 sps:$4 sm:$0xff] (!%p497_p2)   ;;  %v8245_v60 = vld [vmem:[%s11218_s3 + $0x120] ss:$8 sps:$4 sm:$0xff] (!%p497_p2)  }
   0xa   : > { %2397 = vmatprep.subr.bf16.mxu1 (!%p497_p2), %v8240_v56  ;;  %v8246_v61 = vld [vmem:[%s11218_s3 + $0x134] ss:$8 sps:$4 sm:$0xff] (!%p497_p2)   ;;  %v8248_v62 = vld [vmem:[%s11218_s3 + $0x130] ss:$8 sps:$4 sm:$0xff] (!%p497_p2)  }
   0xd   : > { %v8150_v0 = vld [vmem:[%s11236_s28 + $0x64] ss:$8 sps:$4 sm:$0xff] (!%p497_p2)   ;;  %v8152_v1 = vld [vmem:[%s11236_s28 + $0x60] ss:$8 sps:$4 sm:$0xff] (!%p497_p2)   ;;  %v8153_v3 = vld [vmem:[%s11236_s28 + $0x74] ss:$8 sps:$4 sm:$0xff] (!%p497_p2)   ;;  %2398 = vmatpush1.bf16.msra.mxu1 (!%p497_p2), %v8242_v57 }
   0xe   : > { %862 = vmatprep.subr.bf16.mxu0 (!%p497_p2), %v8150_v0  ;;  %v8155_v4 = vld [vmem:[%s11236_s28 + $0x70] ss:$8 sps:$4 sm:$0xff] (!%p497_p2)   ;;  %v8156_v5 = vld [vmem:[%s11236_s28 + $0x84] ss:$8 sps:$4 sm:$0xff] (!%p497_p2)   ;;  %v8158_v6 = vld [vmem:[%s11236_s28 + $0x80] ss:$8 sps:$4 sm:$0xff] (!%p497_p2)   ;;  %2399 = vmatprep.subr.bf16.mxu1 (!%p497_p2), %v8243_v59 }
   0xf   : > { %s11239_s25 = smov (!%p568_p3, %s6869_s25), 1  ;;  %863 = vmatpush1.bf16.msra.mxu0 %v8152_v1  ;;  %v8159_v7 = vld [vmem:[%s11236_s28 + $0x94] ss:$8 sps:$4 sm:$0xff]   ;;  %v8161_v8 = vld [vmem:[%s11236_s28 + $0x90] ss:$8 sps:$4 sm:$0xff]  }
  0x10   : > { %864 = vmatprep.subr.bf16.mxu0 %v8153_v3  ;;  %s8140_s22 = smul.u32 144, %s11239_s25  ;;  %v8162_v9 = vld [vmem:[%s11236_s28 + $0xa4] ss:$8 sps:$4 sm:$0xff]   ;;  %v8164_v10 = vld [vmem:[%s11236_s28 + $0xa0] ss:$8 sps:$4 sm:$0xff]   ;;  %s7814_s19 = sshll.u32 %s11239_s25, 8 }
  0x11   : > { %v8165_v11 = vld [vmem:[%s11236_s28 + $0xb4] ss:$8 sps:$4 sm:$0xff]   ;;  %v8167_v12 = vld [vmem:[%s11236_s28 + $0xb0] ss:$8 sps:$4 sm:$0xff]   ;;  %v8171_v13 = vld [vmem:[%s11236_s28 + $0x4] ss:$8 sps:$4 sm:$0xff]   ;;  %2400 = vmatpush1.bf16.msra.mxu1 %v8245_v60  ;;  %s10030_s21 = scalar_lea.vmem %s11229_s14, %s7814_s19 }
  0x12   : > { %s9057_s30 = scalar_lea.vmem %s11237_s0, %s8140_s22  ;;  %v8169_v15 = vld [vmem:[%s11236_s28] ss:$8 sps:$4 sm:$0xff]   ;;  %v8176_v16 = vld [vmem:[%s11236_s28 + $0x14] ss:$8 sps:$4 sm:$0xff]   ;;  %v8174_v17 = vld [vmem:[%s11236_s28 + $0x10] ss:$8 sps:$4 sm:$0xff]   ;;  %2401 = vmatprep.subr.bf16.mxu1 %v8246_v61 }
  0x13   : > { %865 = vmatpush1.bf16.msra.mxu0 %v8155_v4  ;;  %v9081_v14 = vld [vmem:[%s9057_s30 + $0x8] sm:$0xff]   ;;  %v9099_v19 = vld [vmem:[%s9057_s30 + $0x10] sm:$0xff]   ;;  %v9117_v24 = vld [vmem:[%s9057_s30 + $0x18] sm:$0xff]   ;;  %s7815_s20 = sshll.u32 %s11239_s25, 7  ;;  %s7816_s18 = sshll.u32 %s11239_s25, 6 }
  0x14   : > { %866 = vmatprep.subr.bf16.mxu0 %v8156_v5  ;;  %v8182_v18 = vld [vmem:[%s11236_s28 + $0x24] ss:$8 sps:$4 sm:$0xff]   ;;  %v8180_v20 = vld [vmem:[%s11236_s28 + $0x20] ss:$8 sps:$4 sm:$0xff]   ;;  %v8188_v21 = vld [vmem:[%s11236_s28 + $0x34] ss:$8 sps:$4 sm:$0xff]   ;;  %s11064_s1 = scalar_lea.vmem %s11231_s16, %s7816_s18 }
  0x15   : > { %v8186_v22 = vld [vmem:[%s11236_s28 + $0x30] ss:$8 sps:$4 sm:$0xff]   ;;  %v8193_v23 = vld [vmem:[%s11236_s28 + $0x44] ss:$8 sps:$4 sm:$0xff]   ;;  %v8191_v25 = vld [vmem:[%s11236_s28 + $0x40] ss:$8 sps:$4 sm:$0xff]   ;;  %2402 = vmatpush1.bf16.msra.mxu1 %v8248_v62 }
  0x16   : > { %v8199_v26 = vld [vmem:[%s11236_s28 + $0x54] ss:$8 sps:$4 sm:$0xff]   ;;  %v8197_v27 = vld [vmem:[%s11236_s28 + $0x50] ss:$8 sps:$4 sm:$0xff]   ;;  %v8205_v28 = vld [vmem:[%s11236_s28 + $0xc4] ss:$8 sps:$4 sm:$0xff]  }
  0x17   : > { %867 = vmatpush1.bf16.msra.mxu0 %v8158_v6  ;;  %v9135_v29 = vld [vmem:[%s9057_s30 + $0x20] sm:$0xff]   ;;  %v9141_v30 = vld [vmem:[%s9057_s30 + $0x28] sm:$0xff]   ;;  %v9147_v31 = vld [vmem:[%s9057_s30 + $0x30] sm:$0xff]   ;;  %s7817_s22 = sshll.u32 %s11239_s25, 5  ;;  %s7813_s18 = sshll.u32 %s11239_s25, 4 }
  0x18   : > { %868 = vmatprep.subr.bf16.mxu0 %v8159_v7  ;;  %v9153_v32 = vld [vmem:[%s9057_s30 + $0x38] sm:$0xff]   ;;  %v9159_v33 = vld [vmem:[%s9057_s30 + $0x40] sm:$0xff]   ;;  %v9165_v34 = vld [vmem:[%s9057_s30 + $0x48] sm:$0xff]   ;;  %s597_s0 = scalar_lea.vmem %s11232_s17, %s7817_s22  ;;  %s577_s23 = scalar_lea.vmem %s11228_s13, %s7813_s18 }
  0x19   : > { %v9171_v35 = vld [vmem:[%s9057_s30 + $0x50] sm:$0xff]   ;;  %v9177_v36 = vld [vmem:[%s9057_s30 + $0x58] sm:$0xff]   ;;  %v8194_v37 = vld [vmem:[%s9057_s30 + $0x60] sm:$0xff]  }
  0x1a   : > { %v8195_v38 = vld [vmem:[%s9057_s30 + $0x68] sm:$0xff]   ;;  %v8196_v39 = vld [vmem:[%s9057_s30 + $0x70] sm:$0xff]   ;;  %v8200_v40 = vld [vmem:[%s9057_s30 + $0x78] sm:$0xff]  }
  0x1b   : > { %869 = vmatpush1.bf16.msra.mxu0 %v8161_v8  ;;  %v8201_v41 = vld [vmem:[%s9057_s30 + $0x80] sm:$0xff]   ;;  %v8208_v44 = vld [vmem:[%s11236_s28 + $0xd4] ss:$8 sps:$4 sm:$0xff]   ;;  %v8206_v45 = vld [vmem:[%s11236_s28 + $0xd0] ss:$8 sps:$4 sm:$0xff]  }
  0x1c   : > { %870 = vmatprep.subr.bf16.mxu0 %v8162_v9  ;;  %v8202_v42 = vld [vmem:[%s9057_s30] sm:$0xff]   ;;  %v8214_v48 = vld [vmem:[%s11236_s28 + $0xf4] ss:$8 sps:$4 sm:$0xff]   ;;  %v8212_v49 = vld [vmem:[%s11236_s28 + $0xf0] ss:$8 sps:$4 sm:$0xff]  }
  0x1d   : > { %v8203_v43 = vld [vmem:[%s11236_s28 + $0xc0] ss:$8 sps:$4 sm:$0xff]   ;;  %v8211_v46 = vld [vmem:[%s11236_s28 + $0xe4] ss:$8 sps:$4 sm:$0xff]   ;;  %v8220_v52 = vld [vmem:[%s11236_s28 + $0x114] ss:$8 sps:$4 sm:$0xff]  }
  0x1e   : > { %v8209_v47 = vld [vmem:[%s11236_s28 + $0xe0] ss:$8 sps:$4 sm:$0xff]   ;;  %v8217_v50 = vld [vmem:[%s11236_s28 + $0x104] ss:$8 sps:$4 sm:$0xff]   ;;  %v8218_v53 = vld [vmem:[%s11236_s28 + $0x110] ss:$8 sps:$4 sm:$0xff]  }
  0x1f   : > { %871 = vmatpush1.bf16.msra.mxu0 %v8164_v10  ;;  %v8215_v51 = vld [vmem:[%s11236_s28 + $0x100] ss:$8 sps:$4 sm:$0xff]   ;;  %v8221_v58 = vld [vmem:[%s9057_s30 + $0x10] sm:$0xff]   ;;  %v8222_v63 = vld [vmem:[%s9057_s30 + $0x18] sm:$0xff]  }
  0x20   : > { %872 = vmatprep.subr.bf16.mxu0 %v8165_v11  ;;  %v8249_v0 = vld [vmem:[%s11218_s3 + $0x144] ss:$8 sps:$4 sm:$0xff]   ;;  %v8251_v1 = vld [vmem:[%s11218_s3 + $0x140] ss:$8 sps:$4 sm:$0xff]   ;;  %v8252_v3 = vld [vmem:[%s11218_s3 + $0x154] ss:$8 sps:$4 sm:$0xff]  }
  0x21   : > { %2403 = vmatprep.subr.bf16.mxu1 %v8249_v0  ;;  %v8254_v4 = vld [vmem:[%s11218_s3 + $0x150] ss:$8 sps:$4 sm:$0xff]   ;;  %v8223_v5 = vld [vmem:[%s9057_s30 + $0x20] sm:$0xff]   ;;  %v8258_v8 = vld [vmem:[%s11218_s3 + $0x174] ss:$8 sps:$4 sm:$0xff]  }
  0x22   : > { %2404 = vmatpush1.bf16.msra.mxu1 %v8251_v1  ;;  %v8255_v6 = vld [vmem:[%s11218_s3 + $0x164] ss:$8 sps:$4 sm:$0xff]   ;;  %v8257_v7 = vld [vmem:[%s11218_s3 + $0x160] ss:$8 sps:$4 sm:$0xff]   ;;  %v8260_v9 = vld [vmem:[%s11218_s3 + $0x170] ss:$8 sps:$4 sm:$0xff]  }
  0x23   : > { %873 = vmatpush1.bf16.msra.mxu0 %v8167_v12  ;;  %2405 = vmatprep.subr.bf16.mxu1 %v8252_v3  ;;  %v8224_v10 = vld [vmem:[%s9057_s30 + $0x28] sm:$0xff]  }
  0x24   : > { %1123 = vmatprep.subr.bf16.mxu0 %v8171_v13  ;;  %v8261_v11 = vld [vmem:[%s11218_s3 + $0x184] ss:$8 sps:$4 sm:$0xff]   ;;  %v8263_v12 = vld [vmem:[%s11218_s3 + $0x180] ss:$8 sps:$4 sm:$0xff]   ;;  %v8264_v13 = vld [vmem:[%s11218_s3 + $0x194] ss:$8 sps:$4 sm:$0xff]  }
  0x26   : > { %6925 = vmatmul.mubr.msk.bf16.vlgmr.msra.gmra.mrb[0].mxu0 %vm813_vm0, %v9081_v14  ;;  %2406 = vmatpush1.bf16.msra.mxu1 %v8254_v4 }
  0x27   : > { %1124 = vmatpush1.bf16.msra.mxu0 %v8169_v15  ;;  %904 = vmatprep.mubr.bf16.mxu0 %v8933_v2  ;;  %v8225_v15 = vld [vmem:[%s9057_s30 + $0x30] sm:$0xff]  }
  0x28   : > { %1125 = vmatprep.subr.bf16.mxu0 %v8176_v16  ;;  %2407 = vmatprep.subr.bf16.mxu1 %v8255_v6  ;;  %v8267_v16 = vld [vmem:[%s11218_s3 + $0x1a4] ss:$8 sps:$4 sm:$0xff]  }
  0x2a   : > { %2408 = vmatpush1.bf16.msra.mxu1 %v8257_v7 }
  0x2b   : > { %1126 = vmatpush1.bf16.msra.mxu0 %v8174_v17  ;;  %2409 = vmatprep.subr.bf16.mxu1 %v8258_v8  ;;  %v8269_v17 = vld [vmem:[%s11218_s3 + $0x1a0] ss:$8 sps:$4 sm:$0xff]   ;;  %v8290_v8 = vld [vmem:[%s11218_s3 + $0x14] ss:$8 sps:$4 sm:$0xff]  }
  0x2c   : > { %1127 = vmatprep.subr.bf16.mxu0 %v8182_v18  ;;  %v8270_v18 = vld [vmem:[%s11218_s3 + $0x1b4] ss:$8 sps:$4 sm:$0xff]  }
  0x2e   : > { %6926 = vmatmul.mubr.msk.bf16.gmra.mrb[4].mxu0 %vm813_vm0, %v9099_v19  ;;  %2410 = vmatpush1.bf16.msra.mxu1 %v8260_v9 }
  0x2f   : > { %914 = vmatprep.mubr.bf16.mxu0 %v8933_v2  ;;  %1128 = vmatpush1.bf16.msra.mxu0 %v8180_v20  ;;  %v8226_v20 = vld [vmem:[%s9057_s30 + $0x38] sm:$0xff]  }
  0x30   : > { %1129 = vmatprep.subr.bf16.mxu0 %v8188_v21  ;;  %2411 = vmatprep.subr.bf16.mxu1 %v8261_v11  ;;  %v8273_v21 = vld [vmem:[%s11218_s3 + $0x1c4] ss:$8 sps:$4 sm:$0xff]  }
  0x32   : > { %2412 = vmatpush1.bf16.msra.mxu1 %v8263_v12 }
  0x33   : > { %1130 = vmatpush1.bf16.msra.mxu0 %v8186_v22  ;;  %2413 = vmatprep.subr.bf16.mxu1 %v8264_v13  ;;  %v8275_v22 = vld [vmem:[%s11218_s3 + $0x1c0] ss:$8 sps:$4 sm:$0xff]  }
  0x34   : > { %1131 = vmatprep.subr.bf16.mxu0 %v8193_v23  ;;  %v8227_v23 = vld [vmem:[%s9057_s30 + $0x40] sm:$0xff]  }
  0x36   : > { %6927 = vmatmul.mubr.msk.bf16.gmra.mrb[8].mxu0 %vm813_vm0, %v9117_v24 }
  0x37   : > { %924 = vmatprep.mubr.bf16.mxu0 %v8933_v2  ;;  %1132 = vmatpush1.bf16.msra.mxu0 %v8191_v25  ;;  %v8229_v25 = vld [vmem:[%s9057_s30 + $0x50] sm:$0xff]  }
  0x38   : > { %1133 = vmatprep.subr.bf16.mxu0 %v8199_v26  ;;  %v8230_v26 = vld [vmem:[%s9057_s30 + $0x58] sm:$0xff]  }
  0x3b   : > { %1134 = vmatpush1.bf16.msra.mxu0 %v8197_v27  ;;  %v8231_v27 = vld [vmem:[%s9057_s30 + $0x60] sm:$0xff]  }
  0x3c   : > { %1549 = vmatprep.subr.bf16.mxu0 %v8205_v28  ;;  %v8276_v28 = vld [vmem:[%s11218_s3 + $0x1d4] ss:$8 sps:$4 sm:$0xff]  }
  0x3e   : > { %6928 = vmatmul.mubr.msk.bf16.gmra.mrb[12].mxu0 %vm813_vm0, %v9135_v29 }
  0x3f   : > { %934 = vmatprep.mubr.bf16.mxu0 %v8933_v2 }
  0x46   : > { %6929 = vmatmul.mubr.msk.bf16.gmra.mrb[16].mxu0 %vm813_vm0, %v9141_v30 }
  0x47   : > { %944 = vmatprep.mubr.bf16.mxu0 %v8933_v2 }
  0x4e   : > { %6930 = vmatmul.mubr.msk.bf16.gmra.mrb[20].mxu0 %vm813_vm0, %v9147_v31 }
  0x4f   : > { %954 = vmatprep.mubr.bf16.mxu0 %v8933_v2 }
  0x56   : > { %6931 = vmatmul.mubr.msk.bf16.gmra.mrb[24].mxu0 %vm813_vm0, %v9153_v32 }
  0x57   : > { %964 = vmatprep.mubr.bf16.mxu0 %v8933_v2 }
  0x5e   : > { %6932 = vmatmul.mubr.msk.bf16.gmra.mrb[28].mxu0 %vm813_vm0, %v9159_v33 }
  0x5f   : > { %974 = vmatprep.mubr.bf16.mxu0 %v8933_v2 }
  0x66   : > { %6933 = vmatmul.mubr.msk.bf16.gmra.mrb[32].mxu0 %vm813_vm0, %v9165_v34 }
  0x67   : > { %984 = vmatprep.mubr.bf16.mxu0 %v8933_v2 }
  0x6e   : > { %6934 = vmatmul.mubr.msk.bf16.gmra.mrb[36].mxu0 %vm813_vm0, %v9171_v35 }
  0x6f   : > { %994 = vmatprep.mubr.bf16.mxu0 %v8933_v2 }
  0x76   : > { %6935 = vmatmul.mubr.msk.bf16.gmra.mrb[40].mxu0 %vm813_vm0, %v9177_v36 }
  0x77   : > { %1004 = vmatprep.mubr.bf16.mxu0 %v8933_v2 }
  0x7e   : > { %6936 = vmatmul.mubr.msk.bf16.gmra.mrb[44].mxu0 %vm813_vm0, %v8194_v37 }
  0x7f   : > { %1014 = vmatprep.mubr.bf16.mxu0 %v8933_v2 }
  0x86   : > { %6937 = vmatmul.mubr.msk.bf16.gmra.mrb[48].mxu0 %vm813_vm0, %v8195_v38 }
  0x87   : > { %1024 = vmatprep.mubr.bf16.mxu0 %v8933_v2 }
  0x8e   : > { %6938 = vmatmul.mubr.msk.bf16.gmra.mrb[52].mxu0 %vm813_vm0, %v8196_v39 }
  0x8f   : > { %1034 = vmatprep.mubr.bf16.mxu0 %v8933_v2 }
  0x96   : > { %6939 = vmatmul.mubr.msk.bf16.gmra.mrb[56].mxu0 %vm813_vm0, %v8200_v40 }
  0x97   : > { %1044 = vmatprep.mubr.bf16.mxu0 %v8933_v2 }
  0x9e   : > { %6940 = vmatmul.mubr.msk.bf16.gmra.mrb[60].mxu0 %vm813_vm0, %v8201_v41 }
  0x9f   : > { %1155 = vmatprep.mubr.bf16.mxu0 %v8933_v2 }
  0xa6   : > { %6954 = vmatmul.mubr.msk.bf16.vlgmr.msra.gmra.mrb[0].mxu0 %vm813_vm0, %v8202_v42 }
  0xa7   : > { %1550 = vmatpush1.bf16.msra.mxu0 %v8203_v43  ;;  %1165 = vmatprep.mubr.bf16.mxu0 %v8933_v2  ;;  %v1806_v43 = vld [vmem:[%s11217_s2] sm:$0x3] }
  0xa8   : > { %1551 = vmatprep.subr.bf16.mxu0 %v8208_v44 }
  0xab   : > { %1552 = vmatpush1.bf16.msra.mxu0 %v8206_v45 }
  0xac   : > { %1553 = vmatprep.subr.bf16.mxu0 %v8211_v46 }
  0xae   : > { %6955 = vmatmul.mubr.msk.bf16.gmra.mrb[4].mxu0 %vm813_vm0, %v9081_v14  ;;  %v8266_v14 = vld [vmem:[%s11218_s3 + $0x190] ss:$8 sps:$4 sm:$0xff]  }
  0xaf   : > { %1175 = vmatprep.mubr.bf16.mxu0 %v8933_v2  ;;  %1554 = vmatpush1.bf16.msra.mxu0 %v8209_v47 }
  0xb0   : > { %1555 = vmatprep.subr.bf16.mxu0 %v8214_v48  ;;  %2414 = vmatpush1.bf16.msra.mxu1 %v8266_v14 }
  0xb1   : > { %2415 = vmatprep.subr.bf16.mxu1 %v8267_v16 }
  0xb3   : > { %1556 = vmatpush1.bf16.msra.mxu0 %v8212_v49 }
  0xb4   : > { %1557 = vmatprep.subr.bf16.mxu0 %v8217_v50  ;;  %2416 = vmatpush1.bf16.msra.mxu1 %v8269_v17  ;;  %v8293_v17 = vld [vmem:[%s11218_s3 + $0x24] ss:$8 sps:$4 sm:$0xff]  }
  0xb5   : > { %2417 = vmatprep.subr.bf16.mxu1 %v8270_v18 }
  0xb6   : > { %6956 = vmatmul.mubr.msk.bf16.gmra.mrb[8].mxu0 %vm813_vm0, %v9099_v19  ;;  %v8272_v19 = vld [vmem:[%s11218_s3 + $0x1b0] ss:$8 sps:$4 sm:$0xff]  }
  0xb7   : > { %1185 = vmatprep.mubr.bf16.mxu0 %v8933_v2  ;;  %1558 = vmatpush1.bf16.msra.mxu0 %v8215_v51 }
  0xb8   : > { %1559 = vmatprep.subr.bf16.mxu0 %v8220_v52  ;;  %2418 = vmatpush1.bf16.msra.mxu1 %v8272_v19 }
  0xb9   : > { %2419 = vmatprep.subr.bf16.mxu1 %v8273_v21 }
  0xbb   : > { %1560 = vmatpush1.bf16.msra.mxu0 %v8218_v53 }
  0xbc   : > { %2420 = vmatpush1.bf16.msra.mxu1 %v8275_v22 }
  0xbd   : > { %2421 = vmatprep.subr.bf16.mxu1 %v8276_v28 }
  0xbe   : > { %6957 = vmatmul.mubr.msk.bf16.gmra.mrb[12].mxu0 %vm813_vm0, %v9117_v24  ;;  %v8228_v24 = vld [vmem:[%s9057_s30 + $0x48] sm:$0xff]  }
  0xbf   : > { %1195 = vmatprep.mubr.bf16.mxu0 %v8933_v2 }
  0xc6   : > { %6958 = vmatmul.mubr.msk.bf16.gmra.mrb[16].mxu0 %vm813_vm0, %v9135_v29  ;;  %v8278_v29 = vld [vmem:[%s11218_s3 + $0x1d0] ss:$8 sps:$4 sm:$0xff]  }
  0xc7   : > { %1205 = vmatprep.mubr.bf16.mxu0 %v8933_v2  ;;  %2422 = vmatpush1.bf16.msra.mxu1 %v8278_v29 }
  0xce   : > { %6959 = vmatmul.mubr.msk.bf16.gmra.mrb[20].mxu0 %vm813_vm0, %v9141_v30  ;;  %v8232_v30 = vld [vmem:[%s9057_s30 + $0x68] sm:$0xff]  }
  0xcf   : > { %1215 = vmatprep.mubr.bf16.mxu0 %v8933_v2 }
  0xd6   : > { %6960 = vmatmul.mubr.msk.bf16.gmra.mrb[24].mxu0 %vm813_vm0, %v9147_v31  ;;  %v8279_v31 = vld [vmem:[%s11218_s3 + $0x1e4] ss:$8 sps:$4 sm:$0xff]  }
  0xd7   : > { %1225 = vmatprep.mubr.bf16.mxu0 %v8933_v2  ;;  %2423 = vmatprep.subr.bf16.mxu1 %v8279_v31 }
  0xde   : > { %6961 = vmatmul.mubr.msk.bf16.gmra.mrb[28].mxu0 %vm813_vm0, %v9153_v32  ;;  %v8281_v32 = vld [vmem:[%s11218_s3 + $0x1e0] ss:$8 sps:$4 sm:$0xff]  }
  0xdf   : > { %1235 = vmatprep.mubr.bf16.mxu0 %v8933_v2  ;;  %2424 = vmatpush1.bf16.msra.mxu1 %v8281_v32 }
  0xe6   : > { %6962 = vmatmul.mubr.msk.bf16.gmra.mrb[32].mxu0 %vm813_vm0, %v9159_v33  ;;  %v8282_v33 = vld [vmem:[%s11218_s3 + $0x1f4] ss:$8 sps:$4 sm:$0xff]  }
  0xe7   : > { %1245 = vmatprep.mubr.bf16.mxu0 %v8933_v2  ;;  %2425 = vmatprep.subr.bf16.mxu1 %v8282_v33 }
  0xee   : > { %6963 = vmatmul.mubr.msk.bf16.gmra.mrb[36].mxu0 %vm813_vm0, %v9165_v34  ;;  %v8284_v34 = vld [vmem:[%s11218_s3 + $0x1f0] ss:$8 sps:$4 sm:$0xff]  }
  0xef   : > { %1255 = vmatprep.mubr.bf16.mxu0 %v8933_v2  ;;  %2426 = vmatpush1.bf16.msra.mxu1 %v8284_v34 }
  0xf6   : > { %6964 = vmatmul.mubr.msk.bf16.gmra.mrb[40].mxu0 %vm813_vm0, %v9171_v35  ;;  %v8233_v35 = vld [vmem:[%s9057_s30 + $0x70] sm:$0xff]  }
  0xf7   : > { %1265 = vmatprep.mubr.bf16.mxu0 %v8933_v2 }
  0xfe   : > { %6965 = vmatmul.mubr.msk.bf16.gmra.mrb[44].mxu0 %vm813_vm0, %v9177_v36  ;;  %v8234_v36 = vld [vmem:[%s9057_s30 + $0x78] sm:$0xff]  }
  0xff   : > { %1275 = vmatprep.mubr.bf16.mxu0 %v8933_v2 }
 0x106   : > { %6966 = vmatmul.mubr.msk.bf16.gmra.mrb[48].mxu0 %vm813_vm0, %v8194_v37  ;;  %v8235_v37 = vld [vmem:[%s9057_s30 + $0x80] sm:$0xff]  }
 0x107   : > { %1285 = vmatprep.mubr.bf16.mxu0 %v8933_v2 }
 0x10e   : > { %6967 = vmatmul.mubr.msk.bf16.gmra.mrb[52].mxu0 %vm813_vm0, %v8195_v38  ;;  %v8236_v38 = vld [vmem:[%s9057_s30 + $0x88] sm:$0xff]   ;;  %s10567_s30 = scalar_lea.vmem %s11230_s15, %s7815_s20 }
 0x10f   : > { %1295 = vmatprep.mubr.bf16.mxu0 %v8933_v2 }
 0x116   : > { %6968 = vmatmul.mubr.msk.bf16.gmra.mrb[56].mxu0 %vm813_vm0, %v8196_v39  ;;  %v8287_v39 = vld [vmem:[%s11218_s3 + $0x4] ss:$8 sps:$4 sm:$0xff]  }
 0x117   : > { %1305 = vmatprep.mubr.bf16.mxu0 %v8933_v2  ;;  %2668 = vmatprep.subr.bf16.mxu1 %v8287_v39  ;;  %v8299_v39 = vld [vmem:[%s11218_s3 + $0x44] ss:$8 sps:$4 sm:$0xff]  }
 0x11e   : > { %6969 = vmatmul.mubr.msk.bf16.gmra.mrb[60].mxu0 %vm813_vm0, %v8200_v40  ;;  %v1808_v40 = vlaneseq }
 0x11f   : > { %1581 = vmatprep.mubr.bf16.mxu0 %v8933_v2 }
 0x120   : > { %v1809_v41 = vshrl.u32 %v1808_v40, 7 }
 0x122   : > { %v9420_v42 = vsub.s32 0, %v1809_v41  ;;  %v9425_v44 = vsub.s32 1, %v1809_v41 }
 0x124   : > { %v9428_v45 = vrot.slane %v1806_v43, %v9420_v42  ;;  %v9431_v46 = vrot.slane %v1806_v43, %v9425_v44 }
 0x126   : > { %7010 = vmatmul.mubr.msk.bf16.vlgmr.msra.gmra.mrb[0].mxu0 %vm813_vm0, %v8221_v58 }
 0x127   : > { %1591 = vmatprep.mubr.bf16.mxu0 %v8933_v2 }
 0x12e   : > { %7011 = vmatmul.mubr.msk.bf16.gmra.mrb[4].mxu0 %vm813_vm0, %v8222_v63 }
 0x12f   : > { %1601 = vmatprep.mubr.bf16.mxu0 %v8933_v2 }
 0x136   : > { %7012 = vmatmul.mubr.msk.bf16.gmra.mrb[8].mxu0 %vm813_vm0, %v8223_v5  ;;  %v8285_v5 = vld [vmem:[%s11218_s3] ss:$8 sps:$4 sm:$0xff]  }
 0x137   : > { %1611 = vmatprep.mubr.bf16.mxu0 %v8933_v2 }
 0x13e   : > { %7013 = vmatmul.mubr.msk.bf16.gmra.mrb[12].mxu0 %vm813_vm0, %v8224_v10 }
 0x13f   : > { %1621 = vmatprep.mubr.bf16.mxu0 %v8933_v2 }
 0x146   : > { %7014 = vmatmul.mubr.msk.bf16.gmra.mrb[16].mxu0 %vm813_vm0, %v8225_v15  ;;  %v8288_v15 = vld [vmem:[%s11218_s3 + $0x10] ss:$8 sps:$4 sm:$0xff]  }
 0x147   : > { %1631 = vmatprep.mubr.bf16.mxu0 %v8933_v2 }
 0x14e   : > { %7015 = vmatmul.mubr.msk.bf16.gmra.mrb[20].mxu0 %vm813_vm0, %v8226_v20 }
 0x14f   : > { %1641 = vmatprep.mubr.bf16.mxu0 %v8933_v2 }
 0x156   : > { %7016 = vmatmul.mubr.msk.bf16.gmra.mrb[24].mxu0 %vm813_vm0, %v8227_v23 }
 0x157   : > { %1651 = vmatprep.mubr.bf16.mxu0 %v8933_v2 }
 0x15e   : > { %7017 = vmatmul.mubr.msk.bf16.gmra.mrb[28].mxu0 %vm813_vm0, %v8228_v24 }
 0x15f   : > { %1661 = vmatprep.mubr.bf16.mxu0 %v8933_v2 }
 0x166   : > { %7018 = vmatmul.mubr.msk.bf16.gmra.mrb[32].mxu0 %vm813_vm0, %v8229_v25 }
 0x167   : > { %1671 = vmatprep.mubr.bf16.mxu0 %v8933_v2 }
 0x16e   : > { %7019 = vmatmul.mubr.msk.bf16.gmra.mrb[36].mxu0 %vm813_vm0, %v8230_v26  ;;  %v8291_v26 = vld [vmem:[%s11218_s3 + $0x20] ss:$8 sps:$4 sm:$0xff]  }
 0x16f   : > { %1681 = vmatprep.mubr.bf16.mxu0 %v8933_v2 }
 0x176   : > { %7020 = vmatmul.mubr.msk.bf16.gmra.mrb[40].mxu0 %vm813_vm0, %v8231_v27 }
 0x177   : > { %1691 = vmatprep.mubr.bf16.mxu0 %v8933_v2 }
 0x17e   : > { %7021 = vmatmul.mubr.msk.bf16.gmra.mrb[44].mxu0 %vm813_vm0, %v8232_v30  ;;  %v8296_v30 = vld [vmem:[%s11218_s3 + $0x34] ss:$8 sps:$4 sm:$0xff]  }
 0x17f   : > { %1701 = vmatprep.mubr.bf16.mxu0 %v8933_v2 }
 0x186   : > { %7022 = vmatmul.mubr.msk.bf16.gmra.mrb[48].mxu0 %vm813_vm0, %v8233_v35 }
 0x187   : > { %1711 = vmatprep.mubr.bf16.mxu0 %v8933_v2 }
 0x18e   : > { %7023 = vmatmul.mubr.msk.bf16.gmra.mrb[52].mxu0 %vm813_vm0, %v8234_v36 }
 0x18f   : > { %1721 = vmatprep.mubr.bf16.mxu0 %v8933_v2 }
 0x196   : > { %7024 = vmatmul.mubr.msk.bf16.gmra.mrb[56].mxu0 %vm813_vm0, %v8235_v37  ;;  %v8294_v37 = vld [vmem:[%s11218_s3 + $0x30] ss:$8 sps:$4 sm:$0xff]  }
 0x197   : > { %1731 = vmatprep.mubr.bf16.mxu0 %v8933_v2 }
 0x19e   : > { %7025 = vmatmul.mubr.msk.bf16.gmra.mrb[60].mxu0 %vm813_vm0, %v8236_v38 }
 0x1f9   : > { %v1583_v47 = vpop.f32.mrb[0].mxu0 }
 0x1fa   : > { %v1818_v48 = vadd.f32 %v9428_v45, %v1583_v47  ;;  %v1585_v49 = vpop.f32.mrb[1].mxu0 }
 0x1fb   : > { %v1819_v50 = vadd.f32 %v9431_v46, %v1585_v49  ;;  %v1587_v51 = vpop.f32.mrb[2].mxu0 }
 0x1fc   : > { %v1946_v52 = vmul.f32 0.01, %v1818_v48  ;;  %v1820_v53 = vadd.f32 %v9428_v45, %v1587_v51  ;;  %v1589_v54 = vpop.f32.mrb[3].mxu0  ;;  %vm1882_vm1 = vcmp.ge.f32.partialorder %v1818_v48, 0.0 }
 0x1fd   : > { %v1947_v55 = vmul.f32 0.01, %v1819_v50  ;;  %v1821_v56 = vadd.f32 %v9431_v46, %v1589_v54  ;;  %vm1883_vm3 = vcmp.ge.f32.partialorder %v1819_v50, 0.0 }
 0x1fe   : > { %vm1884_vm2 = vcmp.ge.f32.partialorder %v1820_v53, 0.0  ;;  %v1948_v57 = vmul.f32 0.01, %v1820_v53  ;;  %v2010_v59 = vsel %vm1882_vm1, %v1818_v48, %v1946_v52 }
 0x1ff   : > { %v1949_v58 = vmul.f32 0.01, %v1821_v56  ;;  %vm1885_vm4 = vcmp.ge.f32.partialorder %v1821_v56, 0.0  ;;  %v2011_v62 = vsel %vm1883_vm3, %v1819_v50, %v1947_v55 }
 0x200   : > { %v2012_v60 = vsel %vm1884_vm2, %v1820_v53, %v1948_v57  ;;  %v8297_v53 = vld [vmem:[%s11218_s3 + $0x40] ss:$8 sps:$4 sm:$0xff]  }
 0x201   : > { %v1593_v61 = vpop.f32.mrb[4].mxu0  ;;  %v2013_v63 = vsel %vm1885_vm4, %v1821_v56, %v1949_v58  ;;  %v2074_v0 = vpack.c.bf16 %v2012_v60, %v2010_v59  ;;  %v8302_v56 = vld [vmem:[%s11218_s3 + $0x54] ss:$8 sps:$4 sm:$0xff]  }
 0x202   : > { %v1822_v1 = vadd.f32 %v9428_v45, %v1593_v61  ;;  %v1595_v3 = vpop.f32.mrb[5].mxu0  ;;  %v2075_v4 = vpack.c.bf16 %v2013_v63, %v2011_v62  ;;  %v8300_v63 = vld [vmem:[%s11218_s3 + $0x50] ss:$8 sps:$4 sm:$0xff]  }
 0x203   : > { %v1823_v6 = vadd.f32 %v9431_v46, %v1595_v3  ;;  %v1597_v7 = vpop.f32.mrb[6].mxu0 }
 0x204   : > { %v1950_v9 = vmul.f32 0.01, %v1822_v1  ;;  %v1824_v10 = vadd.f32 %v9428_v45, %v1597_v7  ;;  %v1599_v11 = vpop.f32.mrb[7].mxu0  ;;  %2427 = vmatprep.mubr.bf16.mxu1 %v2075_v4  ;;  %vm1886_vm5 = vcmp.ge.f32.partialorder %v1822_v1, 0.0 }
 0x205   : > { %v1951_v12 = vmul.f32 0.01, %v1823_v6  ;;  %v1825_v13 = vadd.f32 %v9431_v46, %v1599_v11  ;;  %2428 = vmatmul.mubr.bf16.vlgmr.msra.gmra.mrb[0].mxu1 %v2074_v0  ;;  %vm1887_vm6 = vcmp.ge.f32.partialorder %v1823_v6, 0.0  ;;  %v8303_v11 = vld [vmem:[%s11218_s3 + $0x60] ss:$8 sps:$4 sm:$0xff]  }
 0x206   : > { %vm1888_vm7 = vcmp.ge.f32.partialorder %v1824_v10, 0.0  ;;  %v1952_v14 = vmul.f32 0.01, %v1824_v10  ;;  %2669 = vmatpush1.bf16.msra.mxu1 %v8285_v5  ;;  %v2014_v18 = vsel %vm1886_vm5, %v1822_v1, %v1950_v9  ;;  %v8305_v1 = vld [vmem:[%s11218_s3 + $0x64] ss:$8 sps:$4 sm:$0xff]  }
 0x207   : > { %vm1889_vm8 = vcmp.ge.f32.partialorder %v1825_v13, 0.0  ;;  %v1953_v16 = vmul.f32 0.01, %v1825_v13  ;;  %2670 = vmatprep.subr.bf16.mxu1 %v8290_v8  ;;  %v2015_v21 = vsel %vm1887_vm6, %v1823_v6, %v1951_v12 }
 0x208   : > { %v2016_v19 = vsel %vm1888_vm7, %v1824_v10, %v1952_v14 }
 0x209   : > { %v1603_v20 = vpop.f32.mrb[8].mxu0  ;;  %v2017_v22 = vsel %vm1889_vm8, %v1825_v13, %v1953_v16  ;;  %v9453_v23 = vpack.c.bf16 %v2016_v19, %v2014_v18 }
 0x20a   : > { %v1826_v24 = vadd.f32 %v9428_v45, %v1603_v20  ;;  %v1605_v25 = vpop.f32.mrb[9].mxu0  ;;  %2671 = vmatpush1.bf16.msra.mxu1 %v8288_v15  ;;  %v9459_v27 = vpack.c.bf16 %v2017_v22, %v2015_v21  ;;  %v8308_v15 = vld [vmem:[%s11218_s3 + $0x74] ss:$8 sps:$4 sm:$0xff]   ;;  %v8306_v22 = vld [vmem:[%s11218_s3 + $0x70] ss:$8 sps:$4 sm:$0xff]  }
 0x20b   : > { %v1827_v28 = vadd.f32 %v9431_v46, %v1605_v25  ;;  %v1607_v29 = vpop.f32.mrb[10].mxu0  ;;  %2672 = vmatprep.subr.bf16.mxu1 %v8293_v17  ;;  %v8311_v25 = vld [vmem:[%s11218_s3 + $0x84] ss:$8 sps:$4 sm:$0xff]  }
 0x20c   : > { %v1954_v31 = vmul.f32 0.01, %v1826_v24  ;;  %v1828_v32 = vadd.f32 %v9428_v45, %v1607_v29  ;;  %v1609_v33 = vpop.f32.mrb[11].mxu0  ;;  %vm1890_vm9 = vcmp.ge.f32.partialorder %v1826_v24, 0.0 }
 0x20d   : > { %v1955_v34 = vmul.f32 0.01, %v1827_v28  ;;  %v1829_v35 = vadd.f32 %v9431_v46, %v1609_v33  ;;  %vm1891_vm10 = vcmp.ge.f32.partialorder %v1827_v28, 0.0 }
 0x20e   : > { %vm1892_vm11 = vcmp.ge.f32.partialorder %v1828_v32, 0.0  ;;  %v1956_v36 = vmul.f32 0.01, %v1828_v32  ;;  %2673 = vmatpush1.bf16.msra.mxu1 %v8291_v26  ;;  %v2018_v40 = vsel %vm1890_vm9, %v1826_v24, %v1954_v31 }
 0x20f   : > { %vm1893_vm12 = vcmp.ge.f32.partialorder %v1829_v35, 0.0  ;;  %v1957_v38 = vmul.f32 0.01, %v1829_v35  ;;  %2674 = vmatprep.subr.bf16.mxu1 %v8296_v30  ;;  %v2019_v47 = vsel %vm1891_vm10, %v1827_v28, %v1955_v34 }
 0x210   : > { %v2020_v41 = vsel %vm1892_vm11, %v1828_v32, %v1956_v36  ;;  %v8309_v36 = vld [vmem:[%s11218_s3 + $0x80] ss:$8 sps:$4 sm:$0xff]  }
 0x211   : > { %v1613_v43 = vpop.f32.mrb[12].mxu0  ;;  %v2021_v48 = vsel %vm1893_vm12, %v1829_v35, %v1957_v38  ;;  %v9473_v49 = vpack.c.bf16 %v2020_v41, %v2018_v40 }
 0x212   : > { %v1830_v50 = vadd.f32 %v9428_v45, %v1613_v43  ;;  %v1615_v51 = vpop.f32.mrb[13].mxu0  ;;  %v9476_v52 = vpack.c.bf16 %v2021_v48, %v2019_v47  ;;  %2675 = vmatpush1.bf16.msra.mxu1 %v8294_v37 }
 0x213   : > { %v1831_v54 = vadd.f32 %v9431_v46, %v1615_v51  ;;  %v1617_v55 = vpop.f32.mrb[14].mxu0  ;;  %2676 = vmatprep.subr.bf16.mxu1 %v8299_v39  ;;  %v8314_v39 = vld [vmem:[%s11218_s3 + $0x94] ss:$8 sps:$4 sm:$0xff]   ;;  %v8312_v51 = vld [vmem:[%s11218_s3 + $0x90] ss:$8 sps:$4 sm:$0xff]  }
 0x214   : > { %v1958_v57 = vmul.f32 0.01, %v1830_v50  ;;  %v1832_v58 = vadd.f32 %v9428_v45, %v1617_v55  ;;  %v1619_v59 = vpop.f32.mrb[15].mxu0  ;;  %2437 = vmatprep.mubr.bf16.mxu1 %v9476_v52  ;;  %vm1894_vm13 = vcmp.ge.f32.partialorder %v1830_v50, 0.0 }
 0x215   : > { %v1959_v60 = vmul.f32 0.01, %v1831_v54  ;;  %v1833_v61 = vadd.f32 %v9431_v46, %v1619_v59  ;;  %2438 = vmatmul.mubr.bf16.gmra.mrb[4].mxu1 %v9473_v49  ;;  %vm1895_vm14 = vcmp.ge.f32.partialorder %v1831_v54, 0.0 }
 0x216   : > { %vm1896_vm15 = vcmp.ge.f32.partialorder %v1832_v58, 0.0  ;;  %v1960_v62 = vmul.f32 0.01, %v1832_v58  ;;  %2677 = vmatpush1.bf16.msra.mxu1 %v8297_v53  ;;  %v2022_v3 = vsel %vm1894_vm13, %v1830_v50, %v1958_v57 }
 0x217   : > { %vm1897_vm0 = vcmp.ge.f32.partialorder %v1833_v61, 0.0  ;;  %v1961_v0 = vmul.f32 0.01, %v1833_v61  ;;  %2678 = vmatprep.subr.bf16.mxu1 %v8302_v56  ;;  %v2023_v6 = vsel %vm1895_vm14, %v1831_v54, %v1959_v60  ;;  %v8317_v54 = vld [vmem:[%s11218_s3 + $0xa4] ss:$8 sps:$4 sm:$0xff]  }
 0x218   : > { %v2024_v4 = vsel %vm1896_vm15, %v1832_v58, %v1960_v62 }
 0x219   : > { %v1623_v5 = vpop.f32.mrb[16].mxu0  ;;  %v2025_v7 = vsel %vm1897_vm0, %v1833_v61, %v1961_v0  ;;  %v9495_v8 = vpack.c.bf16 %v2024_v4, %v2022_v3  ;;  %v8320_v4 = vld [vmem:[%s11218_s3 + $0xb4] ss:$8 sps:$4 sm:$0xff]  }
 0x21a   : > { %v1834_v9 = vadd.f32 %v9428_v45, %v1623_v5  ;;  %v1625_v10 = vpop.f32.mrb[17].mxu0  ;;  %2679 = vmatpush1.bf16.msra.mxu1 %v8300_v63  ;;  %v9501_v12 = vpack.c.bf16 %v2025_v7, %v2023_v6  ;;  %v8315_v63 = vld [vmem:[%s11218_s3 + $0xa0] ss:$8 sps:$4 sm:$0xff]  }
 0x21b   : > { %v1835_v13 = vadd.f32 %v9431_v46, %v1625_v10  ;;  %v1627_v14 = vpop.f32.mrb[18].mxu0  ;;  %2680 = vmatprep.subr.bf16.mxu1 %v8305_v1 }
 0x21c   : > { %v1962_v16 = vmul.f32 0.01, %v1834_v9  ;;  %v1836_v17 = vadd.f32 %v9428_v45, %v1627_v14  ;;  %v1629_v18 = vpop.f32.mrb[19].mxu0  ;;  %vm1898_vm1 = vcmp.ge.f32.partialorder %v1834_v9, 0.0 }
 0x21d   : > { %v1963_v19 = vmul.f32 0.01, %v1835_v13  ;;  %v1837_v20 = vadd.f32 %v9431_v46, %v1629_v18  ;;  %vm1899_vm2 = vcmp.ge.f32.partialorder %v1835_v13, 0.0 }
 0x21e   : > { %vm1900_vm3 = vcmp.ge.f32.partialorder %v1836_v17, 0.0  ;;  %v1964_v21 = vmul.f32 0.01, %v1836_v17  ;;  %2681 = vmatpush1.bf16.msra.mxu1 %v8303_v11  ;;  %v2026_v26 = vsel %vm1898_vm1, %v1834_v9, %v1962_v16 }
 0x21f   : > { %vm1901_vm4 = vcmp.ge.f32.partialorder %v1837_v20, 0.0  ;;  %v1965_v24 = vmul.f32 0.01, %v1837_v20  ;;  %2682 = vmatprep.subr.bf16.mxu1 %v8308_v15  ;;  %v2027_v30 = vsel %vm1899_vm2, %v1835_v13, %v1963_v19  ;;  %v8318_v13 = vld [vmem:[%s11218_s3 + $0xb0] ss:$8 sps:$4 sm:$0xff]  }
 0x220   : > { %v2028_v28 = vsel %vm1900_vm3, %v1836_v17, %v1964_v21  ;;  %v8323_v15 = vld [vmem:[%s11218_s3 + $0xc4] ss:$8 sps:$4 sm:$0xff]  }
 0x221   : > { %v1633_v29 = vpop.f32.mrb[20].mxu0  ;;  %v2029_v31 = vsel %vm1901_vm4, %v1837_v20, %v1965_v24  ;;  %v9515_v32 = vpack.c.bf16 %v2028_v28, %v2026_v26  ;;  %v8321_v26 = vld [vmem:[%s11218_s3 + $0xc0] ss:$8 sps:$4 sm:$0xff]  }
 0x222   : > { %v1838_v33 = vadd.f32 %v9428_v45, %v1633_v29  ;;  %v1635_v34 = vpop.f32.mrb[21].mxu0  ;;  %v9518_v35 = vpack.c.bf16 %v2029_v31, %v2027_v30  ;;  %2683 = vmatpush1.bf16.msra.mxu1 %v8306_v22  ;;  %v8326_v30 = vld [vmem:[%s11218_s3 + $0xd4] ss:$8 sps:$4 sm:$0xff]  }
 0x223   : > { %v1839_v37 = vadd.f32 %v9431_v46, %v1635_v34  ;;  %v1637_v38 = vpop.f32.mrb[22].mxu0  ;;  %2684 = vmatprep.subr.bf16.mxu1 %v8311_v25 }
 0x224   : > { %v1966_v40 = vmul.f32 0.01, %v1838_v33  ;;  %v1840_v41 = vadd.f32 %v9428_v45, %v1637_v38  ;;  %v1639_v43 = vpop.f32.mrb[23].mxu0  ;;  %2447 = vmatprep.mubr.bf16.mxu1 %v9518_v35  ;;  %vm1902_vm5 = vcmp.ge.f32.partialorder %v1838_v33, 0.0 }
 0x225   : > { %v1967_v47 = vmul.f32 0.01, %v1839_v37  ;;  %v1841_v48 = vadd.f32 %v9431_v46, %v1639_v43  ;;  %2448 = vmatmul.mubr.bf16.gmra.mrb[8].mxu1 %v9515_v32  ;;  %vm1903_vm6 = vcmp.ge.f32.partialorder %v1839_v37, 0.0 }
 0x226   : > { %vm1904_vm7 = vcmp.ge.f32.partialorder %v1840_v41, 0.0  ;;  %v1968_v50 = vmul.f32 0.01, %v1840_v41  ;;  %2685 = vmatpush1.bf16.msra.mxu1 %v8309_v36  ;;  %v2030_v55 = vsel %vm1902_vm5, %v1838_v33, %v1966_v40 }
 0x227   : > { %vm1905_vm8 = vcmp.ge.f32.partialorder %v1841_v48, 0.0  ;;  %v1969_v53 = vmul.f32 0.01, %v1841_v48  ;;  %2686 = vmatprep.subr.bf16.mxu1 %v8314_v39  ;;  %v2031_v58 = vsel %vm1903_vm6, %v1839_v37, %v1967_v47  ;;  %v8324_v39 = vld [vmem:[%s11218_s3 + $0xd0] ss:$8 sps:$4 sm:$0xff]  }
 0x228   : > { %v2032_v56 = vsel %vm1904_vm7, %v1840_v41, %v1968_v50  ;;  %v8329_v41 = vld [vmem:[%s11218_s3 + $0xe4] ss:$8 sps:$4 sm:$0xff]  }
 0x229   : > { %v1643_v57 = vpop.f32.mrb[24].mxu0  ;;  %v2033_v59 = vsel %vm1905_vm8, %v1841_v48, %v1969_v53  ;;  %v9537_v60 = vpack.c.bf16 %v2032_v56, %v2030_v55  ;;  %v8327_v56 = vld [vmem:[%s11218_s3 + $0xe0] ss:$8 sps:$4 sm:$0xff]  }
 0x22a   : > { %v1842_v61 = vadd.f32 %v9428_v45, %v1643_v57  ;;  %v1645_v62 = vpop.f32.mrb[25].mxu0  ;;  %2687 = vmatpush1.bf16.msra.mxu1 %v8312_v51  ;;  %v9543_v0 = vpack.c.bf16 %v2033_v59, %v2031_v58 }
 0x22b   : > { %v1843_v1 = vadd.f32 %v9431_v46, %v1645_v62  ;;  %v1647_v3 = vpop.f32.mrb[26].mxu0  ;;  %2688 = vmatprep.subr.bf16.mxu1 %v8317_v54 }
 0x22c   : > { %v1970_v5 = vmul.f32 0.01, %v1842_v61  ;;  %v1844_v6 = vadd.f32 %v9428_v45, %v1647_v3  ;;  %v1649_v7 = vpop.f32.mrb[27].mxu0  ;;  %vm1906_vm9 = vcmp.ge.f32.partialorder %v1842_v61, 0.0 }
 0x22d   : > { %v1971_v9 = vmul.f32 0.01, %v1843_v1  ;;  %v1845_v10 = vadd.f32 %v9431_v46, %v1649_v7  ;;  %vm1907_vm10 = vcmp.ge.f32.partialorder %v1843_v1, 0.0 }
 0x22e   : > { %vm1908_vm11 = vcmp.ge.f32.partialorder %v1844_v6, 0.0  ;;  %v1972_v11 = vmul.f32 0.01, %v1844_v6  ;;  %2689 = vmatpush1.bf16.msra.mxu1 %v8315_v63  ;;  %v2034_v16 = vsel %vm1906_vm9, %v1842_v61, %v1970_v5  ;;  %v8332_v61 = vld [vmem:[%s11218_s3 + $0xf4] ss:$8 sps:$4 sm:$0xff]  }
 0x22f   : > { %vm1909_vm12 = vcmp.ge.f32.partialorder %v1845_v10, 0.0  ;;  %v1973_v14 = vmul.f32 0.01, %v1845_v10  ;;  %2690 = vmatprep.subr.bf16.mxu1 %v8320_v4  ;;  %v2035_v19 = vsel %vm1907_vm10, %v1843_v1, %v1971_v9  ;;  %v8335_v9 = vld [vmem:[%s11218_s3 + $0x204] ss:$8 sps:$4 sm:$0xff]  }
 0x230   : > { %v2036_v17 = vsel %vm1908_vm11, %v1844_v6, %v1972_v11  ;;  %v8330_v6 = vld [vmem:[%s11218_s3 + $0xf0] ss:$8 sps:$4 sm:$0xff]  }
 0x231   : > { %v1653_v18 = vpop.f32.mrb[28].mxu0  ;;  %v2037_v20 = vsel %vm1909_vm12, %v1845_v10, %v1973_v14  ;;  %v9557_v21 = vpack.c.bf16 %v2036_v17, %v2034_v16 }
 0x232   : > { %v1846_v22 = vadd.f32 %v9428_v45, %v1653_v18  ;;  %v1655_v24 = vpop.f32.mrb[29].mxu0  ;;  %v9560_v25 = vpack.c.bf16 %v2037_v20, %v2035_v19  ;;  %2691 = vmatpush1.bf16.msra.mxu1 %v8318_v13 }
 0x233   : > { %v1847_v28 = vadd.f32 %v9431_v46, %v1655_v24  ;;  %v1657_v29 = vpop.f32.mrb[30].mxu0  ;;  %2692 = vmatprep.subr.bf16.mxu1 %v8323_v15 }
 0x234   : > { %v1974_v31 = vmul.f32 0.01, %v1846_v22  ;;  %v1848_v33 = vadd.f32 %v9428_v45, %v1657_v29  ;;  %v1659_v34 = vpop.f32.mrb[31].mxu0  ;;  %2457 = vmatprep.mubr.bf16.mxu1 %v9560_v25  ;;  %vm1910_vm13 = vcmp.ge.f32.partialorder %v1846_v22, 0.0 }
 0x235   : > { %v1975_v36 = vmul.f32 0.01, %v1847_v28  ;;  %v1849_v37 = vadd.f32 %v9431_v46, %v1659_v34  ;;  %2458 = vmatmul.mubr.bf16.gmra.mrb[12].mxu1 %v9557_v21  ;;  %vm1911_vm14 = vcmp.ge.f32.partialorder %v1847_v28, 0.0 }
 0x236   : > { %vm1912_vm15 = vcmp.ge.f32.partialorder %v1848_v33, 0.0  ;;  %v1976_v38 = vmul.f32 0.01, %v1848_v33  ;;  %2693 = vmatpush1.bf16.msra.mxu1 %v8321_v26  ;;  %v2038_v43 = vsel %vm1910_vm13, %v1846_v22, %v1974_v31 }
 0x237   : > { %vm1913_vm0 = vcmp.ge.f32.partialorder %v1849_v37, 0.0  ;;  %v1977_v40 = vmul.f32 0.01, %v1849_v37  ;;  %2694 = vmatprep.subr.bf16.mxu1 %v8326_v30  ;;  %v2039_v50 = vsel %vm1911_vm14, %v1847_v28, %v1975_v36 }
 0x238   : > { %v2040_v47 = vsel %vm1912_vm15, %v1848_v33, %v1976_v38 }
 0x239   : > { %v1663_v48 = vpop.f32.mrb[32].mxu0  ;;  %v2041_v51 = vsel %vm1913_vm0, %v1849_v37, %v1977_v40  ;;  %v9579_v53 = vpack.c.bf16 %v2040_v47, %v2038_v43 }
 0x23a   : > { %v1850_v54 = vadd.f32 %v9428_v45, %v1663_v48  ;;  %v1665_v55 = vpop.f32.mrb[33].mxu0  ;;  %2695 = vmatpush1.bf16.msra.mxu1 %v8324_v39  ;;  %v9585_v57 = vpack.c.bf16 %v2041_v51, %v2039_v50 }
 0x23b   : > { %v1851_v58 = vadd.f32 %v9431_v46, %v1665_v55  ;;  %v1667_v59 = vpop.f32.mrb[34].mxu0  ;;  %2696 = vmatprep.subr.bf16.mxu1 %v8329_v41 }
 0x23c   : > { %v1978_v62 = vmul.f32 0.01, %v1850_v54  ;;  %v1852_v63 = vadd.f32 %v9428_v45, %v1667_v59  ;;  %v1669_v1 = vpop.f32.mrb[35].mxu0  ;;  %vm1914_vm1 = vcmp.ge.f32.partialorder %v1850_v54, 0.0 }
 0x23d   : > { %v1979_v3 = vmul.f32 0.01, %v1851_v58  ;;  %v1853_v4 = vadd.f32 %v9431_v46, %v1669_v1  ;;  %vm1915_vm2 = vcmp.ge.f32.partialorder %v1851_v58, 0.0 }
 0x23e   : > { %vm1916_vm3 = vcmp.ge.f32.partialorder %v1852_v63, 0.0  ;;  %v1980_v5 = vmul.f32 0.01, %v1852_v63  ;;  %2697 = vmatpush1.bf16.msra.mxu1 %v8327_v56  ;;  %v2042_v10 = vsel %vm1914_vm1, %v1850_v54, %v1978_v62 }
 0x23f   : > { %vm1917_vm4 = vcmp.ge.f32.partialorder %v1853_v4, 0.0  ;;  %v1981_v7 = vmul.f32 0.01, %v1853_v4  ;;  %2698 = vmatprep.subr.bf16.mxu1 %v8332_v61  ;;  %v2043_v14 = vsel %vm1915_vm2, %v1851_v58, %v1979_v3 }
 0x240   : > { %v2044_v11 = vsel %vm1916_vm3, %v1852_v63, %v1980_v5 }
 0x241   : > { %v1673_v13 = vpop.f32.mrb[36].mxu0  ;;  %v2045_v15 = vsel %vm1917_vm4, %v1853_v4, %v1981_v7  ;;  %v9599_v16 = vpack.c.bf16 %v2044_v11, %v2042_v10 }
 0x242   : > { %v1854_v17 = vadd.f32 %v9428_v45, %v1673_v13  ;;  %v1675_v18 = vpop.f32.mrb[37].mxu0  ;;  %v9602_v19 = vpack.c.bf16 %v2045_v15, %v2043_v14  ;;  %2699 = vmatpush1.bf16.msra.mxu1 %v8330_v6 }
 0x243   : > { %v1855_v20 = vadd.f32 %v9431_v46, %v1675_v18  ;;  %v1677_v22 = vpop.f32.mrb[38].mxu0  ;;  %2990 = vmatprep.subr.bf16.mxu1 %v8335_v9 }
 0x244   : > { %v1982_v24 = vmul.f32 0.01, %v1854_v17  ;;  %v1856_v26 = vadd.f32 %v9428_v45, %v1677_v22  ;;  %v1679_v28 = vpop.f32.mrb[39].mxu0  ;;  %2467 = vmatprep.mubr.bf16.mxu1 %v9602_v19  ;;  %vm1918_vm5 = vcmp.ge.f32.partialorder %v1854_v17, 0.0 }
 0x245   : > { %v1983_v29 = vmul.f32 0.01, %v1855_v20  ;;  %v1857_v30 = vadd.f32 %v9431_v46, %v1679_v28  ;;  %2468 = vmatmul.mubr.bf16.gmra.mrb[16].mxu1 %v9599_v16  ;;  %vm1919_vm6 = vcmp.ge.f32.partialorder %v1855_v20, 0.0 }
 0x246   : > { %vm1920_vm7 = vcmp.ge.f32.partialorder %v1856_v26, 0.0  ;;  %v1984_v31 = vmul.f32 0.01, %v1856_v26  ;;  %v2046_v34 = vsel %vm1918_vm5, %v1854_v17, %v1982_v24 }
 0x247   : > { %vm1921_vm8 = vcmp.ge.f32.partialorder %v1857_v30, 0.0  ;;  %v1985_v33 = vmul.f32 0.01, %v1857_v30  ;;  %v2047_v38 = vsel %vm1919_vm6, %v1855_v20, %v1983_v29 }
 0x248   : > { %v2048_v36 = vsel %vm1920_vm7, %v1856_v26, %v1984_v31 }
 0x249   : > { %v1683_v37 = vpop.f32.mrb[40].mxu0  ;;  %v2049_v39 = vsel %vm1921_vm8, %v1857_v30, %v1985_v33  ;;  %v9609_v40 = vpack.c.bf16 %v2048_v36, %v2046_v34 }
 0x24a   : > { %v1858_v41 = vadd.f32 %v9428_v45, %v1683_v37  ;;  %v1685_v43 = vpop.f32.mrb[41].mxu0  ;;  %v9612_v47 = vpack.c.bf16 %v2049_v39, %v2047_v38 }
 0x24b   : > { %v1859_v48 = vadd.f32 %v9431_v46, %v1685_v43  ;;  %v1687_v50 = vpop.f32.mrb[42].mxu0 }
 0x24c   : > { %v1986_v51 = vmul.f32 0.01, %v1858_v41  ;;  %v1860_v54 = vadd.f32 %v9428_v45, %v1687_v50  ;;  %v1689_v55 = vpop.f32.mrb[43].mxu0  ;;  %vm1922_vm9 = vcmp.ge.f32.partialorder %v1858_v41, 0.0 }
 0x24d   : > { %v1987_v56 = vmul.f32 0.01, %v1859_v48  ;;  %v1861_v58 = vadd.f32 %v9431_v46, %v1689_v55  ;;  %vm1923_vm10 = vcmp.ge.f32.partialorder %v1859_v48, 0.0 }
 0x24e   : > { %vm1924_vm11 = vcmp.ge.f32.partialorder %v1860_v54, 0.0  ;;  %v1988_v59 = vmul.f32 0.01, %v1860_v54  ;;  %v2050_v62 = vsel %vm1922_vm9, %v1858_v41, %v1986_v51 }
 0x24f   : > { %vm1925_vm12 = vcmp.ge.f32.partialorder %v1861_v58, 0.0  ;;  %v1989_v61 = vmul.f32 0.01, %v1861_v58  ;;  %v2051_v3 = vsel %vm1923_vm10, %v1859_v48, %v1987_v56 }
 0x250   : > { %v2052_v63 = vsel %vm1924_vm11, %v1860_v54, %v1988_v59 }
 0x251   : > { %v1693_v1 = vpop.f32.mrb[44].mxu0  ;;  %v2053_v4 = vsel %vm1925_vm12, %v1861_v58, %v1989_v61  ;;  %v9617_v5 = vpack.c.bf16 %v2052_v63, %v2050_v62 }
 0x252   : > { %v1862_v6 = vadd.f32 %v9428_v45, %v1693_v1  ;;  %v1695_v7 = vpop.f32.mrb[45].mxu0  ;;  %v9620_v9 = vpack.c.bf16 %v2053_v4, %v2051_v3 }
 0x253   : > { %v1863_v10 = vadd.f32 %v9431_v46, %v1695_v7  ;;  %v1697_v11 = vpop.f32.mrb[46].mxu0 }
 0x254   : > { %v1990_v13 = vmul.f32 0.01, %v1862_v6  ;;  %v1864_v14 = vadd.f32 %v9428_v45, %v1697_v11  ;;  %v1699_v15 = vpop.f32.mrb[47].mxu0  ;;  %2477 = vmatprep.mubr.bf16.mxu1 %v9620_v9  ;;  %vm1926_vm13 = vcmp.ge.f32.partialorder %v1862_v6, 0.0 }
 0x255   : > { %v1991_v17 = vmul.f32 0.01, %v1863_v10  ;;  %v1865_v18 = vadd.f32 %v9431_v46, %v1699_v15  ;;  %2478 = vmatmul.mubr.bf16.gmra.mrb[20].mxu1 %v9617_v5  ;;  %vm1927_vm14 = vcmp.ge.f32.partialorder %v1863_v10, 0.0 }
 0x256   : > { %vm1928_vm15 = vcmp.ge.f32.partialorder %v1864_v14, 0.0  ;;  %v1992_v20 = vmul.f32 0.01, %v1864_v14  ;;  %v2054_v24 = vsel %vm1926_vm13, %v1862_v6, %v1990_v13 }
 0x257   : > { %vm1929_vm0 = vcmp.ge.f32.partialorder %v1865_v18, 0.0  ;;  %v1993_v22 = vmul.f32 0.01, %v1865_v18  ;;  %v2055_v29 = vsel %vm1927_vm14, %v1863_v10, %v1991_v17 }
 0x258   : > { %v2056_v26 = vsel %vm1928_vm15, %v1864_v14, %v1992_v20 }
 0x259   : > { %v1703_v28 = vpop.f32.mrb[48].mxu0  ;;  %v2057_v30 = vsel %vm1929_vm0, %v1865_v18, %v1993_v22  ;;  %v9627_v31 = vpack.c.bf16 %v2056_v26, %v2054_v24 }
 0x25a   : > { %v1866_v33 = vadd.f32 %v9428_v45, %v1703_v28  ;;  %v1705_v34 = vpop.f32.mrb[49].mxu0  ;;  %v9630_v36 = vpack.c.bf16 %v2057_v30, %v2055_v29 }
 0x25b   : > { %v1867_v37 = vadd.f32 %v9431_v46, %v1705_v34  ;;  %v1707_v38 = vpop.f32.mrb[50].mxu0 }
 0x25c   : > { %v1994_v39 = vmul.f32 0.01, %v1866_v33  ;;  %v1868_v41 = vadd.f32 %v9428_v45, %v1707_v38  ;;  %v1709_v43 = vpop.f32.mrb[51].mxu0  ;;  %vm1930_vm1 = vcmp.ge.f32.partialorder %v1866_v33, 0.0 }
 0x25d   : > { %v1995_v48 = vmul.f32 0.01, %v1867_v37  ;;  %v1869_v50 = vadd.f32 %v9431_v46, %v1709_v43  ;;  %vm1931_vm2 = vcmp.ge.f32.partialorder %v1867_v37, 0.0 }
 0x25e   : > { %vm1932_vm3 = vcmp.ge.f32.partialorder %v1868_v41, 0.0  ;;  %v1996_v51 = vmul.f32 0.01, %v1868_v41  ;;  %v2058_v55 = vsel %vm1930_vm1, %v1866_v33, %v1994_v39 }
 0x25f   : > { %vm1933_vm4 = vcmp.ge.f32.partialorder %v1869_v50, 0.0  ;;  %v1997_v54 = vmul.f32 0.01, %v1869_v50  ;;  %v2059_v59 = vsel %vm1931_vm2, %v1867_v37, %v1995_v48 }
 0x260   : > { %v2060_v56 = vsel %vm1932_vm3, %v1868_v41, %v1996_v51 }
 0x261   : > { %v1713_v58 = vpop.f32.mrb[52].mxu0  ;;  %v2061_v61 = vsel %vm1933_vm4, %v1869_v50, %v1997_v54  ;;  %v9635_v62 = vpack.c.bf16 %v2060_v56, %v2058_v55 }
 0x262   : > { %v1870_v63 = vadd.f32 %v9428_v45, %v1713_v58  ;;  %v1715_v1 = vpop.f32.mrb[53].mxu0  ;;  %v9638_v3 = vpack.c.bf16 %v2061_v61, %v2059_v59 }
 0x263   : > { %v1871_v4 = vadd.f32 %v9431_v46, %v1715_v1  ;;  %v1717_v6 = vpop.f32.mrb[54].mxu0 }
 0x264   : > { %v1998_v7 = vmul.f32 0.01, %v1870_v63  ;;  %v1872_v10 = vadd.f32 %v9428_v45, %v1717_v6  ;;  %v1719_v11 = vpop.f32.mrb[55].mxu0  ;;  %2487 = vmatprep.mubr.bf16.mxu1 %v9638_v3  ;;  %vm1934_vm5 = vcmp.ge.f32.partialorder %v1870_v63, 0.0 }
 0x265   : > { %v1999_v13 = vmul.f32 0.01, %v1871_v4  ;;  %v1873_v14 = vadd.f32 %v9431_v46, %v1719_v11  ;;  %2488 = vmatmul.mubr.bf16.gmra.mrb[24].mxu1 %v9635_v62  ;;  %vm1935_vm6 = vcmp.ge.f32.partialorder %v1871_v4, 0.0 }
 0x266   : > { %vm1936_vm7 = vcmp.ge.f32.partialorder %v1872_v10, 0.0  ;;  %v2000_v15 = vmul.f32 0.01, %v1872_v10  ;;  %v2062_v18 = vsel %vm1934_vm5, %v1870_v63, %v1998_v7 }
 0x267   : > { %vm1937_vm8 = vcmp.ge.f32.partialorder %v1873_v14, 0.0  ;;  %v2001_v17 = vmul.f32 0.01, %v1873_v14  ;;  %v2063_v24 = vsel %vm1935_vm6, %v1871_v4, %v1999_v13 }
 0x268   : > { %v2064_v20 = vsel %vm1936_vm7, %v1872_v10, %v2000_v15 }
 0x269   : > { %v1723_v22 = vpop.f32.mrb[56].mxu0  ;;  %v2065_v26 = vsel %vm1937_vm8, %v1873_v14, %v2001_v17  ;;  %v9645_v28 = vpack.c.bf16 %v2064_v20, %v2062_v18 }
 0x26a   : > { %v1874_v29 = vadd.f32 %v9428_v45, %v1723_v22  ;;  %v1725_v30 = vpop.f32.mrb[57].mxu0  ;;  %v9648_v33 = vpack.c.bf16 %v2065_v26, %v2063_v24  ;;  %v8333_v26 = vld [vmem:[%s11218_s3 + $0x200] ss:$8 sps:$4 sm:$0xff]  }
 0x26b   : > { %v1875_v34 = vadd.f32 %v9431_v46, %v1725_v30  ;;  %v1727_v37 = vpop.f32.mrb[58].mxu0  ;;  %v8338_v30 = vld [vmem:[%s11218_s3 + $0x214] ss:$8 sps:$4 sm:$0xff]  }
 0x26c   : > { %v2002_v38 = vmul.f32 0.01, %v1874_v29  ;;  %v1876_v39 = vadd.f32 %v9428_v45, %v1727_v37  ;;  %v1729_v41 = vpop.f32.mrb[59].mxu0  ;;  %vm1938_vm9 = vcmp.ge.f32.partialorder %v1874_v29, 0.0  ;;  %v8341_v37 = vld [vmem:[%s11218_s3 + $0x224] ss:$8 sps:$4 sm:$0xff]  }
 0x26d   : > { %v2003_v43 = vmul.f32 0.01, %v1875_v34  ;;  %v1877_v48 = vadd.f32 %v9431_v46, %v1729_v41  ;;  %vm1939_vm10 = vcmp.ge.f32.partialorder %v1875_v34, 0.0  ;;  %v8342_v41 = vld [vmem:[%s11218_s3 + $0x230] ss:$8 sps:$4 sm:$0xff]  }
 0x26e   : > { %vm1940_vm11 = vcmp.ge.f32.partialorder %v1876_v39, 0.0  ;;  %v2004_v50 = vmul.f32 0.01, %v1876_v39  ;;  %v2066_v54 = vsel %vm1938_vm9, %v1874_v29, %v2002_v38  ;;  %v8339_v38 = vld [vmem:[%s11218_s3 + $0x220] ss:$8 sps:$4 sm:$0xff]  }
 0x26f   : > { %vm1941_vm12 = vcmp.ge.f32.partialorder %v1877_v48, 0.0  ;;  %v2005_v51 = vmul.f32 0.01, %v1877_v48  ;;  %v2067_v58 = vsel %vm1939_vm10, %v1875_v34, %v2003_v43  ;;  %v8336_v34 = vld [vmem:[%s11218_s3 + $0x210] ss:$8 sps:$4 sm:$0xff]  }
 0x270   : > { %v2068_v55 = vsel %vm1940_vm11, %v1876_v39, %v2004_v50  ;;  %v8344_v39 = vld [vmem:[%s11218_s3 + $0x234] ss:$8 sps:$4 sm:$0xff]   ;;  %v8347_v43 = vld [vmem:[%s11218_s3 + $0x244] ss:$8 sps:$4 sm:$0xff]  }
 0x271   : > { %v1733_v56 = vpop.f32.mrb[60].mxu0  ;;  %v2069_v59 = vsel %vm1941_vm12, %v1877_v48, %v2005_v51  ;;  %v9653_v61 = vpack.c.bf16 %v2068_v55, %v2066_v54  ;;  %v8345_v48 = vld [vmem:[%s11218_s3 + $0x240] ss:$8 sps:$4 sm:$0xff]   ;;  %v8350_v50 = vld [vmem:[%s11218_s3 + $0x254] ss:$8 sps:$4 sm:$0xff]  }
 0x272   : > { %v1878_v63 = vadd.f32 %v9428_v45, %v1733_v56  ;;  %v1735_v1 = vpop.f32.mrb[61].mxu0  ;;  %v9656_v4 = vpack.c.bf16 %v2069_v59, %v2067_v58  ;;  %v8348_v51 = vld [vmem:[%s11218_s3 + $0x250] ss:$8 sps:$4 sm:$0xff]   ;;  %v8353_v54 = vld [vmem:[%s11218_s3 + $0x264] ss:$8 sps:$4 sm:$0xff]  }
 0x273   : > { %v1879_v6 = vadd.f32 %v9431_v46, %v1735_v1  ;;  %v1737_v7 = vpop.f32.mrb[62].mxu0  ;;  %v8351_v55 = vld [vmem:[%s11218_s3 + $0x260] ss:$8 sps:$4 sm:$0xff]   ;;  %v8356_v56 = vld [vmem:[%s11218_s3 + $0x274] ss:$8 sps:$4 sm:$0xff]  }
 0x274   : > { %v2006_v10 = vmul.f32 0.01, %v1878_v63  ;;  %v1880_v11 = vadd.f32 %v9428_v45, %v1737_v7  ;;  %v1739_v13 = vpop.f32.mrb[63].mxu0  ;;  %2497 = vmatprep.mubr.bf16.mxu1 %v9656_v4  ;;  %vm1942_vm13 = vcmp.ge.f32.partialorder %v1878_v63, 0.0  ;;  %v8354_v58 = vld [vmem:[%s11218_s3 + $0x270] ss:$8 sps:$4 sm:$0xff]  }
 0x275   : > { %v2007_v14 = vmul.f32 0.01, %v1879_v6  ;;  %v1881_v15 = vadd.f32 %v9431_v46, %v1739_v13  ;;  %2498 = vmatmul.mubr.bf16.gmra.mrb[28].mxu1 %v9653_v61  ;;  %vm1943_vm14 = vcmp.ge.f32.partialorder %v1879_v6, 0.0  ;;  %v8359_v59 = vld [vmem:[%s11218_s3 + $0x284] ss:$8 sps:$4 sm:$0xff]  }
 0x276   : > { %vm1944_vm15 = vcmp.ge.f32.partialorder %v1880_v11, 0.0  ;;  %v2008_v17 = vmul.f32 0.01, %v1880_v11  ;;  %2700 = vmatprep.mubr.bf16.mxu1 %v8933_v2  ;;  %v9664_v20 = vsel %vm1942_vm13, %v1878_v63, %v2006_v10  ;;  %v8357_v63 = vld [vmem:[%s11218_s3 + $0x280] ss:$8 sps:$4 sm:$0xff]  }
 0x277   : > { %vm1945_vm0 = vcmp.ge.f32.partialorder %v1881_v15, 0.0  ;;  %v2009_v18 = vmul.f32 0.01, %v1881_v15  ;;  %v9668_v45 = vsel %vm1943_vm14, %v1879_v6, %v2007_v14  ;;  %v8362_v1 = vld [vmem:[%s11218_s3 + $0x294] ss:$8 sps:$4 sm:$0xff]  }
 0x278   : > { %v9666_v22 = vsel %vm1944_vm15, %v1880_v11, %v2008_v17  ;;  %v8360_v6 = vld [vmem:[%s11218_s3 + $0x290] ss:$8 sps:$4 sm:$0xff]   ;;  %v8365_v7 = vld [vmem:[%s11218_s3 + $0x2a4] ss:$8 sps:$4 sm:$0xff]   ;;  %v8363_v10 = vld [vmem:[%s11218_s3 + $0x2a0] ss:$8 sps:$4 sm:$0xff]  }
 0x279   : > { %v9670_v24 = vsel %vm1945_vm0, %v1881_v15, %v2009_v18  ;;  %v2104_v46 = vpack.c.bf16 %v9666_v22, %v9664_v20  ;;  %v8368_v11 = vld [vmem:[%s11218_s3 + $0x2b4] ss:$8 sps:$4 sm:$0xff]   ;;  %v8366_v13 = vld [vmem:[%s11218_s3 + $0x2b0] ss:$8 sps:$4 sm:$0xff]   ;;  %v8371_v14 = vld [vmem:[%s11218_s3 + $0x2c4] ss:$8 sps:$4 sm:$0xff]  }
 0x27a   : > { %v2105_v29 = vpack.c.bf16 %v9670_v24, %v9668_v45  ;;  %v8369_v15 = vld [vmem:[%s11218_s3 + $0x2c0] ss:$8 sps:$4 sm:$0xff]   ;;  %v8374_v17 = vld [vmem:[%s11218_s3 + $0x2d4] ss:$8 sps:$4 sm:$0xff]   ;;  %v8372_v18 = vld [vmem:[%s11218_s3 + $0x2d0] ss:$8 sps:$4 sm:$0xff]  }
 0x27b   : > { %v8426_v45 = vld [vmem:[%s11218_s3 + $0x3f0] ss:$8 sps:$4 sm:$0xff]   ;;  %v8431_v24 = vld [vmem:[%s11220_s5 + $0x104] ss:$8 sps:$4 sm:$0xff]   ;;  %v8434_v20 = vld [vmem:[%s11220_s5 + $0x114] ss:$8 sps:$4 sm:$0xff]  }
 0x27c   : > { %v8437_v22 = vld [vmem:[%s11220_s5 + $0x124] ss:$8 sps:$4 sm:$0xff]  }
 0x27d   : > { %2701 = vmatmul.mubr.bf16.vlgmr.msra.gmra.mrb[0].mxu1 %v8933_v2 }
 0x27e   : > { %2710 = vmatprep.mubr.bf16.mxu1 %v9459_v27  ;;  %2991 = vmatpush1.bf16.msra.mxu1 %v8333_v26  ;;  %v8377_v26 = vld [vmem:[%s11218_s3 + $0x2e4] ss:$8 sps:$4 sm:$0xff]  }
 0x27f   : > { %2992 = vmatprep.subr.bf16.mxu1 %v8338_v30  ;;  %v8375_v30 = vld [vmem:[%s11218_s3 + $0x2e0] ss:$8 sps:$4 sm:$0xff]  }
 0x282   : > { %2993 = vmatpush1.bf16.msra.mxu1 %v8336_v34  ;;  %v8380_v34 = vld [vmem:[%s11218_s3 + $0x2f4] ss:$8 sps:$4 sm:$0xff]  }
 0x283   : > { %2994 = vmatprep.subr.bf16.mxu1 %v8341_v37  ;;  %v8378_v37 = vld [vmem:[%s11218_s3 + $0x2f0] ss:$8 sps:$4 sm:$0xff]  }
 0x285   : > { %2711 = vmatmul.mubr.bf16.gmra.mrb[4].mxu1 %v9453_v23 }
 0x286   : > { %2720 = vmatprep.mubr.bf16.mxu1 %v9501_v12  ;;  %2995 = vmatpush1.bf16.msra.mxu1 %v8339_v38  ;;  %v8383_v38 = vld [vmem:[%s11218_s3 + $0x304] ss:$8 sps:$4 sm:$0xff]  }
 0x287   : > { %2996 = vmatprep.subr.bf16.mxu1 %v8344_v39  ;;  %v8381_v39 = vld [vmem:[%s11218_s3 + $0x300] ss:$8 sps:$4 sm:$0xff]  }
 0x28a   : > { %2997 = vmatpush1.bf16.msra.mxu1 %v8342_v41  ;;  %v8386_v41 = vld [vmem:[%s11218_s3 + $0x314] ss:$8 sps:$4 sm:$0xff]  }
 0x28b   : > { %2998 = vmatprep.subr.bf16.mxu1 %v8347_v43  ;;  %v8389_v43 = vld [vmem:[%s11218_s3 + $0x324] ss:$8 sps:$4 sm:$0xff]  }
 0x28d   : > { %2721 = vmatmul.mubr.bf16.gmra.mrb[8].mxu1 %v9495_v8 }
 0x28e   : > { %2730 = vmatprep.mubr.bf16.mxu1 %v9543_v0  ;;  %2999 = vmatpush1.bf16.msra.mxu1 %v8345_v48  ;;  %v8387_v48 = vld [vmem:[%s11218_s3 + $0x320] ss:$8 sps:$4 sm:$0xff]  }
 0x28f   : > { %3000 = vmatprep.subr.bf16.mxu1 %v8350_v50  ;;  %v8395_v50 = vld [vmem:[%s11218_s3 + $0x344] ss:$8 sps:$4 sm:$0xff]  }
 0x292   : > { %3001 = vmatpush1.bf16.msra.mxu1 %v8348_v51  ;;  %v8393_v51 = vld [vmem:[%s11218_s3 + $0x340] ss:$8 sps:$4 sm:$0xff]  }
 0x293   : > { %3002 = vmatprep.subr.bf16.mxu1 %v8353_v54  ;;  %v8401_v54 = vld [vmem:[%s11218_s3 + $0x364] ss:$8 sps:$4 sm:$0xff]  }
 0x295   : > { %2731 = vmatmul.mubr.bf16.gmra.mrb[12].mxu1 %v9537_v60 }
 0x296   : > { %2740 = vmatprep.mubr.bf16.mxu1 %v9585_v57  ;;  %3003 = vmatpush1.bf16.msra.mxu1 %v8351_v55  ;;  %v8399_v55 = vld [vmem:[%s11218_s3 + $0x360] ss:$8 sps:$4 sm:$0xff]  }
 0x297   : > { %3004 = vmatprep.subr.bf16.mxu1 %v8356_v56  ;;  %v8407_v56 = vld [vmem:[%s11218_s3 + $0x384] ss:$8 sps:$4 sm:$0xff]  }
 0x29a   : > { %3005 = vmatpush1.bf16.msra.mxu1 %v8354_v58  ;;  %v8405_v58 = vld [vmem:[%s11218_s3 + $0x380] ss:$8 sps:$4 sm:$0xff]  }
 0x29b   : > { %3006 = vmatprep.subr.bf16.mxu1 %v8359_v59  ;;  %v8413_v59 = vld [vmem:[%s11218_s3 + $0x3a4] ss:$8 sps:$4 sm:$0xff]  }
 0x29d   : > { %2741 = vmatmul.mubr.bf16.gmra.mrb[16].mxu1 %v9579_v53 }
 0x29e   : > { %2750 = vmatprep.mubr.bf16.mxu1 %v9612_v47  ;;  %3007 = vmatpush1.bf16.msra.mxu1 %v8357_v63  ;;  %v8411_v63 = vld [vmem:[%s11218_s3 + $0x3a0] ss:$8 sps:$4 sm:$0xff]  }
 0x29f   : > { %3008 = vmatprep.subr.bf16.mxu1 %v8362_v1  ;;  %v8419_v1 = vld [vmem:[%s11218_s3 + $0x3c4] ss:$8 sps:$4 sm:$0xff]  }
 0x2a2   : > { %3009 = vmatpush1.bf16.msra.mxu1 %v8360_v6  ;;  %v8417_v6 = vld [vmem:[%s11218_s3 + $0x3c0] ss:$8 sps:$4 sm:$0xff]  }
 0x2a3   : > { %3010 = vmatprep.subr.bf16.mxu1 %v8365_v7  ;;  %v8425_v7 = vld [vmem:[%s11218_s3 + $0x3e4] ss:$8 sps:$4 sm:$0xff]  }
 0x2a5   : > { %2751 = vmatmul.mubr.bf16.gmra.mrb[20].mxu1 %v9609_v40 }
 0x2a6   : > { %2760 = vmatprep.mubr.bf16.mxu1 %v9630_v36  ;;  %3011 = vmatpush1.bf16.msra.mxu1 %v8363_v10  ;;  %v8423_v10 = vld [vmem:[%s11218_s3 + $0x3e0] ss:$8 sps:$4 sm:$0xff]  }
 0x2a7   : > { %3012 = vmatprep.subr.bf16.mxu1 %v8368_v11  ;;  %v8443_v11 = vld [vmem:[%s11220_s5 + $0x144] ss:$8 sps:$4 sm:$0xff]  }
 0x2aa   : > { %3013 = vmatpush1.bf16.msra.mxu1 %v8366_v13  ;;  %v8441_v13 = vld [vmem:[%s11220_s5 + $0x140] ss:$8 sps:$4 sm:$0xff]  }
 0x2ab   : > { %3014 = vmatprep.subr.bf16.mxu1 %v8371_v14  ;;  %v8449_v14 = vld [vmem:[%s11220_s5 + $0x164] ss:$8 sps:$4 sm:$0xff]  }
 0x2ad   : > { %2761 = vmatmul.mubr.bf16.gmra.mrb[24].mxu1 %v9627_v31 }
 0x2ae   : > { %2770 = vmatprep.mubr.bf16.mxu1 %v9648_v33  ;;  %3015 = vmatpush1.bf16.msra.mxu1 %v8369_v15  ;;  %v8447_v15 = vld [vmem:[%s11220_s5 + $0x160] ss:$8 sps:$4 sm:$0xff]  }
 0x2af   : > { %3016 = vmatprep.subr.bf16.mxu1 %v8374_v17  ;;  %v8455_v17 = vld [vmem:[%s11220_s5 + $0x184] ss:$8 sps:$4 sm:$0xff]  }
 0x2b2   : > { %3017 = vmatpush1.bf16.msra.mxu1 %v8372_v18  ;;  %v8453_v18 = vld [vmem:[%s11220_s5 + $0x180] ss:$8 sps:$4 sm:$0xff]  }
 0x2b3   : > { %3018 = vmatprep.subr.bf16.mxu1 %v8377_v26  ;;  %v8461_v26 = vld [vmem:[%s11220_s5 + $0x1a4] ss:$8 sps:$4 sm:$0xff]  }
 0x2b5   : > { %2771 = vmatmul.mubr.bf16.gmra.mrb[28].mxu1 %v9645_v28 }
 0x2b6   : > { %3019 = vmatpush1.bf16.msra.mxu1 %v8375_v30  ;;  %3022 = vmatprep.mubr.bf16.mxu1 %v9459_v27  ;;  %v8384_v27 = vld [vmem:[%s11218_s3 + $0x310] ss:$8 sps:$4 sm:$0xff]   ;;  %v8459_v30 = vld [vmem:[%s11220_s5 + $0x1a0] ss:$8 sps:$4 sm:$0xff]  }
 0x2b7   : > { %3020 = vmatprep.subr.bf16.mxu1 %v8380_v34  ;;  %v8467_v34 = vld [vmem:[%s11220_s5 + $0x1c4] ss:$8 sps:$4 sm:$0xff]  }
 0x2ba   : > { %3021 = vmatpush1.bf16.msra.mxu1 %v8378_v37  ;;  %v8465_v37 = vld [vmem:[%s11220_s5 + $0x1c0] ss:$8 sps:$4 sm:$0xff]  }
 0x2bb   : > { %3344 = vmatprep.subr.bf16.mxu1 %v8383_v38  ;;  %v8473_v38 = vld [vmem:[%s11220_s5 + $0x1e4] ss:$8 sps:$4 sm:$0xff]  }
 0x2bd   : > { %3023 = vmatmul.mubr.bf16.vlgmr.msra.gmra.mrb[0].mxu1 %v9453_v23  ;;  %v8392_v23 = vld [vmem:[%s11218_s3 + $0x334] ss:$8 sps:$4 sm:$0xff]  }
 0x2be   : > { %3032 = vmatprep.mubr.bf16.mxu1 %v9501_v12  ;;  %3345 = vmatpush1.bf16.msra.mxu1 %v8381_v39  ;;  %v8390_v12 = vld [vmem:[%s11218_s3 + $0x330] ss:$8 sps:$4 sm:$0xff]   ;;  %v8476_v39 = vld [vmem:[%s11220_s5 + $0x1f4] ss:$8 sps:$4 sm:$0xff]  }
 0x2bf   : > { %3346 = vmatprep.subr.bf16.mxu1 %v8386_v41  ;;  %v8474_v41 = vld [vmem:[%s11220_s5 + $0x1f0] ss:$8 sps:$4 sm:$0xff]  }
 0x2c2   : > { %3347 = vmatpush1.bf16.msra.mxu1 %v8384_v27  ;;  %v8479_v27 = vld [vmem:[%s11220_s5 + $0x4] ss:$8 sps:$4 sm:$0xff]  }
 0x2c3   : > { %3348 = vmatprep.subr.bf16.mxu1 %v8389_v43  ;;  %v3489_v43 = vld [vmem:[%s11219_s4] sm:$0x3] }
 0x2c5   : > { %3033 = vmatmul.mubr.bf16.gmra.mrb[4].mxu1 %v9495_v8  ;;  %v8398_v8 = vld [vmem:[%s11218_s3 + $0x354] ss:$8 sps:$4 sm:$0xff]  }
 0x2c6   : > { %3042 = vmatprep.mubr.bf16.mxu1 %v9543_v0  ;;  %3349 = vmatpush1.bf16.msra.mxu1 %v8387_v48  ;;  %v8396_v0 = vld [vmem:[%s11218_s3 + $0x350] ss:$8 sps:$4 sm:$0xff]   ;;  %v10019_v48 = vrot.slane %v3489_v43, %v9420_v42 }
 0x2c7   : > { %3350 = vmatprep.subr.bf16.mxu1 %v8392_v23  ;;  %v10022_v23 = vrot.slane %v3489_v43, %v9425_v44 }
 0x2ca   : > { %3351 = vmatpush1.bf16.msra.mxu1 %v8390_v12 }
 0x2cb   : > { %3352 = vmatprep.subr.bf16.mxu1 %v8395_v50 }
 0x2cd   : > { %3043 = vmatmul.mubr.bf16.gmra.mrb[8].mxu1 %v9537_v60  ;;  %v8404_v60 = vld [vmem:[%s11218_s3 + $0x374] ss:$8 sps:$4 sm:$0xff]  }
 0x2ce   : > { %3052 = vmatprep.mubr.bf16.mxu1 %v9585_v57  ;;  %3353 = vmatpush1.bf16.msra.mxu1 %v8393_v51  ;;  %v8402_v57 = vld [vmem:[%s11218_s3 + $0x370] ss:$8 sps:$4 sm:$0xff]  }
 0x2cf   : > { %3354 = vmatprep.subr.bf16.mxu1 %v8398_v8 }
 0x2d2   : > { %3355 = vmatpush1.bf16.msra.mxu1 %v8396_v0 }
 0x2d3   : > { %3356 = vmatprep.subr.bf16.mxu1 %v8401_v54 }
 0x2d5   : > { %3053 = vmatmul.mubr.bf16.gmra.mrb[12].mxu1 %v9579_v53  ;;  %v8410_v53 = vld [vmem:[%s11218_s3 + $0x394] ss:$8 sps:$4 sm:$0xff]  }
 0x2d6   : > { %3062 = vmatprep.mubr.bf16.mxu1 %v9612_v47  ;;  %3357 = vmatpush1.bf16.msra.mxu1 %v8399_v55  ;;  %v8408_v47 = vld [vmem:[%s11218_s3 + $0x390] ss:$8 sps:$4 sm:$0xff]  }
 0x2d7   : > { %3358 = vmatprep.subr.bf16.mxu1 %v8404_v60 }
 0x2da   : > { %3359 = vmatpush1.bf16.msra.mxu1 %v8402_v57 }
 0x2db   : > { %3360 = vmatprep.subr.bf16.mxu1 %v8407_v56 }
 0x2dd   : > { %3063 = vmatmul.mubr.bf16.gmra.mrb[16].mxu1 %v9609_v40  ;;  %v8416_v40 = vld [vmem:[%s11218_s3 + $0x3b4] ss:$8 sps:$4 sm:$0xff]  }
 0x2de   : > { %3072 = vmatprep.mubr.bf16.mxu1 %v9630_v36  ;;  %3361 = vmatpush1.bf16.msra.mxu1 %v8405_v58  ;;  %v8414_v36 = vld [vmem:[%s11218_s3 + $0x3b0] ss:$8 sps:$4 sm:$0xff]  }
 0x2df   : > { %3362 = vmatprep.subr.bf16.mxu1 %v8410_v53 }
 0x2e2   : > { %3363 = vmatpush1.bf16.msra.mxu1 %v8408_v47 }
 0x2e3   : > { %3364 = vmatprep.subr.bf16.mxu1 %v8413_v59 }
 0x2e5   : > { %3073 = vmatmul.mubr.bf16.gmra.mrb[20].mxu1 %v9627_v31  ;;  %v8422_v31 = vld [vmem:[%s11218_s3 + $0x3d4] ss:$8 sps:$4 sm:$0xff]  }
 0x2e6   : > { %3082 = vmatprep.mubr.bf16.mxu1 %v9648_v33  ;;  %3365 = vmatpush1.bf16.msra.mxu1 %v8411_v63  ;;  %v8420_v33 = vld [vmem:[%s11218_s3 + $0x3d0] ss:$8 sps:$4 sm:$0xff]  }
 0x2e7   : > { %3366 = vmatprep.subr.bf16.mxu1 %v8416_v40 }
 0x2ea   : > { %3367 = vmatpush1.bf16.msra.mxu1 %v8414_v36 }
 0x2eb   : > { %3368 = vmatprep.subr.bf16.mxu1 %v8419_v1 }
 0x2ed   : > { %3083 = vmatmul.mubr.bf16.gmra.mrb[24].mxu1 %v9645_v28  ;;  %v8428_v28 = vld [vmem:[%s11218_s3 + $0x3f4] ss:$8 sps:$4 sm:$0xff]  }
 0x2ee   : > { %3092 = vmatprep.mubr.bf16.mxu1 %v2105_v29  ;;  %3369 = vmatpush1.bf16.msra.mxu1 %v8417_v6  ;;  %v8429_v29 = vld [vmem:[%s11220_s5 + $0x100] ss:$8 sps:$4 sm:$0xff]  }
 0x2ef   : > { %3370 = vmatprep.subr.bf16.mxu1 %v8422_v31 }
 0x2f2   : > { %3371 = vmatpush1.bf16.msra.mxu1 %v8420_v33 }
 0x2f3   : > { %3372 = vmatprep.subr.bf16.mxu1 %v8425_v7  ;;  %v8477_v7 = vld [vmem:[%s11220_s5] ss:$8 sps:$4 sm:$0xff]  }
 0x2f5   : > { %3093 = vmatmul.mubr.bf16.gmra.mrb[28].mxu1 %v2104_v46  ;;  %v8435_v46 = vld [vmem:[%s11220_s5 + $0x120] ss:$8 sps:$4 sm:$0xff]  }
 0x2f6   : > { %3373 = vmatpush1.bf16.msra.mxu1 %v8423_v10  ;;  %3376 = vmatprep.mubr.bf16.mxu1 %v9476_v52  ;;  %v8432_v52 = vld [vmem:[%s11220_s5 + $0x110] ss:$8 sps:$4 sm:$0xff]  }
 0x2f7   : > { %3374 = vmatprep.subr.bf16.mxu1 %v8428_v28 }
 0x2fa   : > { %3375 = vmatpush1.bf16.msra.mxu1 %v8426_v45  ;;  %v8482_v45 = vld [vmem:[%s11220_s5 + $0x14] ss:$8 sps:$4 sm:$0xff]  }
 0x2fb   : > { %3934 = vmatprep.subr.bf16.mxu1 %v8431_v24 }
 0x2fd   : > { %3377 = vmatmul.mubr.bf16.vlgmr.msra.gmra.mrb[0].mxu1 %v9473_v49  ;;  %v8440_v49 = vld [vmem:[%s11220_s5 + $0x134] ss:$8 sps:$4 sm:$0xff]  }
 0x2fe   : > { %3386 = vmatprep.mubr.bf16.mxu1 %v9518_v35  ;;  %3935 = vmatpush1.bf16.msra.mxu1 %v8429_v29  ;;  %v8438_v35 = vld [vmem:[%s11220_s5 + $0x130] ss:$8 sps:$4 sm:$0xff]  }
 0x2ff   : > { %3936 = vmatprep.subr.bf16.mxu1 %v8434_v20 }
 0x302   : > { %3937 = vmatpush1.bf16.msra.mxu1 %v8432_v52 }
 0x303   : > { %3938 = vmatprep.subr.bf16.mxu1 %v8437_v22 }
 0x305   : > { %3387 = vmatmul.mubr.bf16.gmra.mrb[4].mxu1 %v9515_v32  ;;  %v8446_v32 = vld [vmem:[%s11220_s5 + $0x154] ss:$8 sps:$4 sm:$0xff]  }
 0x306   : > { %3396 = vmatprep.mubr.bf16.mxu1 %v9560_v25  ;;  %3939 = vmatpush1.bf16.msra.mxu1 %v8435_v46  ;;  %v8444_v25 = vld [vmem:[%s11220_s5 + $0x150] ss:$8 sps:$4 sm:$0xff]  }
 0x307   : > { %3940 = vmatprep.subr.bf16.mxu1 %v8440_v49  ;;  %v8480_v49 = vld [vmem:[%s11220_s5 + $0x10] ss:$8 sps:$4 sm:$0xff]  }
 0x30a   : > { %3941 = vmatpush1.bf16.msra.mxu1 %v8438_v35 }
 0x30b   : > { %3942 = vmatprep.subr.bf16.mxu1 %v8443_v11 }
 0x30d   : > { %3397 = vmatmul.mubr.bf16.gmra.mrb[8].mxu1 %v9557_v21  ;;  %v8452_v21 = vld [vmem:[%s11220_s5 + $0x174] ss:$8 sps:$4 sm:$0xff]  }
 0x30e   : > { %3406 = vmatprep.mubr.bf16.mxu1 %v9602_v19  ;;  %3943 = vmatpush1.bf16.msra.mxu1 %v8441_v13  ;;  %v8450_v19 = vld [vmem:[%s11220_s5 + $0x170] ss:$8 sps:$4 sm:$0xff]   ;;  %v8485_v13 = vld [vmem:[%s11220_s5 + $0x24] ss:$8 sps:$4 sm:$0xff]  }
 0x30f   : > { %3944 = vmatprep.subr.bf16.mxu1 %v8446_v32 }
 0x312   : > { %3945 = vmatpush1.bf16.msra.mxu1 %v8444_v25 }
 0x313   : > { %3946 = vmatprep.subr.bf16.mxu1 %v8449_v14 }
 0x315   : > { %3407 = vmatmul.mubr.bf16.gmra.mrb[12].mxu1 %v9599_v16  ;;  %v8458_v16 = vld [vmem:[%s11220_s5 + $0x194] ss:$8 sps:$4 sm:$0xff]  }
 0x316   : > { %3416 = vmatprep.mubr.bf16.mxu1 %v9620_v9  ;;  %3947 = vmatpush1.bf16.msra.mxu1 %v8447_v15  ;;  %v8456_v9 = vld [vmem:[%s11220_s5 + $0x190] ss:$8 sps:$4 sm:$0xff]  }
 0x317   : > { %3948 = vmatprep.subr.bf16.mxu1 %v8452_v21 }
 0x31a   : > { %3949 = vmatpush1.bf16.msra.mxu1 %v8450_v19 }
 0x31b   : > { %3950 = vmatprep.subr.bf16.mxu1 %v8455_v17 }
 0x31d   : > { %3417 = vmatmul.mubr.bf16.gmra.mrb[16].mxu1 %v9617_v5  ;;  %v8464_v5 = vld [vmem:[%s11220_s5 + $0x1b4] ss:$8 sps:$4 sm:$0xff]  }
 0x31e   : > { %3426 = vmatprep.mubr.bf16.mxu1 %v9638_v3  ;;  %3951 = vmatpush1.bf16.msra.mxu1 %v8453_v18  ;;  %v8462_v3 = vld [vmem:[%s11220_s5 + $0x1b0] ss:$8 sps:$4 sm:$0xff]   ;;  %v8483_v18 = vld [vmem:[%s11220_s5 + $0x20] ss:$8 sps:$4 sm:$0xff]  }
 0x31f   : > { %3952 = vmatprep.subr.bf16.mxu1 %v8458_v16 }
 0x322   : > { %3953 = vmatpush1.bf16.msra.mxu1 %v8456_v9 }
 0x323   : > { %3954 = vmatprep.subr.bf16.mxu1 %v8461_v26 }
 0x325   : > { %3427 = vmatmul.mubr.bf16.gmra.mrb[20].mxu1 %v9635_v62  ;;  %v8470_v62 = vld [vmem:[%s11220_s5 + $0x1d4] ss:$8 sps:$4 sm:$0xff]  }
 0x326   : > { %3436 = vmatprep.mubr.bf16.mxu1 %v9656_v4  ;;  %3955 = vmatpush1.bf16.msra.mxu1 %v8459_v30  ;;  %v8468_v4 = vld [vmem:[%s11220_s5 + $0x1d0] ss:$8 sps:$4 sm:$0xff]   ;;  %v8488_v30 = vld [vmem:[%s11220_s5 + $0x34] ss:$8 sps:$4 sm:$0xff]  }
 0x327   : > { %3956 = vmatprep.subr.bf16.mxu1 %v8464_v5 }
 0x32a   : > { %3957 = vmatpush1.bf16.msra.mxu1 %v8462_v3 }
 0x32b   : > { %3958 = vmatprep.subr.bf16.mxu1 %v8467_v34 }
 0x32d   : > { %3437 = vmatmul.mubr.bf16.gmra.mrb[24].mxu1 %v9653_v61  ;;  %v8471_v61 = vld [vmem:[%s11220_s5 + $0x1e0] ss:$8 sps:$4 sm:$0xff]  }
 0x32e   : > { %3446 = vmatprep.mubr.bf16.mxu1 %v8933_v2  ;;  %3959 = vmatpush1.bf16.msra.mxu1 %v8465_v37 }
 0x32f   : > { %3960 = vmatprep.subr.bf16.mxu1 %v8470_v62 }
 0x332   : > { %3961 = vmatpush1.bf16.msra.mxu1 %v8468_v4 }
 0x333   : > { %3962 = vmatprep.subr.bf16.mxu1 %v8473_v38  ;;  %v8486_v38 = vld [vmem:[%s11220_s5 + $0x30] ss:$8 sps:$4 sm:$0xff]  }
 0x335   : > { %3447 = vmatmul.mubr.bf16.gmra.mrb[28].mxu1 %v8933_v2 }
 0x336   : > { %3963 = vmatpush1.bf16.msra.mxu1 %v8471_v61 }
 0x337   : > { %3964 = vmatprep.subr.bf16.mxu1 %v8476_v39 }
 0x33a   : > { %3965 = vmatpush1.bf16.msra.mxu1 %v8474_v41 }
 0x33b   : > { %4167 = vmatprep.subr.bf16.mxu1 %v8479_v27  ;;  %v8491_v27 = vld [vmem:[%s11220_s5 + $0x44] ss:$8 sps:$4 sm:$0xff]  }
 0x3d0   : > { %v3378_v12 = vpop.f32.mrb[0].mxu1 }
 0x3d1   : > { %v3501_v50 = vadd.f32 %v10019_v48, %v3378_v12  ;;  %v3380_v51 = vpop.f32.mrb[1].mxu1 }
 0x3d2   : > { %v3502_v8 = vadd.f32 %v10022_v23, %v3380_v51  ;;  %v3382_v0 = vpop.f32.mrb[2].mxu1 }
 0x3d3   : > { %vm3533_vm1 = vcmp.ge.f32.partialorder %v3501_v50, 0.0  ;;  %v3565_v54 = vmul.f32 0.01, %v3501_v50  ;;  %v3503_v55 = vadd.f32 %v10019_v48, %v3382_v0  ;;  %v3384_v60 = vpop.f32.mrb[3].mxu1 }
 0x3d4   : > { %vm3534_vm2 = vcmp.ge.f32.partialorder %v3502_v8, 0.0  ;;  %v3566_v57 = vmul.f32 0.01, %v3502_v8  ;;  %v3504_v56 = vadd.f32 %v10022_v23, %v3384_v60 }
 0x3d5   : > { %v3597_v58 = vsel %vm3533_vm1, %v3501_v50, %v3565_v54  ;;  %vm3535_vm3 = vcmp.ge.f32.partialorder %v3503_v55, 0.0  ;;  %v3567_v53 = vmul.f32 0.01, %v3503_v55 }
 0x3d6   : > { %3629 = vst [vmem:[%s10030_s21] sm:$0xff] %v3597_v58  ;;  %vm3536_vm4 = vcmp.ge.f32.partialorder %v3504_v56, 0.0  ;;  %v3568_v47 = vmul.f32 0.01, %v3504_v56  ;;  %v3598_v59 = vsel %vm3534_vm2, %v3502_v8, %v3566_v57 }
 0x3d7   : > { %v3599_v63 = vsel %vm3535_vm3, %v3503_v55, %v3567_v53  ;;  %3630 = vst [vmem:[%s10030_s21 + $0x8] sm:$0xff] %v3598_v59  ;;  %v8489_v55 = vld [vmem:[%s11220_s5 + $0x40] ss:$8 sps:$4 sm:$0xff]  }
 0x3d8   : > { %3631 = vst [vmem:[%s10030_s21 + $0x10] sm:$0xff] %v3599_v63  ;;  %v3661_v40 = vpack.c.bf16 %v3599_v63, %v3597_v58  ;;  %v3388_v36 = vpop.f32.mrb[4].mxu1  ;;  %v3600_v1 = vsel %vm3536_vm4, %v3504_v56, %v3568_v47  ;;  %v8494_v56 = vld [vmem:[%s11220_s5 + $0x54] ss:$8 sps:$4 sm:$0xff]  }
 0x3d9   : > { %v3505_v6 = vadd.f32 %v10019_v48, %v3388_v36  ;;  %v3390_v31 = vpop.f32.mrb[5].mxu1  ;;  %3632 = vst [vmem:[%s10030_s21 + $0x18] sm:$0xff] %v3600_v1  ;;  %v3662_v33 = vpack.c.bf16 %v3600_v1, %v3598_v59  ;;  %v8492_v36 = vld [vmem:[%s11220_s5 + $0x50] ss:$8 sps:$4 sm:$0xff]  }
 0x3da   : > { %v3506_v10 = vadd.f32 %v10022_v23, %v3390_v31  ;;  %v3392_v28 = vpop.f32.mrb[6].mxu1  ;;  %v8497_v31 = vld [vmem:[%s11220_s5 + $0x64] ss:$8 sps:$4 sm:$0xff]  }
 0x3db   : > { %vm3537_vm5 = vcmp.ge.f32.partialorder %v3505_v6, 0.0  ;;  %v3569_v24 = vmul.f32 0.01, %v3505_v6  ;;  %v3507_v29 = vadd.f32 %v10019_v48, %v3392_v28  ;;  %v3394_v20 = vpop.f32.mrb[7].mxu1  ;;  %3966 = vmatprep.mubr.bf16.mxu1 %v3662_v33 }
 0x3dc   : > { %vm3538_vm6 = vcmp.ge.f32.partialorder %v3506_v10, 0.0  ;;  %v3570_v52 = vmul.f32 0.01, %v3506_v10  ;;  %v3508_v22 = vadd.f32 %v10022_v23, %v3394_v20  ;;  %3967 = vmatmul.mubr.bf16.vlgmr.msra.gmra.mrb[32].mxu1 %v3661_v40  ;;  %v8495_v20 = vld [vmem:[%s11220_s5 + $0x60] ss:$8 sps:$4 sm:$0xff]  }
 0x3dd   : > { %vm3539_vm7 = vcmp.ge.f32.partialorder %v3507_v29, 0.0  ;;  %v3571_v46 = vmul.f32 0.01, %v3507_v29  ;;  %4168 = vmatpush1.bf16.msra.mxu1 %v8477_v7  ;;  %v3601_v35 = vsel %vm3537_vm5, %v3505_v6, %v3569_v24 }
 0x3de   : > { %vm3540_vm8 = vcmp.ge.f32.partialorder %v3508_v22, 0.0  ;;  %v3572_v11 = vmul.f32 0.01, %v3508_v22  ;;  %4169 = vmatprep.subr.bf16.mxu1 %v8482_v45  ;;  %v3602_v32 = vsel %vm3538_vm6, %v3506_v10, %v3570_v52  ;;  %3633 = vst [vmem:[%s10030_s21 + $0x20] sm:$0xff] %v3601_v35 }
 0x3df   : > { %3634 = vst [vmem:[%s10030_s21 + $0x28] sm:$0xff] %v3602_v32  ;;  %v3603_v25 = vsel %vm3539_vm7, %v3507_v29, %v3571_v46 }
 0x3e0   : > { %v3398_v14 = vpop.f32.mrb[8].mxu1  ;;  %v3604_v15 = vsel %vm3540_vm8, %v3508_v22, %v3572_v11  ;;  %3635 = vst [vmem:[%s10030_s21 + $0x30] sm:$0xff] %v3603_v25  ;;  %v10057_v21 = vpack.c.bf16 %v3603_v25, %v3601_v35 }
 0x3e1   : > { %v3509_v19 = vadd.f32 %v10019_v48, %v3398_v14  ;;  %4170 = vmatpush1.bf16.msra.mxu1 %v8480_v49  ;;  %v3400_v17 = vpop.f32.mrb[9].mxu1  ;;  %3636 = vst [vmem:[%s10030_s21 + $0x38] sm:$0xff] %v3604_v15  ;;  %v10064_v16 = vpack.c.bf16 %v3604_v15, %v3602_v32  ;;  %v8500_v49 = vld [vmem:[%s11220_s5 + $0x74] ss:$8 sps:$4 sm:$0xff]   ;;  %v8498_v15 = vld [vmem:[%s11220_s5 + $0x70] ss:$8 sps:$4 sm:$0xff]  }
 0x3e2   : > { %v3510_v9 = vadd.f32 %v10022_v23, %v3400_v17  ;;  %v3402_v26 = vpop.f32.mrb[10].mxu1  ;;  %4171 = vmatprep.subr.bf16.mxu1 %v8485_v13 }
 0x3e3   : > { %vm3541_vm9 = vcmp.ge.f32.partialorder %v3509_v19, 0.0  ;;  %v3573_v5 = vmul.f32 0.01, %v3509_v19  ;;  %v3511_v3 = vadd.f32 %v10019_v48, %v3402_v26  ;;  %v3404_v34 = vpop.f32.mrb[11].mxu1 }
 0x3e4   : > { %vm3542_vm10 = vcmp.ge.f32.partialorder %v3510_v9, 0.0  ;;  %v3574_v37 = vmul.f32 0.01, %v3510_v9  ;;  %v3512_v62 = vadd.f32 %v10022_v23, %v3404_v34 }
 0x3e5   : > { %vm3543_vm11 = vcmp.ge.f32.partialorder %v3511_v3, 0.0  ;;  %v3575_v4 = vmul.f32 0.01, %v3511_v3  ;;  %4172 = vmatpush1.bf16.msra.mxu1 %v8483_v18  ;;  %v3605_v61 = vsel %vm3541_vm9, %v3509_v19, %v3573_v5 }
 0x3e6   : > { %vm3544_vm12 = vcmp.ge.f32.partialorder %v3512_v62, 0.0  ;;  %v3576_v39 = vmul.f32 0.01, %v3512_v62  ;;  %4173 = vmatprep.subr.bf16.mxu1 %v8488_v30  ;;  %v3606_v41 = vsel %vm3542_vm10, %v3510_v9, %v3574_v37  ;;  %3637 = vst [vmem:[%s10030_s21 + $0x40] sm:$0xff] %v3605_v61  ;;  %v8503_v9 = vld [vmem:[%s11220_s5 + $0x84] ss:$8 sps:$4 sm:$0xff]  }
 0x3e7   : > { %3638 = vst [vmem:[%s10030_s21 + $0x48] sm:$0xff] %v3606_v41  ;;  %v3607_v43 = vsel %vm3543_vm11, %v3511_v3, %v3575_v4  ;;  %v8501_v4 = vld [vmem:[%s11220_s5 + $0x80] ss:$8 sps:$4 sm:$0xff]  }
 0x3e8   : > { %v3408_v12 = vpop.f32.mrb[12].mxu1  ;;  %v3608_v50 = vsel %vm3544_vm12, %v3512_v62, %v3576_v39  ;;  %3639 = vst [vmem:[%s10030_s21 + $0x50] sm:$0xff] %v3607_v43  ;;  %v10081_v51 = vpack.c.bf16 %v3607_v43, %v3605_v61  ;;  %v8506_v39 = vld [vmem:[%s11220_s5 + $0x94] ss:$8 sps:$4 sm:$0xff]  }
 0x3e9   : > { %v3513_v8 = vadd.f32 %v10019_v48, %v3408_v12  ;;  %4174 = vmatpush1.bf16.msra.mxu1 %v8486_v38  ;;  %v3410_v0 = vpop.f32.mrb[13].mxu1  ;;  %3640 = vst [vmem:[%s10030_s21 + $0x58] sm:$0xff] %v3608_v50  ;;  %v10085_v54 = vpack.c.bf16 %v3608_v50, %v3606_v41 }
 0x3ea   : > { %v3514_v60 = vadd.f32 %v10022_v23, %v3410_v0  ;;  %v3412_v57 = vpop.f32.mrb[14].mxu1  ;;  %4175 = vmatprep.subr.bf16.mxu1 %v8491_v27  ;;  %v8504_v0 = vld [vmem:[%s11220_s5 + $0x90] ss:$8 sps:$4 sm:$0xff]  }
 0x3eb   : > { %vm3545_vm13 = vcmp.ge.f32.partialorder %v3513_v8, 0.0  ;;  %v3577_v58 = vmul.f32 0.01, %v3513_v8  ;;  %v3515_v53 = vadd.f32 %v10019_v48, %v3412_v57  ;;  %v3414_v47 = vpop.f32.mrb[15].mxu1  ;;  %3976 = vmatprep.mubr.bf16.mxu1 %v10085_v54  ;;  %v8509_v57 = vld [vmem:[%s11220_s5 + $0xa4] ss:$8 sps:$4 sm:$0xff]  }
 0x3ec   : > { %vm3546_vm14 = vcmp.ge.f32.partialorder %v3514_v60, 0.0  ;;  %v3578_v59 = vmul.f32 0.01, %v3514_v60  ;;  %v3516_v63 = vadd.f32 %v10022_v23, %v3414_v47  ;;  %3977 = vmatmul.mubr.bf16.gmra.mrb[36].mxu1 %v10081_v51 }
 0x3ed   : > { %vm3547_vm15 = vcmp.ge.f32.partialorder %v3515_v53, 0.0  ;;  %v3579_v40 = vmul.f32 0.01, %v3515_v53  ;;  %4176 = vmatpush1.bf16.msra.mxu1 %v8489_v55  ;;  %v3609_v1 = vsel %vm3545_vm13, %v3513_v8, %v3577_v58 }
 0x3ee   : > { %vm3548_vm0 = vcmp.ge.f32.partialorder %v3516_v63, 0.0  ;;  %v3580_v6 = vmul.f32 0.01, %v3516_v63  ;;  %4177 = vmatprep.subr.bf16.mxu1 %v8494_v56  ;;  %v3610_v33 = vsel %vm3546_vm14, %v3514_v60, %v3578_v59  ;;  %3641 = vst [vmem:[%s10030_s21 + $0x60] sm:$0xff] %v3609_v1 }
 0x3ef   : > { %3642 = vst [vmem:[%s10030_s21 + $0x68] sm:$0xff] %v3610_v33  ;;  %v3611_v7 = vsel %vm3547_vm15, %v3515_v53, %v3579_v40 }
 0x3f0   : > { %v3418_v10 = vpop.f32.mrb[16].mxu1  ;;  %v3612_v28 = vsel %vm3548_vm0, %v3516_v63, %v3580_v6  ;;  %3643 = vst [vmem:[%s10030_s21 + $0x70] sm:$0xff] %v3611_v7  ;;  %v10107_v45 = vpack.c.bf16 %v3611_v7, %v3609_v1 }
 0x3f1   : > { %v3517_v24 = vadd.f32 %v10019_v48, %v3418_v10  ;;  %4178 = vmatpush1.bf16.msra.mxu1 %v8492_v36  ;;  %v3420_v29 = vpop.f32.mrb[17].mxu1  ;;  %3644 = vst [vmem:[%s10030_s21 + $0x78] sm:$0xff] %v3612_v28  ;;  %v10114_v52 = vpack.c.bf16 %v3612_v28, %v3610_v33  ;;  %v8507_v36 = vld [vmem:[%s11220_s5 + $0xa0] ss:$8 sps:$4 sm:$0xff]   ;;  %v8512_v33 = vld [vmem:[%s11220_s5 + $0xb4] ss:$8 sps:$4 sm:$0xff]  }
 0x3f2   : > { %v3518_v22 = vadd.f32 %v10022_v23, %v3420_v29  ;;  %v3422_v46 = vpop.f32.mrb[18].mxu1  ;;  %4179 = vmatprep.subr.bf16.mxu1 %v8497_v31 }
 0x3f3   : > { %vm3549_vm1 = vcmp.ge.f32.partialorder %v3517_v24, 0.0  ;;  %v3581_v35 = vmul.f32 0.01, %v3517_v24  ;;  %v3519_v11 = vadd.f32 %v10019_v48, %v3422_v46  ;;  %v3424_v13 = vpop.f32.mrb[19].mxu1 }
 0x3f4   : > { %vm3550_vm2 = vcmp.ge.f32.partialorder %v3518_v22, 0.0  ;;  %v3582_v32 = vmul.f32 0.01, %v3518_v22  ;;  %v3520_v25 = vadd.f32 %v10022_v23, %v3424_v13 }
 0x3f5   : > { %vm3551_vm3 = vcmp.ge.f32.partialorder %v3519_v11, 0.0  ;;  %v3583_v14 = vmul.f32 0.01, %v3519_v11  ;;  %4180 = vmatpush1.bf16.msra.mxu1 %v8495_v20  ;;  %v3613_v19 = vsel %vm3549_vm1, %v3517_v24, %v3581_v35 }
 0x3f6   : > { %vm3552_vm4 = vcmp.ge.f32.partialorder %v3520_v25, 0.0  ;;  %v3584_v17 = vmul.f32 0.01, %v3520_v25  ;;  %4181 = vmatprep.subr.bf16.mxu1 %v8500_v49  ;;  %v3614_v18 = vsel %vm3550_vm2, %v3518_v22, %v3582_v32  ;;  %3645 = vst [vmem:[%s10030_s21 + $0x80] sm:$0xff] %v3613_v19  ;;  %v8510_v22 = vld [vmem:[%s11220_s5 + $0xb0] ss:$8 sps:$4 sm:$0xff]  }
 0x3f7   : > { %3646 = vst [vmem:[%s10030_s21 + $0x88] sm:$0xff] %v3614_v18  ;;  %v3615_v26 = vsel %vm3551_vm3, %v3519_v11, %v3583_v14  ;;  %v8515_v11 = vld [vmem:[%s11220_s5 + $0xc4] ss:$8 sps:$4 sm:$0xff]  }
 0x3f8   : > { %v3428_v30 = vpop.f32.mrb[20].mxu1  ;;  %v3616_v5 = vsel %vm3552_vm4, %v3520_v25, %v3584_v17  ;;  %3647 = vst [vmem:[%s10030_s21 + $0x90] sm:$0xff] %v3615_v26  ;;  %v10131_v3 = vpack.c.bf16 %v3615_v26, %v3613_v19 }
 0x3f9   : > { %v3521_v34 = vadd.f32 %v10019_v48, %v3428_v30  ;;  %4182 = vmatpush1.bf16.msra.mxu1 %v8498_v15  ;;  %v3430_v37 = vpop.f32.mrb[21].mxu1  ;;  %3648 = vst [vmem:[%s10030_s21 + $0x98] sm:$0xff] %v3616_v5  ;;  %v10135_v62 = vpack.c.bf16 %v3616_v5, %v3614_v18  ;;  %v8513_v18 = vld [vmem:[%s11220_s5 + $0xc0] ss:$8 sps:$4 sm:$0xff]   ;;  %v8518_v30 = vld [vmem:[%s11220_s5 + $0xd4] ss:$8 sps:$4 sm:$0xff]  }
 0x3fa   : > { %v3522_v38 = vadd.f32 %v10022_v23, %v3430_v37  ;;  %v3432_v61 = vpop.f32.mrb[22].mxu1  ;;  %4183 = vmatprep.subr.bf16.mxu1 %v8503_v9 }
 0x3fb   : > { %vm3553_vm5 = vcmp.ge.f32.partialorder %v3521_v34, 0.0  ;;  %v3585_v41 = vmul.f32 0.01, %v3521_v34  ;;  %v3523_v27 = vadd.f32 %v10019_v48, %v3432_v61  ;;  %v3434_v43 = vpop.f32.mrb[23].mxu1  ;;  %3986 = vmatprep.mubr.bf16.mxu1 %v10135_v62 }
 0x3fc   : > { %vm3554_vm6 = vcmp.ge.f32.partialorder %v3522_v38, 0.0  ;;  %v3586_v12 = vmul.f32 0.01, %v3522_v38  ;;  %v3524_v50 = vadd.f32 %v10022_v23, %v3434_v43  ;;  %3987 = vmatmul.mubr.bf16.gmra.mrb[40].mxu1 %v10131_v3 }
 0x3fd   : > { %vm3555_vm7 = vcmp.ge.f32.partialorder %v3523_v27, 0.0  ;;  %v3587_v8 = vmul.f32 0.01, %v3523_v27  ;;  %4184 = vmatpush1.bf16.msra.mxu1 %v8501_v4  ;;  %v3617_v55 = vsel %vm3553_vm5, %v3521_v34, %v3585_v41 }
 0x3fe   : > { %vm3556_vm8 = vcmp.ge.f32.partialorder %v3524_v50, 0.0  ;;  %v3588_v60 = vmul.f32 0.01, %v3524_v50  ;;  %4185 = vmatprep.subr.bf16.mxu1 %v8506_v39  ;;  %v3618_v56 = vsel %vm3554_vm6, %v3522_v38, %v3586_v12  ;;  %3649 = vst [vmem:[%s10030_s21 + $0xa0] sm:$0xff] %v3617_v55  ;;  %v8516_v39 = vld [vmem:[%s11220_s5 + $0xd0] ss:$8 sps:$4 sm:$0xff]  }
 0x3ff   : > { %3650 = vst [vmem:[%s10030_s21 + $0xa8] sm:$0xff] %v3618_v56  ;;  %v3619_v58 = vsel %vm3555_vm7, %v3523_v27, %v3587_v8  ;;  %v8519_v8 = vld [vmem:[%s11220_s5 + $0xe0] ss:$8 sps:$4 sm:$0xff]  }
 0x400   : > { %v3438_v53 = vpop.f32.mrb[24].mxu1  ;;  %v3620_v47 = vsel %vm3556_vm8, %v3524_v50, %v3588_v60  ;;  %3651 = vst [vmem:[%s10030_s21 + $0xb0] sm:$0xff] %v3619_v58  ;;  %v10157_v59 = vpack.c.bf16 %v3619_v58, %v3617_v55  ;;  %v8524_v55 = vld [vmem:[%s11220_s5 + $0xf4] ss:$8 sps:$4 sm:$0xff]   ;;  %v8522_v60 = vld [vmem:[%s11220_s5 + $0xf0] ss:$8 sps:$4 sm:$0xff]  }
 0x401   : > { %v3525_v63 = vadd.f32 %v10019_v48, %v3438_v53  ;;  %4186 = vmatpush1.bf16.msra.mxu1 %v8504_v0  ;;  %v3440_v40 = vpop.f32.mrb[25].mxu1  ;;  %3652 = vst [vmem:[%s10030_s21 + $0xb8] sm:$0xff] %v3620_v47  ;;  %v10164_v1 = vpack.c.bf16 %v3620_v47, %v3618_v56  ;;  %v8525_v56 = vld [vmem:[%s11220_s5 + $0x200] ss:$8 sps:$4 sm:$0xff]   ;;  %v8530_v58 = vld [vmem:[%s11220_s5 + $0x214] ss:$8 sps:$4 sm:$0xff]  }
 0x402   : > { %v3526_v6 = vadd.f32 %v10022_v23, %v3440_v40  ;;  %v3442_v31 = vpop.f32.mrb[26].mxu1  ;;  %4187 = vmatprep.subr.bf16.mxu1 %v8509_v57  ;;  %v8527_v57 = vld [vmem:[%s11220_s5 + $0x204] ss:$8 sps:$4 sm:$0xff]   ;;  %v8528_v53 = vld [vmem:[%s11220_s5 + $0x210] ss:$8 sps:$4 sm:$0xff]  }
 0x403   : > { %vm3557_vm9 = vcmp.ge.f32.partialorder %v3525_v63, 0.0  ;;  %v3589_v7 = vmul.f32 0.01, %v3525_v63  ;;  %v3527_v10 = vadd.f32 %v10019_v48, %v3442_v31  ;;  %v3444_v28 = vpop.f32.mrb[27].mxu1  ;;  %v8533_v47 = vld [vmem:[%s11220_s5 + $0x224] ss:$8 sps:$4 sm:$0xff]  }
 0x404   : > { %vm3558_vm10 = vcmp.ge.f32.partialorder %v3526_v6, 0.0  ;;  %v3590_v24 = vmul.f32 0.01, %v3526_v6  ;;  %v3528_v29 = vadd.f32 %v10022_v23, %v3444_v28  ;;  %v8536_v40 = vld [vmem:[%s11220_s5 + $0x234] ss:$8 sps:$4 sm:$0xff]  }
 0x405   : > { %vm3559_vm11 = vcmp.ge.f32.partialorder %v3527_v10, 0.0  ;;  %v3591_v20 = vmul.f32 0.01, %v3527_v10  ;;  %4188 = vmatpush1.bf16.msra.mxu1 %v8507_v36  ;;  %v3621_v46 = vsel %vm3557_vm9, %v3525_v63, %v3589_v7  ;;  %v8531_v63 = vld [vmem:[%s11220_s5 + $0x220] ss:$8 sps:$4 sm:$0xff]  }
 0x406   : > { %vm3560_vm12 = vcmp.ge.f32.partialorder %v3528_v29, 0.0  ;;  %v3592_v49 = vmul.f32 0.01, %v3528_v29  ;;  %4189 = vmatprep.subr.bf16.mxu1 %v8512_v33  ;;  %v3622_v35 = vsel %vm3558_vm10, %v3526_v6, %v3590_v24  ;;  %3653 = vst [vmem:[%s10030_s21 + $0xc0] sm:$0xff] %v3621_v46  ;;  %v8534_v36 = vld [vmem:[%s11220_s5 + $0x230] ss:$8 sps:$4 sm:$0xff]  }
 0x407   : > { %3654 = vst [vmem:[%s10030_s21 + $0xc8] sm:$0xff] %v3622_v35  ;;  %v3623_v13 = vsel %vm3559_vm11, %v3527_v10, %v3591_v20  ;;  %v8539_v6 = vld [vmem:[%s11220_s5 + $0x244] ss:$8 sps:$4 sm:$0xff]   ;;  %v8537_v31 = vld [vmem:[%s11220_s5 + $0x240] ss:$8 sps:$4 sm:$0xff]  }
 0x408   : > { %v3448_v32 = vpop.f32.mrb[28].mxu1  ;;  %v3624_v25 = vsel %vm3560_vm12, %v3528_v29, %v3592_v49  ;;  %3655 = vst [vmem:[%s10030_s21 + $0xd0] sm:$0xff] %v3623_v13  ;;  %v10181_v14 = vpack.c.bf16 %v3623_v13, %v3621_v46  ;;  %v8542_v33 = vld [vmem:[%s11220_s5 + $0x254] ss:$8 sps:$4 sm:$0xff]   ;;  %v8540_v7 = vld [vmem:[%s11220_s5 + $0x250] ss:$8 sps:$4 sm:$0xff]  }
 0x409   : > { %v3529_v15 = vadd.f32 %v10019_v48, %v3448_v32  ;;  %4190 = vmatpush1.bf16.msra.mxu1 %v8510_v22  ;;  %v3450_v19 = vpop.f32.mrb[29].mxu1  ;;  %3656 = vst [vmem:[%s10030_s21 + $0xd8] sm:$0xff] %v3624_v25  ;;  %v10185_v17 = vpack.c.bf16 %v3624_v25, %v3622_v35  ;;  %v8545_v10 = vld [vmem:[%s11220_s5 + $0x264] ss:$8 sps:$4 sm:$0xff]   ;;  %v8543_v28 = vld [vmem:[%s11220_s5 + $0x260] ss:$8 sps:$4 sm:$0xff]  }
 0x40a   : > { %v3530_v9 = vadd.f32 %v10022_v23, %v3450_v19  ;;  %v3452_v26 = vpop.f32.mrb[30].mxu1  ;;  %4191 = vmatprep.subr.bf16.mxu1 %v8515_v11  ;;  %v8548_v24 = vld [vmem:[%s11220_s5 + $0x274] ss:$8 sps:$4 sm:$0xff]   ;;  %v8621_v29 = vld [vmem:[%s11222_s7 + $0x100] ss:$8 sps:$4 sm:$0xff]  }
 0x40b   : > { %vm3561_vm13 = vcmp.ge.f32.partialorder %v3529_v15, 0.0  ;;  %v3593_v5 = vmul.f32 0.01, %v3529_v15  ;;  %v3531_v34 = vadd.f32 %v10019_v48, %v3452_v26  ;;  %v3454_v37 = vpop.f32.mrb[31].mxu1  ;;  %3996 = vmatprep.mubr.bf16.mxu1 %v10185_v17  ;;  %v8623_v20 = vld [vmem:[%s11222_s7 + $0x104] ss:$8 sps:$4 sm:$0xff]  }
 0x40c   : > { %vm3562_vm14 = vcmp.ge.f32.partialorder %v3530_v9, 0.0  ;;  %v3594_v4 = vmul.f32 0.01, %v3530_v9  ;;  %v3532_v38 = vadd.f32 %v10022_v23, %v3454_v37  ;;  %3997 = vmatmul.mubr.bf16.gmra.mrb[44].mxu1 %v10181_v14  ;;  %v8521_v23 = vld [vmem:[%s11220_s5 + $0xe4] ss:$8 sps:$4 sm:$0xff]   ;;  %5161 = vmatprep.subr.bf16.mxu0 %v8623_v20 }
 0x40d   : > { %vm3563_vm15 = vcmp.ge.f32.partialorder %v3531_v34, 0.0  ;;  %v3595_v61 = vmul.f32 0.01, %v3531_v34  ;;  %4192 = vmatpush1.bf16.msra.mxu1 %v8513_v18  ;;  %4199 = vmatprep.mubr.bf16.mxu1 %v8933_v2  ;;  %v10202_v48 = vsel %vm3561_vm13, %v3529_v15, %v3593_v5  ;;  %v8546_v22 = vld [vmem:[%s11220_s5 + $0x270] ss:$8 sps:$4 sm:$0xff]  }
 0x40e   : > { %vm3564_vm0 = vcmp.ge.f32.partialorder %v3532_v38, 0.0  ;;  %v3596_v41 = vmul.f32 0.01, %v3532_v38  ;;  %4193 = vmatprep.subr.bf16.mxu1 %v8518_v30  ;;  %v10207_v27 = vsel %vm3562_vm14, %v3530_v9, %v3594_v4  ;;  %3657 = vst [vmem:[%s10030_s21 + $0xe0] sm:$0xff] %v10202_v48  ;;  %v8626_v46 = vld [vmem:[%s11222_s7 + $0x114] ss:$8 sps:$4 sm:$0xff]   ;;  %5162 = vmatpush1.bf16.msra.mxu0 %v8621_v29 }
 0x40f   : > { %3658 = vst [vmem:[%s10030_s21 + $0xe8] sm:$0xff] %v10207_v27  ;;  %v10213_v43 = vsel %vm3563_vm15, %v3531_v34, %v3595_v61  ;;  %v8551_v49 = vld [vmem:[%s11220_s5 + $0x284] ss:$8 sps:$4 sm:$0xff]   ;;  %v8624_v35 = vld [vmem:[%s11222_s7 + $0x110] ss:$8 sps:$4 sm:$0xff]   ;;  %5163 = vmatprep.subr.bf16.mxu0 %v8626_v46 }
 0x410   : > { %v10215_v12 = vsel %vm3564_vm0, %v3532_v38, %v3596_v41  ;;  %3659 = vst [vmem:[%s10030_s21 + $0xf0] sm:$0xff] %v10213_v43  ;;  %v3675_v50 = vpack.c.bf16 %v10213_v43, %v10202_v48  ;;  %v8549_v11 = vld [vmem:[%s11220_s5 + $0x280] ss:$8 sps:$4 sm:$0xff]   ;;  %v8554_v13 = vld [vmem:[%s11220_s5 + $0x294] ss:$8 sps:$4 sm:$0xff]  }
 0x411   : > { %4194 = vmatpush1.bf16.msra.mxu1 %v8516_v39  ;;  %3660 = vst [vmem:[%s10030_s21 + $0xf8] sm:$0xff] %v10215_v12  ;;  %v3676_v0 = vpack.c.bf16 %v10215_v12, %v10207_v27  ;;  %v8627_v32 = vld [vmem:[%s11222_s7 + $0x120] ss:$8 sps:$4 sm:$0xff]   ;;  %v8632_v25 = vld [vmem:[%s11222_s7 + $0x134] ss:$8 sps:$4 sm:$0xff]  }
 0x412   : > { %4195 = vmatprep.subr.bf16.mxu1 %v8521_v23  ;;  %5164 = vmatpush1.bf16.msra.mxu0 %v8624_v35  ;;  %v8552_v15 = vld [vmem:[%s11220_s5 + $0x290] ss:$8 sps:$4 sm:$0xff]   ;;  %v8557_v19 = vld [vmem:[%s11220_s5 + $0x2a4] ss:$8 sps:$4 sm:$0xff]   ;;  %v8555_v26 = vld [vmem:[%s11220_s5 + $0x2a0] ss:$8 sps:$4 sm:$0xff]  }
 0x413   : > { %v8630_v18 = vld [vmem:[%s11222_s7 + $0x130] ss:$8 sps:$4 sm:$0xff]   ;;  %v8635_v9 = vld [vmem:[%s11222_s7 + $0x144] ss:$8 sps:$4 sm:$0xff]   ;;  %v8560_v30 = vld [vmem:[%s11220_s5 + $0x2b4] ss:$8 sps:$4 sm:$0xff]  }
 0x414   : > { %v8633_v5 = vld [vmem:[%s11222_s7 + $0x140] ss:$8 sps:$4 sm:$0xff]   ;;  %v8638_v34 = vld [vmem:[%s11222_s7 + $0x154] ss:$8 sps:$4 sm:$0xff]   ;;  %v8558_v37 = vld [vmem:[%s11220_s5 + $0x2b0] ss:$8 sps:$4 sm:$0xff]  }
 0x415   : > { %4196 = vmatpush1.bf16.msra.mxu1 %v8519_v8  ;;  %v8563_v4 = vld [vmem:[%s11220_s5 + $0x2c4] ss:$8 sps:$4 sm:$0xff]   ;;  %v8636_v38 = vld [vmem:[%s11222_s7 + $0x150] ss:$8 sps:$4 sm:$0xff]   ;;  %v8561_v39 = vld [vmem:[%s11220_s5 + $0x2c0] ss:$8 sps:$4 sm:$0xff]  }
 0x416   : > { %4197 = vmatprep.subr.bf16.mxu1 %v8524_v55  ;;  %v8641_v61 = vld [vmem:[%s11222_s7 + $0x164] ss:$8 sps:$4 sm:$0xff]   ;;  %v8566_v41 = vld [vmem:[%s11220_s5 + $0x2d4] ss:$8 sps:$4 sm:$0xff]   ;;  %v8639_v23 = vld [vmem:[%s11222_s7 + $0x160] ss:$8 sps:$4 sm:$0xff]  }
 0x417   : > { %v8644_v8 = vld [vmem:[%s11222_s7 + $0x174] ss:$8 sps:$4 sm:$0xff]   ;;  %v8564_v55 = vld [vmem:[%s11220_s5 + $0x2d0] ss:$8 sps:$4 sm:$0xff]   ;;  %v8581_v29 = vld [vmem:[%s11220_s5 + $0x324] ss:$8 sps:$4 sm:$0xff]  }
 0x418   : > { %v8579_v20 = vld [vmem:[%s11220_s5 + $0x320] ss:$8 sps:$4 sm:$0xff]   ;;  %v8582_v35 = vld [vmem:[%s11220_s5 + $0x330] ss:$8 sps:$4 sm:$0xff]   ;;  %v8596_v27 = vld [vmem:[%s11220_s5 + $0x374] ss:$8 sps:$4 sm:$0xff]  }
 0x419   : > { %4198 = vmatpush1.bf16.msra.mxu1 %v8522_v60  ;;  %v8569_v60 = vld [vmem:[%s11220_s5 + $0x2e4] ss:$8 sps:$4 sm:$0xff]   ;;  %v8657_v46 = vld [vmem:[%s11222_s7 + $0x1c0] ss:$8 sps:$4 sm:$0xff]   ;;  %v8594_v12 = vld [vmem:[%s11220_s5 + $0x370] ss:$8 sps:$4 sm:$0xff]  }
 0x41a   : > { %4441 = vmatprep.subr.bf16.mxu1 %v8527_v57  ;;  %v8642_v57 = vld [vmem:[%s11222_s7 + $0x170] ss:$8 sps:$4 sm:$0xff]   ;;  %v8602_v48 = vld [vmem:[%s11220_s5 + $0x394] ss:$8 sps:$4 sm:$0xff]   ;;  %v8605_v43 = vld [vmem:[%s11220_s5 + $0x3a4] ss:$8 sps:$4 sm:$0xff]  }
 0x41c   : > { %4200 = vmatmul.mubr.bf16.vlgmr.msra.gmra.mrb[32].mxu1 %v8933_v2 }
 0x41d   : > { %4209 = vmatprep.mubr.bf16.mxu1 %v10064_v16  ;;  %4442 = vmatpush1.bf16.msra.mxu1 %v8525_v56  ;;  %v8647_v56 = vld [vmem:[%s11222_s7 + $0x184] ss:$8 sps:$4 sm:$0xff]  }
 0x41e   : > { %4443 = vmatprep.subr.bf16.mxu1 %v8530_v58  ;;  %v8567_v58 = vld [vmem:[%s11220_s5 + $0x2e0] ss:$8 sps:$4 sm:$0xff]  }
 0x421   : > { %4444 = vmatpush1.bf16.msra.mxu1 %v8528_v53  ;;  %v8572_v53 = vld [vmem:[%s11220_s5 + $0x2f4] ss:$8 sps:$4 sm:$0xff]  }
 0x422   : > { %4445 = vmatprep.subr.bf16.mxu1 %v8533_v47  ;;  %v8645_v47 = vld [vmem:[%s11222_s7 + $0x180] ss:$8 sps:$4 sm:$0xff]  }
 0x424   : > { %4210 = vmatmul.mubr.bf16.gmra.mrb[36].mxu1 %v10057_v21 }
 0x425   : > { %4219 = vmatprep.mubr.bf16.mxu1 %v10114_v52  ;;  %4446 = vmatpush1.bf16.msra.mxu1 %v8531_v63  ;;  %v8650_v63 = vld [vmem:[%s11222_s7 + $0x194] ss:$8 sps:$4 sm:$0xff]  }
 0x426   : > { %4447 = vmatprep.subr.bf16.mxu1 %v8536_v40  ;;  %v8570_v40 = vld [vmem:[%s11220_s5 + $0x2f0] ss:$8 sps:$4 sm:$0xff]  }
 0x429   : > { %4448 = vmatpush1.bf16.msra.mxu1 %v8534_v36  ;;  %v8575_v36 = vld [vmem:[%s11220_s5 + $0x304] ss:$8 sps:$4 sm:$0xff]  }
 0x42a   : > { %4449 = vmatprep.subr.bf16.mxu1 %v8539_v6  ;;  %v8648_v6 = vld [vmem:[%s11222_s7 + $0x190] ss:$8 sps:$4 sm:$0xff]  }
 0x42c   : > { %4220 = vmatmul.mubr.bf16.gmra.mrb[40].mxu1 %v10107_v45 }
 0x42d   : > { %4229 = vmatprep.mubr.bf16.mxu1 %v10164_v1  ;;  %4450 = vmatpush1.bf16.msra.mxu1 %v8537_v31  ;;  %v8653_v31 = vld [vmem:[%s11222_s7 + $0x1a4] ss:$8 sps:$4 sm:$0xff]  }
 0x42e   : > { %4451 = vmatprep.subr.bf16.mxu1 %v8542_v33  ;;  %v8573_v33 = vld [vmem:[%s11220_s5 + $0x300] ss:$8 sps:$4 sm:$0xff]  }
 0x431   : > { %4452 = vmatpush1.bf16.msra.mxu1 %v8540_v7  ;;  %v8578_v7 = vld [vmem:[%s11220_s5 + $0x314] ss:$8 sps:$4 sm:$0xff]  }
 0x432   : > { %4453 = vmatprep.subr.bf16.mxu1 %v8545_v10  ;;  %v8651_v10 = vld [vmem:[%s11222_s7 + $0x1a0] ss:$8 sps:$4 sm:$0xff]  }
 0x434   : > { %4230 = vmatmul.mubr.bf16.gmra.mrb[44].mxu1 %v10157_v59 }
 0x435   : > { %4454 = vmatpush1.bf16.msra.mxu1 %v8543_v28  ;;  %4473 = vmatprep.mubr.bf16.mxu1 %v10064_v16  ;;  %v8629_v16 = vld [vmem:[%s11222_s7 + $0x124] ss:$8 sps:$4 sm:$0xff]   ;;  %v8656_v28 = vld [vmem:[%s11222_s7 + $0x1b4] ss:$8 sps:$4 sm:$0xff]  }
 0x436   : > { %4455 = vmatprep.subr.bf16.mxu1 %v8548_v24  ;;  %5165 = vmatprep.subr.bf16.mxu0 %v8629_v16  ;;  %v8576_v24 = vld [vmem:[%s11220_s5 + $0x310] ss:$8 sps:$4 sm:$0xff]   ;;  %v8587_v16 = vld [vmem:[%s11220_s5 + $0x344] ss:$8 sps:$4 sm:$0xff]  }
 0x437   : > { %5166 = vmatpush1.bf16.msra.mxu0 %v8627_v32  ;;  %v8663_v32 = vld [vmem:[%s11222_s7 + $0x1e0] ss:$8 sps:$4 sm:$0xff]  }
 0x438   : > { %5167 = vmatprep.subr.bf16.mxu0 %v8632_v25  ;;  %v8588_v25 = vld [vmem:[%s11220_s5 + $0x350] ss:$8 sps:$4 sm:$0xff]  }
 0x439   : > { %4456 = vmatpush1.bf16.msra.mxu1 %v8546_v22  ;;  %v8584_v22 = vld [vmem:[%s11220_s5 + $0x334] ss:$8 sps:$4 sm:$0xff]  }
 0x43a   : > { %4457 = vmatprep.subr.bf16.mxu1 %v8551_v49  ;;  %v8662_v49 = vld [vmem:[%s11222_s7 + $0x1d4] ss:$8 sps:$4 sm:$0xff]  }
 0x43b   : > { %5168 = vmatpush1.bf16.msra.mxu0 %v8630_v18  ;;  %v8608_v18 = vld [vmem:[%s11220_s5 + $0x3b4] ss:$8 sps:$4 sm:$0xff]  }
 0x43c   : > { %5169 = vmatprep.subr.bf16.mxu0 %v8635_v9  ;;  %v8606_v9 = vld [vmem:[%s11220_s5 + $0x3b0] ss:$8 sps:$4 sm:$0xff]  }
 0x43d   : > { %4458 = vmatpush1.bf16.msra.mxu1 %v8549_v11  ;;  %v8585_v11 = vld [vmem:[%s11220_s5 + $0x340] ss:$8 sps:$4 sm:$0xff]  }
 0x43e   : > { %4459 = vmatprep.subr.bf16.mxu1 %v8554_v13  ;;  %v8590_v13 = vld [vmem:[%s11220_s5 + $0x354] ss:$8 sps:$4 sm:$0xff]  }
 0x43f   : > { %5170 = vmatpush1.bf16.msra.mxu0 %v8633_v5  ;;  %v8614_v5 = vld [vmem:[%s11220_s5 + $0x3d4] ss:$8 sps:$4 sm:$0xff]  }
 0x440   : > { %5171 = vmatprep.subr.bf16.mxu0 %v8638_v34  ;;  %v8612_v34 = vld [vmem:[%s11220_s5 + $0x3d0] ss:$8 sps:$4 sm:$0xff]  }
 0x441   : > { %4460 = vmatpush1.bf16.msra.mxu1 %v8552_v15  ;;  %v8593_v15 = vld [vmem:[%s11220_s5 + $0x364] ss:$8 sps:$4 sm:$0xff]  }
 0x442   : > { %4461 = vmatprep.subr.bf16.mxu1 %v8557_v19  ;;  %v8597_v19 = vld [vmem:[%s11220_s5 + $0x380] ss:$8 sps:$4 sm:$0xff]  }
 0x443   : > { %5172 = vmatpush1.bf16.msra.mxu0 %v8636_v38  ;;  %v8620_v38 = vld [vmem:[%s11220_s5 + $0x3f4] ss:$8 sps:$4 sm:$0xff]  }
 0x444   : > { %5173 = vmatprep.subr.bf16.mxu0 %v8641_v61  ;;  %v8618_v61 = vld [vmem:[%s11220_s5 + $0x3f0] ss:$8 sps:$4 sm:$0xff]  }
 0x445   : > { %4462 = vmatpush1.bf16.msra.mxu1 %v8555_v26  ;;  %v8611_v26 = vld [vmem:[%s11220_s5 + $0x3c4] ss:$8 sps:$4 sm:$0xff]  }
 0x446   : > { %4463 = vmatprep.subr.bf16.mxu1 %v8560_v30  ;;  %v8609_v30 = vld [vmem:[%s11220_s5 + $0x3c0] ss:$8 sps:$4 sm:$0xff]  }
 0x447   : > { %5174 = vmatpush1.bf16.msra.mxu0 %v8639_v23 }
 0x448   : > { %5175 = vmatprep.subr.bf16.mxu0 %v8644_v8 }
 0x449   : > { %4464 = vmatpush1.bf16.msra.mxu1 %v8558_v37  ;;  %v8617_v37 = vld [vmem:[%s11220_s5 + $0x3e4] ss:$8 sps:$4 sm:$0xff]  }
 0x44a   : > { %4465 = vmatprep.subr.bf16.mxu1 %v8563_v4  ;;  %v8615_v4 = vld [vmem:[%s11220_s5 + $0x3e0] ss:$8 sps:$4 sm:$0xff]  }
 0x44b   : > { %5176 = vmatpush1.bf16.msra.mxu0 %v8642_v57 }
 0x44c   : > { %5177 = vmatprep.subr.bf16.mxu0 %v8647_v56 }
 0x44d   : > { %4466 = vmatpush1.bf16.msra.mxu1 %v8561_v39  ;;  %v8668_v39 = vld [vmem:[%s11222_s7 + $0x1f4] ss:$8 sps:$4 sm:$0xff]  }
 0x44e   : > { %4467 = vmatprep.subr.bf16.mxu1 %v8566_v41 }
 0x44f   : > { %5178 = vmatpush1.bf16.msra.mxu0 %v8645_v47 }
 0x450   : > { %5179 = vmatprep.subr.bf16.mxu0 %v8650_v63 }
 0x451   : > { %4468 = vmatpush1.bf16.msra.mxu1 %v8564_v55 }
 0x452   : > { %4469 = vmatprep.subr.bf16.mxu1 %v8569_v60 }
 0x453   : > { %5180 = vmatpush1.bf16.msra.mxu0 %v8648_v6 }
 0x454   : > { %5181 = vmatprep.subr.bf16.mxu0 %v8653_v31 }
 0x455   : > { %4470 = vmatpush1.bf16.msra.mxu1 %v8567_v58 }
 0x456   : > { %4471 = vmatprep.subr.bf16.mxu1 %v8572_v53 }
 0x457   : > { %5182 = vmatpush1.bf16.msra.mxu0 %v8651_v10 }
 0x458   : > { %5183 = vmatprep.subr.bf16.mxu0 %v8656_v28 }
 0x459   : > { %4472 = vmatpush1.bf16.msra.mxu1 %v8570_v40 }
 0x45a   : > { %4731 = vmatprep.subr.bf16.mxu1 %v8575_v36 }
 0x45c   : > { %4474 = vmatmul.mubr.bf16.vlgmr.msra.gmra.mrb[32].mxu1 %v10057_v21  ;;  %v8654_v21 = vld [vmem:[%s11222_s7 + $0x1b0] ss:$8 sps:$4 sm:$0xff]  }
 0x45d   : > { %4483 = vmatprep.mubr.bf16.mxu1 %v10114_v52  ;;  %4732 = vmatpush1.bf16.msra.mxu1 %v8573_v33  ;;  %v8659_v52 = vld [vmem:[%s11222_s7 + $0x1c4] ss:$8 sps:$4 sm:$0xff]  }
 0x45e   : > { %4733 = vmatprep.subr.bf16.mxu1 %v8578_v7  ;;  %5184 = vmatpush1.bf16.msra.mxu0 %v8654_v21  ;;  %v8669_v21 = vld [vmem:[%s11222_s7] ss:$8 sps:$4 sm:$0xff]  }
 0x45f   : > { %5185 = vmatprep.subr.bf16.mxu0 %v8659_v52 }
 0x461   : > { %4734 = vmatpush1.bf16.msra.mxu1 %v8576_v24 }
 0x462   : > { %4735 = vmatprep.subr.bf16.mxu1 %v8581_v29  ;;  %5186 = vmatpush1.bf16.msra.mxu0 %v8657_v46 }
 0x463   : > { %5187 = vmatprep.subr.bf16.mxu0 %v8662_v49 }
 0x464   : > { %4484 = vmatmul.mubr.bf16.gmra.mrb[36].mxu1 %v10107_v45  ;;  %v8660_v45 = vld [vmem:[%s11222_s7 + $0x1d0] ss:$8 sps:$4 sm:$0xff]  }
 0x465   : > { %4493 = vmatprep.mubr.bf16.mxu1 %v10164_v1  ;;  %4736 = vmatpush1.bf16.msra.mxu1 %v8579_v20  ;;  %v8665_v1 = vld [vmem:[%s11222_s7 + $0x1e4] ss:$8 sps:$4 sm:$0xff]  }
 0x466   : > { %4737 = vmatprep.subr.bf16.mxu1 %v8584_v22  ;;  %5188 = vmatpush1.bf16.msra.mxu0 %v8660_v45  ;;  %v8674_v22 = vld [vmem:[%s11222_s7 + $0x14] ss:$8 sps:$4 sm:$0xff]  }
 0x467   : > { %5189 = vmatprep.subr.bf16.mxu0 %v8665_v1 }
 0x469   : > { %4738 = vmatpush1.bf16.msra.mxu1 %v8582_v35 }
 0x46a   : > { %4739 = vmatprep.subr.bf16.mxu1 %v8587_v16  ;;  %5190 = vmatpush1.bf16.msra.mxu0 %v8663_v32 }
 0x46b   : > { %5191 = vmatprep.subr.bf16.mxu0 %v8668_v39 }
 0x46c   : > { %4494 = vmatmul.mubr.bf16.gmra.mrb[40].mxu1 %v10157_v59  ;;  %v8591_v59 = vld [vmem:[%s11220_s5 + $0x360] ss:$8 sps:$4 sm:$0xff]  }
 0x46d   : > { %4503 = vmatprep.mubr.bf16.mxu1 %v3676_v0  ;;  %4740 = vmatpush1.bf16.msra.mxu1 %v8585_v11  ;;  %v8599_v0 = vld [vmem:[%s11220_s5 + $0x384] ss:$8 sps:$4 sm:$0xff]   ;;  %v8672_v11 = vld [vmem:[%s11222_s7 + $0x10] ss:$8 sps:$4 sm:$0xff]  }
 0x46e   : > { %4741 = vmatprep.subr.bf16.mxu1 %v8590_v13 }
 0x471   : > { %4742 = vmatpush1.bf16.msra.mxu1 %v8588_v25  ;;  %v8677_v25 = vld [vmem:[%s11222_s7 + $0x24] ss:$8 sps:$4 sm:$0xff]  }
 0x472   : > { %4743 = vmatprep.subr.bf16.mxu1 %v8593_v15 }
 0x474   : > { %4504 = vmatmul.mubr.bf16.gmra.mrb[44].mxu1 %v3675_v50  ;;  %v8603_v50 = vld [vmem:[%s11220_s5 + $0x3a0] ss:$8 sps:$4 sm:$0xff]  }
 0x475   : > { %4744 = vmatpush1.bf16.msra.mxu1 %v8591_v59  ;;  %4763 = vmatprep.mubr.bf16.mxu1 %v10085_v54  ;;  %v8600_v54 = vld [vmem:[%s11220_s5 + $0x390] ss:$8 sps:$4 sm:$0xff]  }
 0x476   : > { %4745 = vmatprep.subr.bf16.mxu1 %v8596_v27 }
 0x479   : > { %4746 = vmatpush1.bf16.msra.mxu1 %v8594_v12 }
 0x47a   : > { %4747 = vmatprep.subr.bf16.mxu1 %v8599_v0 }
 0x47d   : > { %4748 = vmatpush1.bf16.msra.mxu1 %v8597_v19 }
 0x47e   : > { %4749 = vmatprep.subr.bf16.mxu1 %v8602_v48 }
 0x481   : > { %4750 = vmatpush1.bf16.msra.mxu1 %v8600_v54  ;;  %v8675_v54 = vld [vmem:[%s11222_s7 + $0x20] ss:$8 sps:$4 sm:$0xff]  }
 0x482   : > { %4751 = vmatprep.subr.bf16.mxu1 %v8605_v43 }
 0x485   : > { %4752 = vmatpush1.bf16.msra.mxu1 %v8603_v50 }
 0x486   : > { %4753 = vmatprep.subr.bf16.mxu1 %v8608_v18 }
 0x489   : > { %4754 = vmatpush1.bf16.msra.mxu1 %v8606_v9  ;;  %v8680_v9 = vld [vmem:[%s11222_s7 + $0x34] ss:$8 sps:$4 sm:$0xff]  }
 0x48a   : > { %4755 = vmatprep.subr.bf16.mxu1 %v8611_v26 }
 0x48d   : > { %4756 = vmatpush1.bf16.msra.mxu1 %v8609_v30 }
 0x48e   : > { %4757 = vmatprep.subr.bf16.mxu1 %v8614_v5 }
 0x491   : > { %4758 = vmatpush1.bf16.msra.mxu1 %v8612_v34 }
 0x492   : > { %4759 = vmatprep.subr.bf16.mxu1 %v8617_v37 }
 0x495   : > { %4760 = vmatpush1.bf16.msra.mxu1 %v8615_v4 }
 0x496   : > { %4761 = vmatprep.subr.bf16.mxu1 %v8620_v38  ;;  %v8678_v38 = vld [vmem:[%s11222_s7 + $0x30] ss:$8 sps:$4 sm:$0xff]  }
 0x499   : > { %4762 = vmatpush1.bf16.msra.mxu1 %v8618_v61 }
 0x49c   : > { %4764 = vmatmul.mubr.bf16.vlgmr.msra.gmra.mrb[32].mxu1 %v10081_v51  ;;  %v8666_v51 = vld [vmem:[%s11222_s7 + $0x1f0] ss:$8 sps:$4 sm:$0xff]  }
 0x49d   : > { %4773 = vmatprep.mubr.bf16.mxu1 %v10135_v62  ;;  %5192 = vmatpush1.bf16.msra.mxu0 %v8666_v51  ;;  %v4820_v62 = vld [vmem:[%s11221_s6] sm:$0x3] }
 0x4a4   : > { %4774 = vmatmul.mubr.bf16.gmra.mrb[36].mxu1 %v10131_v3  ;;  %v8671_v3 = vld [vmem:[%s11222_s7 + $0x4] ss:$8 sps:$4 sm:$0xff]  }
 0x4a5   : > { %4783 = vmatprep.mubr.bf16.mxu1 %v10185_v17  ;;  %5374 = vmatprep.subr.bf16.mxu0 %v8671_v3  ;;  %v10559_v17 = vrot.slane %v4820_v62, %v9425_v44  ;;  %v8683_v3 = vld [vmem:[%s11222_s7 + $0x44] ss:$8 sps:$4 sm:$0xff]  }
 0x4ac   : > { %4784 = vmatmul.mubr.bf16.gmra.mrb[40].mxu1 %v10181_v14  ;;  %v10556_v14 = vrot.slane %v4820_v62, %v9420_v42 }
 0x4ad   : > { %4793 = vmatprep.mubr.bf16.mxu1 %v8933_v2 }
 0x4b4   : > { %4794 = vmatmul.mubr.bf16.gmra.mrb[44].mxu1 %v8933_v2 }
 0x56f   : > { %v4765_v41 = vpop.f32.mrb[32].mxu1 }
 0x570   : > { %v4832_v23 = vadd.f32 %v10556_v14, %v4765_v41  ;;  %v4767_v8 = vpop.f32.mrb[33].mxu1 }
 0x571   : > { %v4833_v55 = vadd.f32 %v10559_v17, %v4767_v8  ;;  %v4769_v60 = vpop.f32.mrb[34].mxu1 }
 0x572   : > { %vm4848_vm1 = vcmp.ge.f32.partialorder %v4832_v23, 0.0  ;;  %v4864_v57 = vmul.f32 0.01, %v4832_v23  ;;  %v4834_v56 = vadd.f32 %v10556_v14, %v4769_v60  ;;  %v4771_v58 = vpop.f32.mrb[35].mxu1 }
 0x573   : > { %vm4849_vm2 = vcmp.ge.f32.partialorder %v4833_v55, 0.0  ;;  %v4865_v53 = vmul.f32 0.01, %v4833_v55  ;;  %v4835_v47 = vadd.f32 %v10559_v17, %v4771_v58 }
 0x574   : > { %v4880_v63 = vsel %vm4848_vm1, %v4832_v23, %v4864_v57  ;;  %vm4850_vm3 = vcmp.ge.f32.partialorder %v4834_v56, 0.0  ;;  %v4866_v40 = vmul.f32 0.01, %v4834_v56 }
 0x575   : > { %4896 = vst [vmem:[%s10567_s30] sm:$0xff] %v4880_v63  ;;  %vm4851_vm4 = vcmp.ge.f32.partialorder %v4835_v47, 0.0  ;;  %v4867_v36 = vmul.f32 0.01, %v4835_v47  ;;  %v4881_v6 = vsel %vm4849_vm2, %v4833_v55, %v4865_v53 }
 0x576   : > { %v4882_v31 = vsel %vm4850_vm3, %v4834_v56, %v4866_v40  ;;  %4897 = vst [vmem:[%s10567_s30 + $0x8] sm:$0xff] %v4881_v6  ;;  %v8681_v56 = vld [vmem:[%s11222_s7 + $0x40] ss:$8 sps:$4 sm:$0xff]  }
 0x577   : > { %4898 = vst [vmem:[%s10567_s30 + $0x10] sm:$0xff] %v4882_v31  ;;  %v4912_v33 = vpack.c.bf16 %v4882_v31, %v4880_v63  ;;  %v4775_v7 = vpop.f32.mrb[36].mxu1  ;;  %v4883_v10 = vsel %vm4851_vm4, %v4835_v47, %v4867_v36  ;;  %v8686_v47 = vld [vmem:[%s11222_s7 + $0x54] ss:$8 sps:$4 sm:$0xff]  }
 0x578   : > { %v4836_v28 = vadd.f32 %v10556_v14, %v4775_v7  ;;  %v4777_v24 = vpop.f32.mrb[37].mxu1  ;;  %4899 = vst [vmem:[%s10567_s30 + $0x18] sm:$0xff] %v4883_v10  ;;  %v4913_v29 = vpack.c.bf16 %v4883_v10, %v4881_v6  ;;  %v8684_v7 = vld [vmem:[%s11222_s7 + $0x50] ss:$8 sps:$4 sm:$0xff]  }
 0x579   : > { %v4837_v52 = vadd.f32 %v10559_v17, %v4777_v24  ;;  %v4779_v20 = vpop.f32.mrb[38].mxu1 }
 0x57a   : > { %vm4852_vm5 = vcmp.ge.f32.partialorder %v4836_v28, 0.0  ;;  %v4868_v46 = vmul.f32 0.01, %v4836_v28  ;;  %v4838_v49 = vadd.f32 %v10556_v14, %v4779_v20  ;;  %v4781_v35 = vpop.f32.mrb[39].mxu1  ;;  %5193 = vmatprep.mubr.bf16.mxu0 %v4913_v29 }
 0x57b   : > { %vm4853_vm6 = vcmp.ge.f32.partialorder %v4837_v52, 0.0  ;;  %v4869_v16 = vmul.f32 0.01, %v4837_v52  ;;  %v4839_v45 = vadd.f32 %v10559_v17, %v4781_v35  ;;  %5194 = vmatmul.mubr.bf16.vlgmr.msra.gmra.mrb[64].mxu0 %v4912_v33  ;;  %v8693_v35 = vld [vmem:[%s11222_s7 + $0x80] ss:$8 sps:$4 sm:$0xff]  }
 0x57c   : > { %vm4854_vm7 = vcmp.ge.f32.partialorder %v4838_v49, 0.0  ;;  %v4870_v1 = vmul.f32 0.01, %v4838_v49  ;;  %5375 = vmatpush1.bf16.msra.mxu0 %v8669_v21  ;;  %v4884_v13 = vsel %vm4852_vm5, %v4836_v28, %v4868_v46  ;;  %v8690_v46 = vld [vmem:[%s11222_s7 + $0x70] ss:$8 sps:$4 sm:$0xff]  }
 0x57d   : > { %vm4855_vm8 = vcmp.ge.f32.partialorder %v4839_v45, 0.0  ;;  %v4871_v32 = vmul.f32 0.01, %v4839_v45  ;;  %5376 = vmatprep.subr.bf16.mxu0 %v8674_v22  ;;  %v4885_v15 = vsel %vm4853_vm6, %v4837_v52, %v4869_v16  ;;  %4900 = vst [vmem:[%s10567_s30 + $0x20] sm:$0xff] %v4884_v13  ;;  %v8687_v52 = vld [vmem:[%s11222_s7 + $0x60] ss:$8 sps:$4 sm:$0xff]  }
 0x57e   : > { %4901 = vst [vmem:[%s10567_s30 + $0x28] sm:$0xff] %v4885_v15  ;;  %v4886_v59 = vsel %vm4854_vm7, %v4838_v49, %v4870_v1  ;;  %v8692_v22 = vld [vmem:[%s11222_s7 + $0x74] ss:$8 sps:$4 sm:$0xff]   ;;  %v8695_v49 = vld [vmem:[%s11222_s7 + $0x84] ss:$8 sps:$4 sm:$0xff]  }
 0x57f   : > { %v4785_v27 = vpop.f32.mrb[40].mxu1  ;;  %v4887_v12 = vsel %vm4855_vm8, %v4839_v45, %v4871_v32  ;;  %4902 = vst [vmem:[%s10567_s30 + $0x30] sm:$0xff] %v4886_v59  ;;  %v10594_v0 = vpack.c.bf16 %v4886_v59, %v4884_v13  ;;  %v8698_v16 = vld [vmem:[%s11222_s7 + $0x94] ss:$8 sps:$4 sm:$0xff]   ;;  %v8696_v45 = vld [vmem:[%s11222_s7 + $0x90] ss:$8 sps:$4 sm:$0xff]  }
 0x580   : > { %v4840_v19 = vadd.f32 %v10556_v14, %v4785_v27  ;;  %5377 = vmatpush1.bf16.msra.mxu0 %v8672_v11  ;;  %v4787_v48 = vpop.f32.mrb[41].mxu1  ;;  %4903 = vst [vmem:[%s10567_s30 + $0x38] sm:$0xff] %v4887_v12  ;;  %v10601_v43 = vpack.c.bf16 %v4887_v12, %v4885_v15  ;;  %v8701_v1 = vld [vmem:[%s11222_s7 + $0xa4] ss:$8 sps:$4 sm:$0xff]   ;;  %v8699_v11 = vld [vmem:[%s11222_s7 + $0xa0] ss:$8 sps:$4 sm:$0xff]  }
 0x581   : > { %v4841_v50 = vadd.f32 %v10559_v17, %v4787_v48  ;;  %v4789_v18 = vpop.f32.mrb[42].mxu1  ;;  %5378 = vmatprep.subr.bf16.mxu0 %v8677_v25  ;;  %v8704_v13 = vld [vmem:[%s11222_s7 + $0xb4] ss:$8 sps:$4 sm:$0xff]   ;;  %v8702_v32 = vld [vmem:[%s11222_s7 + $0xb0] ss:$8 sps:$4 sm:$0xff]  }
 0x582   : > { %vm4856_vm9 = vcmp.ge.f32.partialorder %v4840_v19, 0.0  ;;  %v4872_v26 = vmul.f32 0.01, %v4840_v19  ;;  %v4842_v30 = vadd.f32 %v10556_v14, %v4789_v18  ;;  %v4791_v5 = vpop.f32.mrb[43].mxu1  ;;  %v8707_v25 = vld [vmem:[%s11222_s7 + $0xc4] ss:$8 sps:$4 sm:$0xff]  }
 0x583   : > { %vm4857_vm10 = vcmp.ge.f32.partialorder %v4841_v50, 0.0  ;;  %v4873_v34 = vmul.f32 0.01, %v4841_v50  ;;  %v4843_v37 = vadd.f32 %v10559_v17, %v4791_v5  ;;  %v8705_v15 = vld [vmem:[%s11222_s7 + $0xc0] ss:$8 sps:$4 sm:$0xff]  }
 0x584   : > { %vm4858_vm11 = vcmp.ge.f32.partialorder %v4842_v30, 0.0  ;;  %v4874_v4 = vmul.f32 0.01, %v4842_v30  ;;  %5379 = vmatpush1.bf16.msra.mxu0 %v8675_v54  ;;  %v4888_v61 = vsel %vm4856_vm9, %v4840_v19, %v4872_v26  ;;  %v8710_v59 = vld [vmem:[%s11222_s7 + $0xd4] ss:$8 sps:$4 sm:$0xff]  }
 0x585   : > { %vm4859_vm12 = vcmp.ge.f32.partialorder %v4843_v37, 0.0  ;;  %v4875_v39 = vmul.f32 0.01, %v4843_v37  ;;  %5380 = vmatprep.subr.bf16.mxu0 %v8680_v9  ;;  %v4889_v51 = vsel %vm4857_vm10, %v4841_v50, %v4873_v34  ;;  %4904 = vst [vmem:[%s10567_s30 + $0x40] sm:$0xff] %v4888_v61  ;;  %v8708_v27 = vld [vmem:[%s11222_s7 + $0xd0] ss:$8 sps:$4 sm:$0xff]  }
 0x586   : > { %4905 = vst [vmem:[%s10567_s30 + $0x48] sm:$0xff] %v4889_v51  ;;  %v4890_v62 = vsel %vm4858_vm11, %v4842_v30, %v4874_v4  ;;  %v8713_v12 = vld [vmem:[%s11222_s7 + $0xe4] ss:$8 sps:$4 sm:$0xff]   ;;  %v8711_v19 = vld [vmem:[%s11222_s7 + $0xe0] ss:$8 sps:$4 sm:$0xff]  }
 0x587   : > { %v4795_v41 = vpop.f32.mrb[44].mxu1  ;;  %v4891_v23 = vsel %vm4859_vm12, %v4843_v37, %v4875_v39  ;;  %4906 = vst [vmem:[%s10567_s30 + $0x50] sm:$0xff] %v4890_v62  ;;  %v10618_v8 = vpack.c.bf16 %v4890_v62, %v4888_v61  ;;  %v8716_v48 = vld [vmem:[%s11222_s7 + $0xf4] ss:$8 sps:$4 sm:$0xff]   ;;  %v8714_v54 = vld [vmem:[%s11222_s7 + $0xf0] ss:$8 sps:$4 sm:$0xff]  }
 0x588   : > { %v4844_v55 = vadd.f32 %v10556_v14, %v4795_v41  ;;  %5381 = vmatpush1.bf16.msra.mxu0 %v8678_v38  ;;  %v4797_v60 = vpop.f32.mrb[45].mxu1  ;;  %4907 = vst [vmem:[%s10567_s30 + $0x58] sm:$0xff] %v4891_v23  ;;  %v10622_v57 = vpack.c.bf16 %v4891_v23, %v4889_v51  ;;  %v8719_v50 = vld [vmem:[%s11222_s7 + $0x204] ss:$8 sps:$4 sm:$0xff]   ;;  %v8717_v18 = vld [vmem:[%s11222_s7 + $0x200] ss:$8 sps:$4 sm:$0xff]  }
 0x589   : > { %v4845_v58 = vadd.f32 %v10559_v17, %v4797_v60  ;;  %v4799_v53 = vpop.f32.mrb[46].mxu1  ;;  %5382 = vmatprep.subr.bf16.mxu0 %v8683_v3  ;;  %v8722_v9 = vld [vmem:[%s11222_s7 + $0x214] ss:$8 sps:$4 sm:$0xff]   ;;  %v8720_v26 = vld [vmem:[%s11222_s7 + $0x210] ss:$8 sps:$4 sm:$0xff]  }
 0x58a   : > { %vm4860_vm13 = vcmp.ge.f32.partialorder %v4844_v55, 0.0  ;;  %v4876_v63 = vmul.f32 0.01, %v4844_v55  ;;  %v4846_v40 = vadd.f32 %v10556_v14, %v4799_v53  ;;  %v4801_v36 = vpop.f32.mrb[47].mxu1  ;;  %5203 = vmatprep.mubr.bf16.mxu0 %v10622_v57  ;;  %v8725_v30 = vld [vmem:[%s11222_s7 + $0x224] ss:$8 sps:$4 sm:$0xff]  }
 0x58b   : > { %vm4861_vm14 = vcmp.ge.f32.partialorder %v4845_v58, 0.0  ;;  %v4877_v6 = vmul.f32 0.01, %v4845_v58  ;;  %v4847_v31 = vadd.f32 %v10559_v17, %v4801_v36  ;;  %5204 = vmatmul.mubr.bf16.gmra.mrb[68].mxu0 %v10618_v8  ;;  %v8689_v17 = vld [vmem:[%s11222_s7 + $0x64] ss:$8 sps:$4 sm:$0xff]  }
 0x58c   : > { %vm4862_vm15 = vcmp.ge.f32.partialorder %v4846_v40, 0.0  ;;  %v4878_v33 = vmul.f32 0.01, %v4846_v40  ;;  %5383 = vmatpush1.bf16.msra.mxu0 %v8681_v56  ;;  %5406 = vmatprep.mubr.bf16.mxu0 %v8933_v2  ;;  %v10639_v14 = vsel %vm4860_vm13, %v4844_v55, %v4876_v63  ;;  %v8723_v5 = vld [vmem:[%s11222_s7 + $0x220] ss:$8 sps:$4 sm:$0xff]  }
 0x58d   : > { %vm4863_vm0 = vcmp.ge.f32.partialorder %v4847_v31, 0.0  ;;  %v4879_v10 = vmul.f32 0.01, %v4847_v31  ;;  %5384 = vmatprep.subr.bf16.mxu0 %v8686_v47  ;;  %v10644_v28 = vsel %vm4861_vm14, %v4845_v58, %v4877_v6  ;;  %4908 = vst [vmem:[%s10567_s30 + $0x60] sm:$0xff] %v10639_v14  ;;  %v8728_v34 = vld [vmem:[%s11222_s7 + $0x234] ss:$8 sps:$4 sm:$0xff]  }
 0x58e   : > { %4909 = vst [vmem:[%s10567_s30 + $0x68] sm:$0xff] %v10644_v28  ;;  %v10650_v24 = vsel %vm4862_vm15, %v4846_v40, %v4878_v33  ;;  %v8813_v37 = vld [vmem:[%s11224_s9 + $0x100] ss:$8 sps:$4 sm:$0xff]   ;;  %v8815_v4 = vld [vmem:[%s11224_s9 + $0x104] ss:$8 sps:$4 sm:$0xff]  }
 0x58f   : > { %v10652_v29 = vsel %vm4863_vm0, %v4847_v31, %v4879_v10  ;;  %4910 = vst [vmem:[%s10567_s30 + $0x70] sm:$0xff] %v10650_v24  ;;  %v4918_v21 = vpack.c.bf16 %v10650_v24, %v10639_v14  ;;  %v8726_v38 = vld [vmem:[%s11222_s7 + $0x230] ss:$8 sps:$4 sm:$0xff]   ;;  %v8818_v61 = vld [vmem:[%s11224_s9 + $0x114] ss:$8 sps:$4 sm:$0xff]   ;;  %6224 = vmatprep.subr.bf16.mxu1 %v8815_v4 }
 0x590   : > { %5385 = vmatpush1.bf16.msra.mxu0 %v8684_v7  ;;  %4911 = vst [vmem:[%s10567_s30 + $0x78] sm:$0xff] %v10652_v29  ;;  %v4919_v20 = vpack.c.bf16 %v10652_v29, %v10644_v28  ;;  %v8731_v39 = vld [vmem:[%s11222_s7 + $0x244] ss:$8 sps:$4 sm:$0xff]   ;;  %6225 = vmatpush1.bf16.msra.mxu1 %v8813_v37  ;;  %v8816_v51 = vld [vmem:[%s11224_s9 + $0x110] ss:$8 sps:$4 sm:$0xff]  }
 0x591   : > { %5386 = vmatprep.subr.bf16.mxu0 %v8689_v17  ;;  %6226 = vmatprep.subr.bf16.mxu1 %v8818_v61  ;;  %v8729_v3 = vld [vmem:[%s11222_s7 + $0x240] ss:$8 sps:$4 sm:$0xff]   ;;  %v8734_v62 = vld [vmem:[%s11222_s7 + $0x254] ss:$8 sps:$4 sm:$0xff]   ;;  %v8732_v55 = vld [vmem:[%s11222_s7 + $0x250] ss:$8 sps:$4 sm:$0xff]  }
 0x592   : > { %v8819_v41 = vld [vmem:[%s11224_s9 + $0x120] ss:$8 sps:$4 sm:$0xff]   ;;  %v8824_v23 = vld [vmem:[%s11224_s9 + $0x134] ss:$8 sps:$4 sm:$0xff]   ;;  %v8737_v60 = vld [vmem:[%s11222_s7 + $0x264] ss:$8 sps:$4 sm:$0xff]  }
 0x593   : > { %v8822_v56 = vld [vmem:[%s11224_s9 + $0x130] ss:$8 sps:$4 sm:$0xff]   ;;  %v8827_v58 = vld [vmem:[%s11224_s9 + $0x144] ss:$8 sps:$4 sm:$0xff]   ;;  %v8735_v53 = vld [vmem:[%s11222_s7 + $0x260] ss:$8 sps:$4 sm:$0xff]  }
 0x594   : > { %5387 = vmatpush1.bf16.msra.mxu0 %v8687_v52  ;;  %6227 = vmatpush1.bf16.msra.mxu1 %v8816_v51  ;;  %v8740_v47 = vld [vmem:[%s11222_s7 + $0x274] ss:$8 sps:$4 sm:$0xff]   ;;  %v8825_v63 = vld [vmem:[%s11224_s9 + $0x140] ss:$8 sps:$4 sm:$0xff]   ;;  %v8738_v36 = vld [vmem:[%s11222_s7 + $0x270] ss:$8 sps:$4 sm:$0xff]  }
 0x595   : > { %5388 = vmatprep.subr.bf16.mxu0 %v8692_v22  ;;  %v8830_v40 = vld [vmem:[%s11224_s9 + $0x154] ss:$8 sps:$4 sm:$0xff]   ;;  %v8743_v6 = vld [vmem:[%s11222_s7 + $0x284] ss:$8 sps:$4 sm:$0xff]   ;;  %v8828_v31 = vld [vmem:[%s11224_s9 + $0x150] ss:$8 sps:$4 sm:$0xff]  }
 0x596   : > { %v8833_v33 = vld [vmem:[%s11224_s9 + $0x164] ss:$8 sps:$4 sm:$0xff]   ;;  %v8741_v7 = vld [vmem:[%s11222_s7 + $0x280] ss:$8 sps:$4 sm:$0xff]   ;;  %v8746_v10 = vld [vmem:[%s11222_s7 + $0x294] ss:$8 sps:$4 sm:$0xff]  }
 0x597   : > { %v8831_v17 = vld [vmem:[%s11224_s9 + $0x160] ss:$8 sps:$4 sm:$0xff]   ;;  %v8836_v52 = vld [vmem:[%s11224_s9 + $0x174] ss:$8 sps:$4 sm:$0xff]   ;;  %v8744_v22 = vld [vmem:[%s11222_s7 + $0x290] ss:$8 sps:$4 sm:$0xff]  }
 0x598   : > { %5389 = vmatpush1.bf16.msra.mxu0 %v8690_v46  ;;  %v8749_v46 = vld [vmem:[%s11222_s7 + $0x2a4] ss:$8 sps:$4 sm:$0xff]   ;;  %v8768_v37 = vld [vmem:[%s11222_s7 + $0x310] ss:$8 sps:$4 sm:$0xff]   ;;  %v8782_v14 = vld [vmem:[%s11222_s7 + $0x354] ss:$8 sps:$4 sm:$0xff]  }
 0x599   : > { %5390 = vmatprep.subr.bf16.mxu0 %v8695_v49  ;;  %v8834_v49 = vld [vmem:[%s11224_s9 + $0x170] ss:$8 sps:$4 sm:$0xff]   ;;  %v8773_v4 = vld [vmem:[%s11222_s7 + $0x324] ss:$8 sps:$4 sm:$0xff]   ;;  %v8788_v61 = vld [vmem:[%s11222_s7 + $0x374] ss:$8 sps:$4 sm:$0xff]  }
 0x59a   : > { %v8774_v28 = vld [vmem:[%s11222_s7 + $0x330] ss:$8 sps:$4 sm:$0xff]   ;;  %v8779_v29 = vld [vmem:[%s11222_s7 + $0x344] ss:$8 sps:$4 sm:$0xff]  }
 0x59b   : > { %v8785_v24 = vld [vmem:[%s11222_s7 + $0x364] ss:$8 sps:$4 sm:$0xff]  }
 0x59c   : > { %5391 = vmatpush1.bf16.msra.mxu0 %v8693_v35  ;;  %v8839_v35 = vld [vmem:[%s11224_s9 + $0x184] ss:$8 sps:$4 sm:$0xff]  }
 0x59d   : > { %5392 = vmatprep.subr.bf16.mxu0 %v8698_v16  ;;  %v8747_v16 = vld [vmem:[%s11222_s7 + $0x2a0] ss:$8 sps:$4 sm:$0xff]   ;;  %v8791_v51 = vld [vmem:[%s11222_s7 + $0x384] ss:$8 sps:$4 sm:$0xff]  }
 0x5a0   : > { %5393 = vmatpush1.bf16.msra.mxu0 %v8696_v45  ;;  %v8752_v45 = vld [vmem:[%s11222_s7 + $0x2b4] ss:$8 sps:$4 sm:$0xff]  }
 0x5a1   : > { %5394 = vmatprep.subr.bf16.mxu0 %v8701_v1  ;;  %v8837_v1 = vld [vmem:[%s11224_s9 + $0x180] ss:$8 sps:$4 sm:$0xff]  }
 0x5a4   : > { %5395 = vmatpush1.bf16.msra.mxu0 %v8699_v11  ;;  %v8842_v11 = vld [vmem:[%s11224_s9 + $0x194] ss:$8 sps:$4 sm:$0xff]  }
 0x5a5   : > { %5396 = vmatprep.subr.bf16.mxu0 %v8704_v13  ;;  %v8750_v13 = vld [vmem:[%s11222_s7 + $0x2b0] ss:$8 sps:$4 sm:$0xff]  }
 0x5a8   : > { %5397 = vmatpush1.bf16.msra.mxu0 %v8702_v32  ;;  %v8755_v32 = vld [vmem:[%s11222_s7 + $0x2c4] ss:$8 sps:$4 sm:$0xff]  }
 0x5a9   : > { %5398 = vmatprep.subr.bf16.mxu0 %v8707_v25  ;;  %v8840_v25 = vld [vmem:[%s11224_s9 + $0x190] ss:$8 sps:$4 sm:$0xff]  }
 0x5ac   : > { %5399 = vmatpush1.bf16.msra.mxu0 %v8705_v15  ;;  %v8845_v15 = vld [vmem:[%s11224_s9 + $0x1a4] ss:$8 sps:$4 sm:$0xff]  }
 0x5ad   : > { %5400 = vmatprep.subr.bf16.mxu0 %v8710_v59  ;;  %v8753_v59 = vld [vmem:[%s11222_s7 + $0x2c0] ss:$8 sps:$4 sm:$0xff]  }
 0x5b0   : > { %5401 = vmatpush1.bf16.msra.mxu0 %v8708_v27  ;;  %v8758_v27 = vld [vmem:[%s11222_s7 + $0x2d4] ss:$8 sps:$4 sm:$0xff]  }
 0x5b1   : > { %5402 = vmatprep.subr.bf16.mxu0 %v8713_v12  ;;  %v8843_v12 = vld [vmem:[%s11224_s9 + $0x1a0] ss:$8 sps:$4 sm:$0xff]  }
 0x5b4   : > { %5403 = vmatpush1.bf16.msra.mxu0 %v8711_v19  ;;  %v8848_v19 = vld [vmem:[%s11224_s9 + $0x1b4] ss:$8 sps:$4 sm:$0xff]  }
 0x5b5   : > { %5404 = vmatprep.subr.bf16.mxu0 %v8716_v48  ;;  %v8756_v48 = vld [vmem:[%s11222_s7 + $0x2d0] ss:$8 sps:$4 sm:$0xff]  }
 0x5b8   : > { %5405 = vmatpush1.bf16.msra.mxu0 %v8714_v54  ;;  %v8761_v54 = vld [vmem:[%s11222_s7 + $0x2e4] ss:$8 sps:$4 sm:$0xff]  }
 0x5b9   : > { %5624 = vmatprep.subr.bf16.mxu0 %v8719_v50  ;;  %v8846_v50 = vld [vmem:[%s11224_s9 + $0x1b0] ss:$8 sps:$4 sm:$0xff]  }
 0x5bb   : > { %5407 = vmatmul.mubr.bf16.vlgmr.msra.gmra.mrb[64].mxu0 %v8933_v2 }
 0x5bc   : > { %5416 = vmatprep.mubr.bf16.mxu0 %v10601_v43  ;;  %5625 = vmatpush1.bf16.msra.mxu0 %v8717_v18  ;;  %v8759_v18 = vld [vmem:[%s11222_s7 + $0x2e0] ss:$8 sps:$4 sm:$0xff]  }
 0x5bd   : > { %5626 = vmatprep.subr.bf16.mxu0 %v8722_v9  ;;  %v8764_v9 = vld [vmem:[%s11222_s7 + $0x2f4] ss:$8 sps:$4 sm:$0xff]  }
 0x5c0   : > { %5627 = vmatpush1.bf16.msra.mxu0 %v8720_v26  ;;  %v8762_v26 = vld [vmem:[%s11222_s7 + $0x2f0] ss:$8 sps:$4 sm:$0xff]  }
 0x5c1   : > { %5628 = vmatprep.subr.bf16.mxu0 %v8725_v30  ;;  %v8767_v30 = vld [vmem:[%s11222_s7 + $0x304] ss:$8 sps:$4 sm:$0xff]  }
 0x5c3   : > { %5417 = vmatmul.mubr.bf16.gmra.mrb[68].mxu0 %v10594_v0 }
 0x5c4   : > { %5629 = vmatpush1.bf16.msra.mxu0 %v8723_v5  ;;  %5656 = vmatprep.mubr.bf16.mxu0 %v10601_v43  ;;  %v8821_v43 = vld [vmem:[%s11224_s9 + $0x124] ss:$8 sps:$4 sm:$0xff]   ;;  %v8765_v5 = vld [vmem:[%s11222_s7 + $0x300] ss:$8 sps:$4 sm:$0xff]  }
 0x5c5   : > { %5630 = vmatprep.subr.bf16.mxu0 %v8728_v34  ;;  %6228 = vmatprep.subr.bf16.mxu1 %v8821_v43  ;;  %v8770_v34 = vld [vmem:[%s11222_s7 + $0x314] ss:$8 sps:$4 sm:$0xff]   ;;  %v8789_v43 = vld [vmem:[%s11222_s7 + $0x380] ss:$8 sps:$4 sm:$0xff]  }
 0x5c6   : > { %6229 = vmatpush1.bf16.msra.mxu1 %v8819_v41  ;;  %v8797_v41 = vld [vmem:[%s11222_s7 + $0x3a4] ss:$8 sps:$4 sm:$0xff]  }
 0x5c7   : > { %6230 = vmatprep.subr.bf16.mxu1 %v8824_v23  ;;  %v8795_v23 = vld [vmem:[%s11222_s7 + $0x3a0] ss:$8 sps:$4 sm:$0xff]  }
 0x5c8   : > { %5631 = vmatpush1.bf16.msra.mxu0 %v8726_v38  ;;  %v8771_v38 = vld [vmem:[%s11222_s7 + $0x320] ss:$8 sps:$4 sm:$0xff]  }
 0x5c9   : > { %5632 = vmatprep.subr.bf16.mxu0 %v8731_v39  ;;  %v8786_v39 = vld [vmem:[%s11222_s7 + $0x370] ss:$8 sps:$4 sm:$0xff]  }
 0x5ca   : > { %6231 = vmatpush1.bf16.msra.mxu1 %v8822_v56  ;;  %v8803_v56 = vld [vmem:[%s11222_s7 + $0x3c4] ss:$8 sps:$4 sm:$0xff]  }
 0x5cb   : > { %6232 = vmatprep.subr.bf16.mxu1 %v8827_v58  ;;  %v8801_v58 = vld [vmem:[%s11222_s7 + $0x3c0] ss:$8 sps:$4 sm:$0xff]  }
 0x5cc   : > { %5633 = vmatpush1.bf16.msra.mxu0 %v8729_v3  ;;  %v8794_v3 = vld [vmem:[%s11222_s7 + $0x394] ss:$8 sps:$4 sm:$0xff]  }
 0x5cd   : > { %5634 = vmatprep.subr.bf16.mxu0 %v8734_v62  ;;  %v8792_v62 = vld [vmem:[%s11222_s7 + $0x390] ss:$8 sps:$4 sm:$0xff]  }
 0x5ce   : > { %6233 = vmatpush1.bf16.msra.mxu1 %v8825_v63  ;;  %v8809_v63 = vld [vmem:[%s11222_s7 + $0x3e4] ss:$8 sps:$4 sm:$0xff]  }
 0x5cf   : > { %6234 = vmatprep.subr.bf16.mxu1 %v8830_v40  ;;  %v8807_v40 = vld [vmem:[%s11222_s7 + $0x3e0] ss:$8 sps:$4 sm:$0xff]  }
 0x5d0   : > { %5635 = vmatpush1.bf16.msra.mxu0 %v8732_v55  ;;  %v8800_v55 = vld [vmem:[%s11222_s7 + $0x3b4] ss:$8 sps:$4 sm:$0xff]  }
 0x5d1   : > { %5636 = vmatprep.subr.bf16.mxu0 %v8737_v60  ;;  %v8798_v60 = vld [vmem:[%s11222_s7 + $0x3b0] ss:$8 sps:$4 sm:$0xff]  }
 0x5d2   : > { %6235 = vmatpush1.bf16.msra.mxu1 %v8828_v31  ;;  %v8851_v31 = vld [vmem:[%s11224_s9 + $0x1c4] ss:$8 sps:$4 sm:$0xff]  }
 0x5d3   : > { %6236 = vmatprep.subr.bf16.mxu1 %v8833_v33  ;;  %v8849_v33 = vld [vmem:[%s11224_s9 + $0x1c0] ss:$8 sps:$4 sm:$0xff]  }
 0x5d4   : > { %5637 = vmatpush1.bf16.msra.mxu0 %v8735_v53  ;;  %v8806_v53 = vld [vmem:[%s11222_s7 + $0x3d4] ss:$8 sps:$4 sm:$0xff]  }
 0x5d5   : > { %5638 = vmatprep.subr.bf16.mxu0 %v8740_v47  ;;  %v8804_v47 = vld [vmem:[%s11222_s7 + $0x3d0] ss:$8 sps:$4 sm:$0xff]  }
 0x5d6   : > { %6237 = vmatpush1.bf16.msra.mxu1 %v8831_v17  ;;  %v8860_v17 = vld [vmem:[%s11224_s9 + $0x1f4] ss:$8 sps:$4 sm:$0xff]  }
 0x5d7   : > { %6238 = vmatprep.subr.bf16.mxu1 %v8836_v52  ;;  %v8858_v52 = vld [vmem:[%s11224_s9 + $0x1f0] ss:$8 sps:$4 sm:$0xff]  }
 0x5d8   : > { %5639 = vmatpush1.bf16.msra.mxu0 %v8738_v36  ;;  %v8812_v36 = vld [vmem:[%s11222_s7 + $0x3f4] ss:$8 sps:$4 sm:$0xff]  }
 0x5d9   : > { %5640 = vmatprep.subr.bf16.mxu0 %v8743_v6  ;;  %v8810_v6 = vld [vmem:[%s11222_s7 + $0x3f0] ss:$8 sps:$4 sm:$0xff]  }
 0x5da   : > { %6239 = vmatpush1.bf16.msra.mxu1 %v8834_v49  ;;  %v8910_v49 = vld [vmem:[%s11226_s11] sm:$0xff]  }
 0x5db   : > { %6240 = vmatprep.subr.bf16.mxu1 %v8839_v35  ;;  %v8911_v35 = vld [vmem:[%s11226_s11 + $0x48] sm:$0xff]  }
 0x5dc   : > { %5641 = vmatpush1.bf16.msra.mxu0 %v8741_v7  ;;  %v8854_v7 = vld [vmem:[%s11224_s9 + $0x1d4] ss:$8 sps:$4 sm:$0xff]  }
 0x5dd   : > { %5642 = vmatprep.subr.bf16.mxu0 %v8746_v10  ;;  %v8855_v10 = vld [vmem:[%s11224_s9 + $0x1e0] ss:$8 sps:$4 sm:$0xff]  }
 0x5de   : > { %6241 = vmatpush1.bf16.msra.mxu1 %v8837_v1  ;;  %v8914_v1 = vld [vmem:[%s11226_s11 + $0x10] sm:$0xff]  }
 0x5df   : > { %6242 = vmatprep.subr.bf16.mxu1 %v8842_v11  ;;  %v8915_v11 = vld [vmem:[%s11226_s11 + $0x58] sm:$0xff]  }
 0x5e0   : > { %5643 = vmatpush1.bf16.msra.mxu0 %v8744_v22  ;;  %v8863_v22 = vld [vmem:[%s11224_s9 + $0x4] ss:$8 sps:$4 sm:$0xff]  }
 0x5e1   : > { %5644 = vmatprep.subr.bf16.mxu0 %v8749_v46  ;;  %v8909_v46 = vld [vmem:[%s11226_s11 + $0x40] sm:$0xff]  }
 0x5e2   : > { %6243 = vmatpush1.bf16.msra.mxu1 %v8840_v25  ;;  %v8918_v25 = vld [vmem:[%s11226_s11 + $0x20] sm:$0xff]  }
 0x5e3   : > { %6244 = vmatprep.subr.bf16.mxu1 %v8845_v15  ;;  %v5943_v15 = vld [vmem:[%s11223_s8] sm:$0x3] }
 0x5e4   : > { %5645 = vmatpush1.bf16.msra.mxu0 %v8747_v16  ;;  %v8912_v16 = vld [vmem:[%s11226_s11 + $0x8] sm:$0xff]  }
 0x5e5   : > { %5646 = vmatprep.subr.bf16.mxu0 %v8752_v45  ;;  %v8913_v45 = vld [vmem:[%s11226_s11 + $0x50] sm:$0xff]  }
 0x5e6   : > { %6245 = vmatpush1.bf16.msra.mxu1 %v8843_v12 }
 0x5e7   : > { %6246 = vmatprep.subr.bf16.mxu1 %v8848_v19 }
 0x5e8   : > { %5647 = vmatpush1.bf16.msra.mxu0 %v8750_v13  ;;  %v8916_v13 = vld [vmem:[%s11226_s11 + $0x18] sm:$0xff]  }
 0x5e9   : > { %5648 = vmatprep.subr.bf16.mxu0 %v8755_v32  ;;  %v8917_v32 = vld [vmem:[%s11226_s11 + $0x60] sm:$0xff]  }
 0x5ea   : > { %6247 = vmatpush1.bf16.msra.mxu1 %v8846_v50 }
 0x5eb   : > { %6248 = vmatprep.subr.bf16.mxu1 %v8851_v31  ;;  %v8867_v31 = vld [vmem:[%s11224_s9 + $0x20] ss:$8 sps:$4 sm:$0xff]  }
 0x5ec   : > { %5649 = vmatpush1.bf16.msra.mxu0 %v8753_v59  ;;  %v5948_v59 = vrot.slane %v5943_v15, %v9420_v42 }
 0x5ed   : > { %5650 = vmatprep.subr.bf16.mxu0 %v8758_v27  ;;  %v5952_v27 = vrot.slane %v5943_v15, %v9425_v44  ;;  %v8899_v15 = vld [vmem:[%s11224_s9 + $0xc4] ss:$8 sps:$4 sm:$0xff]  }
 0x5ee   : > { %6249 = vmatpush1.bf16.msra.mxu1 %v8849_v33  ;;  %v8872_v33 = vld [vmem:[%s11224_s9 + $0x34] ss:$8 sps:$4 sm:$0xff]  }
 0x5ef   : > { %6250 = vmatprep.subr.bf16.mxu1 %v8854_v7  ;;  %v8870_v7 = vld [vmem:[%s11224_s9 + $0x30] ss:$8 sps:$4 sm:$0xff]  }
 0x5f0   : > { %5651 = vmatpush1.bf16.msra.mxu0 %v8756_v48 }
 0x5f1   : > { %5652 = vmatprep.subr.bf16.mxu0 %v8761_v54 }
 0x5f4   : > { %5653 = vmatpush1.bf16.msra.mxu0 %v8759_v18 }
 0x5f5   : > { %5654 = vmatprep.subr.bf16.mxu0 %v8764_v9 }
 0x5f8   : > { %5655 = vmatpush1.bf16.msra.mxu0 %v8762_v26 }
 0x5f9   : > { %5882 = vmatprep.subr.bf16.mxu0 %v8767_v30 }
 0x5fb   : > { %5657 = vmatmul.mubr.bf16.vlgmr.msra.gmra.mrb[64].mxu0 %v10594_v0  ;;  %v8776_v0 = vld [vmem:[%s11222_s7 + $0x334] ss:$8 sps:$4 sm:$0xff]  }
 0x5fc   : > { %5666 = vmatprep.mubr.bf16.mxu0 %v4919_v20  ;;  %5883 = vmatpush1.bf16.msra.mxu0 %v8765_v5  ;;  %v8777_v20 = vld [vmem:[%s11222_s7 + $0x340] ss:$8 sps:$4 sm:$0xff]  }
 0x5fd   : > { %5884 = vmatprep.subr.bf16.mxu0 %v8770_v34 }
 0x600   : > { %5885 = vmatpush1.bf16.msra.mxu0 %v8768_v37 }
 0x601   : > { %5886 = vmatprep.subr.bf16.mxu0 %v8773_v4 }
 0x603   : > { %5667 = vmatmul.mubr.bf16.gmra.mrb[68].mxu0 %v4918_v21  ;;  %v8783_v21 = vld [vmem:[%s11222_s7 + $0x360] ss:$8 sps:$4 sm:$0xff]  }
 0x604   : > { %5887 = vmatpush1.bf16.msra.mxu0 %v8771_v38  ;;  %5914 = vmatprep.mubr.bf16.mxu0 %v10622_v57  ;;  %v8780_v57 = vld [vmem:[%s11222_s7 + $0x350] ss:$8 sps:$4 sm:$0xff]  }
 0x605   : > { %5888 = vmatprep.subr.bf16.mxu0 %v8776_v0 }
 0x608   : > { %5889 = vmatpush1.bf16.msra.mxu0 %v8774_v28 }
 0x609   : > { %5890 = vmatprep.subr.bf16.mxu0 %v8779_v29 }
 0x60c   : > { %5891 = vmatpush1.bf16.msra.mxu0 %v8777_v20 }
 0x60d   : > { %5892 = vmatprep.subr.bf16.mxu0 %v8782_v14 }
 0x610   : > { %5893 = vmatpush1.bf16.msra.mxu0 %v8780_v57 }
 0x611   : > { %5894 = vmatprep.subr.bf16.mxu0 %v8785_v24 }
 0x614   : > { %5895 = vmatpush1.bf16.msra.mxu0 %v8783_v21 }
 0x615   : > { %5896 = vmatprep.subr.bf16.mxu0 %v8788_v61 }
 0x618   : > { %5897 = vmatpush1.bf16.msra.mxu0 %v8786_v39 }
 0x619   : > { %5898 = vmatprep.subr.bf16.mxu0 %v8791_v51 }
 0x61c   : > { %5899 = vmatpush1.bf16.msra.mxu0 %v8789_v43 }
 0x61d   : > { %5900 = vmatprep.subr.bf16.mxu0 %v8794_v3 }
 0x620   : > { %5901 = vmatpush1.bf16.msra.mxu0 %v8792_v62 }
 0x621   : > { %5902 = vmatprep.subr.bf16.mxu0 %v8797_v41 }
 0x624   : > { %5903 = vmatpush1.bf16.msra.mxu0 %v8795_v23 }
 0x625   : > { %5904 = vmatprep.subr.bf16.mxu0 %v8800_v55 }
 0x628   : > { %5905 = vmatpush1.bf16.msra.mxu0 %v8798_v60 }
 0x629   : > { %5906 = vmatprep.subr.bf16.mxu0 %v8803_v56 }
 0x62c   : > { %5907 = vmatpush1.bf16.msra.mxu0 %v8801_v58 }
 0x62d   : > { %5908 = vmatprep.subr.bf16.mxu0 %v8806_v53 }
 0x630   : > { %5909 = vmatpush1.bf16.msra.mxu0 %v8804_v47 }
 0x631   : > { %5910 = vmatprep.subr.bf16.mxu0 %v8809_v63  ;;  %v8861_v63 = vld [vmem:[%s11224_s9] ss:$8 sps:$4 sm:$0xff]  }
 0x634   : > { %5911 = vmatpush1.bf16.msra.mxu0 %v8807_v40  ;;  %v8866_v40 = vld [vmem:[%s11224_s9 + $0x14] ss:$8 sps:$4 sm:$0xff]  }
 0x635   : > { %5912 = vmatprep.subr.bf16.mxu0 %v8812_v36  ;;  %v8864_v36 = vld [vmem:[%s11224_s9 + $0x10] ss:$8 sps:$4 sm:$0xff]  }
 0x638   : > { %5913 = vmatpush1.bf16.msra.mxu0 %v8810_v6  ;;  %v8869_v6 = vld [vmem:[%s11224_s9 + $0x24] ss:$8 sps:$4 sm:$0xff]  }
 0x639   : > { %7818 = vmatprep.subr.bf16.mxu0 %v8909_v46  ;;  %v8884_v46 = vld [vmem:[%s11224_s9 + $0x74] ss:$8 sps:$4 sm:$0xff]  }
 0x63b   : > { %5915 = vmatmul.mubr.bf16.vlgmr.msra.gmra.mrb[64].mxu0 %v10618_v8  ;;  %v8852_v8 = vld [vmem:[%s11224_s9 + $0x1d0] ss:$8 sps:$4 sm:$0xff]  }
 0x63c   : > { %5924 = vmatprep.mubr.bf16.mxu0 %v8933_v2  ;;  %6251 = vmatpush1.bf16.msra.mxu1 %v8852_v8  ;;  %v8875_v8 = vld [vmem:[%s11224_s9 + $0x44] ss:$8 sps:$4 sm:$0xff]  }
 0x63d   : > { %7819 = vmatpush3.bf16.msra.mxu0 %v8910_v49  ;;  %v8882_v49 = vld [vmem:[%s11224_s9 + $0x70] ss:$8 sps:$4 sm:$0xff]  }
 0x63e   : > { %7820 = vmatprep.subr.bf16.mxu0 %v8911_v35  ;;  %v8887_v35 = vld [vmem:[%s11224_s9 + $0x84] ss:$8 sps:$4 sm:$0xff]  }
 0x641   : > { %7821 = vmatpush3.bf16.msra.mxu0 %v8912_v16  ;;  %v8885_v16 = vld [vmem:[%s11224_s9 + $0x80] ss:$8 sps:$4 sm:$0xff]  }
 0x642   : > { %7822 = vmatprep.subr.bf16.mxu0 %v8913_v45  ;;  %v8890_v45 = vld [vmem:[%s11224_s9 + $0x94] ss:$8 sps:$4 sm:$0xff]  }
 0x643   : > { %5925 = vmatmul.mubr.bf16.gmra.mrb[68].mxu0 %v8933_v2  ;;  %v8857_v2 = vld [vmem:[%s11224_s9 + $0x1e4] ss:$8 sps:$4 sm:$0xff]  }
 0x644   : > { %6252 = vmatprep.subr.bf16.mxu1 %v8857_v2  ;;  %v8873_v2 = vld [vmem:[%s11224_s9 + $0x40] ss:$8 sps:$4 sm:$0xff]  }
 0x645   : > { %6253 = vmatpush1.bf16.msra.mxu1 %v8855_v10  ;;  %7823 = vmatpush3.bf16.msra.mxu0 %v8914_v1  ;;  %v8878_v10 = vld [vmem:[%s11224_s9 + $0x54] ss:$8 sps:$4 sm:$0xff]   ;;  %v8888_v1 = vld [vmem:[%s11224_s9 + $0x90] ss:$8 sps:$4 sm:$0xff]  }
 0x646   : > { %6254 = vmatprep.subr.bf16.mxu1 %v8860_v17  ;;  %7824 = vmatprep.subr.bf16.mxu0 %v8915_v11  ;;  %v8876_v17 = vld [vmem:[%s11224_s9 + $0x50] ss:$8 sps:$4 sm:$0xff]   ;;  %v8893_v11 = vld [vmem:[%s11224_s9 + $0xa4] ss:$8 sps:$4 sm:$0xff]  }
 0x649   : > { %6255 = vmatpush1.bf16.msra.mxu1 %v8858_v52  ;;  %7825 = vmatpush3.bf16.msra.mxu0 %v8916_v13  ;;  %v8881_v52 = vld [vmem:[%s11224_s9 + $0x64] ss:$8 sps:$4 sm:$0xff]   ;;  %v8891_v13 = vld [vmem:[%s11224_s9 + $0xa0] ss:$8 sps:$4 sm:$0xff]  }
 0x64a   : > { %6427 = vmatprep.subr.bf16.mxu1 %v8863_v22  ;;  %7826 = vmatprep.subr.bf16.mxu0 %v8917_v32  ;;  %v8879_v22 = vld [vmem:[%s11224_s9 + $0x60] ss:$8 sps:$4 sm:$0xff]   ;;  %v8896_v32 = vld [vmem:[%s11224_s9 + $0xb4] ss:$8 sps:$4 sm:$0xff]  }
 0x64d   : > { %7827 = vmatpush3.bf16.msra.mxu0 %v8918_v25  ;;  %v8894_v25 = vld [vmem:[%s11224_s9 + $0xb0] ss:$8 sps:$4 sm:$0xff]  }
 0x70e   : > { %v5916_v12 = vpop.f32.mrb[64].mxu0 }
 0x70f   : > { %v5955_v19 = vadd.f32 %v5948_v59, %v5916_v12  ;;  %v5918_v48 = vpop.f32.mrb[65].mxu0  ;;  %v8900_v12 = vld [vmem:[%s11224_s9 + $0xd0] ss:$8 sps:$4 sm:$0xff]  }
 0x710   : > { %v5956_v54 = vadd.f32 %v5952_v27, %v5918_v48  ;;  %v5920_v50 = vpop.f32.mrb[66].mxu0  ;;  %v8903_v48 = vld [vmem:[%s11224_s9 + $0xe0] ss:$8 sps:$4 sm:$0xff]  }
 0x711   : > { %vm5963_vm1 = vcmp.ge.f32.partialorder %v5955_v19, 0.0  ;;  %v5971_v18 = vmul.f32 0.01, %v5955_v19  ;;  %v5957_v9 = vadd.f32 %v5948_v59, %v5920_v50  ;;  %v5922_v26 = vpop.f32.mrb[67].mxu0  ;;  %v8906_v50 = vld [vmem:[%s11224_s9 + $0xf0] ss:$8 sps:$4 sm:$0xff]  }
 0x712   : > { %vm5964_vm2 = vcmp.ge.f32.partialorder %v5956_v54, 0.0  ;;  %v5972_v30 = vmul.f32 0.01, %v5956_v54  ;;  %v5958_v5 = vadd.f32 %v5952_v27, %v5922_v26  ;;  %v8921_v26 = vld [vmem:[%s11226_s11 + $0x70] sm:$0xff]  }
 0x713   : > { %v11066_v34 = vsel %vm5963_vm1, %v5955_v19, %v5971_v18  ;;  %vm5965_vm3 = vcmp.ge.f32.partialorder %v5957_v9, 0.0  ;;  %v5973_v37 = vmul.f32 0.01, %v5957_v9  ;;  %v8905_v19 = vld [vmem:[%s11224_s9 + $0xe4] ss:$8 sps:$4 sm:$0xff]  }
 0x714   : > { %5987 = vst [vmem:[%s11064_s1] sm:$0xff] %v11066_v34  ;;  %vm5966_vm4 = vcmp.ge.f32.partialorder %v5958_v5, 0.0  ;;  %v5974_v4 = vmul.f32 0.01, %v5958_v5  ;;  %v5980_v38 = vsel %vm5964_vm2, %v5956_v54, %v5972_v30  ;;  %v8908_v54 = vld [vmem:[%s11224_s9 + $0xf4] ss:$8 sps:$4 sm:$0xff]   ;;  %v8919_v18 = vld [vmem:[%s11226_s11 + $0x68] sm:$0xff]  }
 0x715   : > { %v11070_v0 = vsel %vm5965_vm3, %v5957_v9, %v5973_v37  ;;  %5988 = vst [vmem:[%s11064_s1 + $0x8] sm:$0xff] %v5980_v38  ;;  %v8920_v9 = vld [vmem:[%s11226_s11 + $0x28] sm:$0xff]   ;;  %7828 = vmatprep.subr.bf16.mxu0 %v8919_v18  ;;  %v8922_v30 = vld [vmem:[%s11226_s11 + $0x30] sm:$0xff]   ;;  %v6470_v37 = vld [vmem:[%s11225_s10] sm:$0x3] }
 0x716   : > { %5989 = vst [vmem:[%s11064_s1 + $0x10] sm:$0xff] %v11070_v0  ;;  %v5995_v28 = vpack.c.bf16 %v11070_v0, %v11066_v34  ;;  %v5926_v29 = vpop.f32.mrb[68].mxu0  ;;  %v5982_v20 = vsel %vm5966_vm4, %v5958_v5, %v5974_v4  ;;  %7829 = vmatpush3.bf16.msra.mxu0 %v8920_v9  ;;  %v8923_v5 = vld [vmem:[%s11226_s11 + $0x78] sm:$0xff]   ;;  %v6475_v4 = vrot.slane %v6470_v37, %v9420_v42 }
 0x717   : > { %v5959_v14 = vadd.f32 %v5948_v59, %v5926_v29  ;;  %v5928_v57 = vpop.f32.mrb[69].mxu0  ;;  %5990 = vst [vmem:[%s11064_s1 + $0x18] sm:$0xff] %v5982_v20  ;;  %v5996_v24 = vpack.c.bf16 %v5982_v20, %v5980_v38  ;;  %7830 = vmatprep.subr.bf16.mxu0 %v8921_v26  ;;  %v8924_v34 = vld [vmem:[%s11226_s11 + $0x38] sm:$0xff]   ;;  %v6479_v38 = vrot.slane %v6470_v37, %v9425_v44 }
 0x718   : > { %v5960_v21 = vadd.f32 %v5952_v27, %v5928_v57  ;;  %v5930_v61 = vpop.f32.mrb[70].mxu0 }
 0x719   : > { %vm5967_vm5 = vcmp.ge.f32.partialorder %v5959_v14, 0.0  ;;  %v5975_v39 = vmul.f32 0.01, %v5959_v14  ;;  %v5961_v51 = vadd.f32 %v5948_v59, %v5930_v61  ;;  %v5932_v43 = vpop.f32.mrb[71].mxu0  ;;  %v8897_v59 = vld [vmem:[%s11224_s9 + $0xc0] ss:$8 sps:$4 sm:$0xff]  }
 0x71a   : > { %vm5968_vm6 = vcmp.ge.f32.partialorder %v5960_v21, 0.0  ;;  %v5976_v3 = vmul.f32 0.01, %v5960_v21  ;;  %v5962_v62 = vadd.f32 %v5952_v27, %v5932_v43  ;;  %v8902_v27 = vld [vmem:[%s11224_s9 + $0xd4] ss:$8 sps:$4 sm:$0xff]   ;;  %7831 = vmatpush3.bf16.msra.mxu0 %v8922_v30 }
 0x71b   : > { %v5983_v41 = vsel %vm5967_vm5, %v5959_v14, %v5975_v39  ;;  %vm5969_vm7 = vcmp.ge.f32.partialorder %v5961_v51, 0.0  ;;  %v5977_v23 = vmul.f32 0.01, %v5961_v51  ;;  %7832 = vmatprep.subr.bf16.mxu0 %v8923_v5 }
 0x71c   : > { %5991 = vst [vmem:[%s11064_s1 + $0x20] sm:$0xff] %v5983_v41  ;;  %vm5970_vm8 = vcmp.ge.f32.partialorder %v5962_v62, 0.0  ;;  %v5978_v55 = vmul.f32 0.01, %v5962_v62  ;;  %v5984_v60 = vsel %vm5968_vm6, %v5960_v21, %v5976_v3 }
 0x71d   : > { %v5985_v56 = vsel %vm5969_vm7, %v5961_v51, %v5977_v23  ;;  %5992 = vst [vmem:[%s11064_s1 + $0x28] sm:$0xff] %v5984_v60 }
 0x71e   : > { %5993 = vst [vmem:[%s11064_s1 + $0x30] sm:$0xff] %v5985_v56  ;;  %v5997_v58 = vpack.c.bf16 %v5985_v56, %v5983_v41  ;;  %v5986_v53 = vsel %vm5970_vm8, %v5962_v62, %v5978_v55  ;;  %7833 = vmatpush3.bf16.msra.mxu0 %v8924_v34 }
 0x71f   : > { %5994 = vst [vmem:[%s11064_s1 + $0x38] sm:$0xff] %v5986_v53  ;;  %v5998_v47 = vpack.c.bf16 %v5986_v53, %v5984_v60  ;;  %v7794_v60 = vld [vmem:[%s11227_s12] ss:$0 sm:$0xff] }
 0x721   : > { %6256 = vmatprep.mubr.bf16.mxu1 %v5998_v47 }
 0x722   : > { %6257 = vmatmul.mubr.bf16.vlgmr.msra.gmra.mrb[48].mxu1 %v5997_v58 }
 0x723   : > { %6428 = vmatpush1.bf16.msra.mxu1 %v8861_v63  ;;  %6459 = vmatprep.mubr.bf16.mxu1 %v5996_v24 }
 0x724   : > { %6429 = vmatprep.subr.bf16.mxu1 %v8866_v40 }
 0x727   : > { %6430 = vmatpush1.bf16.msra.mxu1 %v8864_v36 }
 0x728   : > { %6431 = vmatprep.subr.bf16.mxu1 %v8869_v6 }
 0x72b   : > { %6432 = vmatpush1.bf16.msra.mxu1 %v8867_v31 }
 0x72c   : > { %6433 = vmatprep.subr.bf16.mxu1 %v8872_v33 }
 0x72f   : > { %6434 = vmatpush1.bf16.msra.mxu1 %v8870_v7 }
 0x730   : > { %6435 = vmatprep.subr.bf16.mxu1 %v8875_v8 }
 0x733   : > { %6436 = vmatpush1.bf16.msra.mxu1 %v8873_v2 }
 0x734   : > { %6437 = vmatprep.subr.bf16.mxu1 %v8878_v10 }
 0x737   : > { %6438 = vmatpush1.bf16.msra.mxu1 %v8876_v17 }
 0x738   : > { %6439 = vmatprep.subr.bf16.mxu1 %v8881_v52 }
 0x73b   : > { %6440 = vmatpush1.bf16.msra.mxu1 %v8879_v22 }
 0x73c   : > { %6441 = vmatprep.subr.bf16.mxu1 %v8884_v46 }
 0x73f   : > { %6442 = vmatpush1.bf16.msra.mxu1 %v8882_v49 }
 0x740   : > { %6443 = vmatprep.subr.bf16.mxu1 %v8887_v35 }
 0x743   : > { %6444 = vmatpush1.bf16.msra.mxu1 %v8885_v16 }
 0x744   : > { %6445 = vmatprep.subr.bf16.mxu1 %v8890_v45 }
 0x747   : > { %6446 = vmatpush1.bf16.msra.mxu1 %v8888_v1 }
 0x748   : > { %6447 = vmatprep.subr.bf16.mxu1 %v8893_v11 }
 0x74b   : > { %6448 = vmatpush1.bf16.msra.mxu1 %v8891_v13 }
 0x74c   : > { %6449 = vmatprep.subr.bf16.mxu1 %v8896_v32 }
 0x74f   : > { %6450 = vmatpush1.bf16.msra.mxu1 %v8894_v25 }
 0x750   : > { %6451 = vmatprep.subr.bf16.mxu1 %v8899_v15 }
 0x753   : > { %6452 = vmatpush1.bf16.msra.mxu1 %v8897_v59 }
 0x754   : > { %6453 = vmatprep.subr.bf16.mxu1 %v8902_v27 }
 0x757   : > { %6454 = vmatpush1.bf16.msra.mxu1 %v8900_v12 }
 0x758   : > { %6455 = vmatprep.subr.bf16.mxu1 %v8905_v19 }
 0x75b   : > { %6456 = vmatpush1.bf16.msra.mxu1 %v8903_v48 }
 0x75c   : > { %6457 = vmatprep.subr.bf16.mxu1 %v8908_v54 }
 0x75f   : > { %6458 = vmatpush1.bf16.msra.mxu1 %v8906_v50 }
 0x762   : > { %6460 = vmatmul.mubr.bf16.vlgmr.msra.gmra.mrb[48].mxu1 %v5995_v28 }
 0x835   : > { %v6461_v0 = vpop.f32.mrb[48].mxu1 }
 0x836   : > { %v6482_v28 = vadd.f32 %v6475_v4, %v6461_v0  ;;  %v6463_v29 = vpop.f32.mrb[49].mxu1 }
 0x837   : > { %v6483_v20 = vadd.f32 %v6479_v38, %v6463_v29  ;;  %v6465_v14 = vpop.f32.mrb[50].mxu1 }
 0x838   : > { %vm6486_vm9 = vcmp.ge.f32.partialorder %v6482_v28, 0.0  ;;  %v6490_v57 = vmul.f32 0.01, %v6482_v28  ;;  %v6484_v24 = vadd.f32 %v6475_v4, %v6465_v14  ;;  %v6467_v21 = vpop.f32.mrb[51].mxu1 }
 0x839   : > { %vm6487_vm10 = vcmp.ge.f32.partialorder %v6483_v20, 0.0  ;;  %v6491_v61 = vmul.f32 0.01, %v6483_v20  ;;  %v6485_v39 = vadd.f32 %v6479_v38, %v6467_v21 }
 0x83a   : > { %v6494_v42 = vsel %vm6486_vm9, %v6482_v28, %v6490_v57  ;;  %vm6488_vm11 = vcmp.ge.f32.partialorder %v6484_v24, 0.0  ;;  %v6492_v44 = vmul.f32 0.01, %v6484_v24 }
 0x83b   : > { %6498 = vst [vmem:[%s597_s0] sm:$0xff] %v6494_v42  ;;  %vm6489_vm12 = vcmp.ge.f32.partialorder %v6485_v39, 0.0  ;;  %v6493_v51 = vmul.f32 0.01, %v6485_v39  ;;  %v6495_v43 = vsel %vm6487_vm10, %v6483_v20, %v6491_v61 }
 0x83c   : > { %v6496_v3 = vsel %vm6488_vm11, %v6484_v24, %v6492_v44  ;;  %6499 = vst [vmem:[%s597_s0 + $0x8] sm:$0xff] %v6495_v43 }
 0x83d   : > { %6500 = vst [vmem:[%s597_s0 + $0x10] sm:$0xff] %v6496_v3  ;;  %v6502_v62 = vpack.c.bf16 %v6496_v3, %v6494_v42  ;;  %v6497_v41 = vsel %vm6489_vm12, %v6485_v39, %v6493_v51 }
 0x83e   : > { %6501 = vst [vmem:[%s597_s0 + $0x18] sm:$0xff] %v6497_v41  ;;  %v6503_v23 = vpack.c.bf16 %v6497_v41, %v6495_v43 }
 0x840   : > { %6671 = vmatprep.mubr.bf16.mxu0 %v6503_v23 }
 0x841   : > { %6672 = vmatmul.mubr.bf16.vlgmr.msra.gmra.mrb[72].mxu0 %v6502_v62 }
 0x914   : > { %v7834_v55 = vpop.f32.mrb[72].mxu0 }
 0x915   : > { %v7835_v56 = vpop.f32.mrb[73].mxu0 }
 0x916   : > { %v7836_v58 = vadd.f32 %v7835_v56, %v7834_v55  ;;  %v7837_v53 = vpop.f32.mrb[74].mxu0 }
 0x917   : > { %v7838_v47 = vpop.f32.mrb[75].mxu0 }
 0x918   : > { %v6674_v63 = vadd.f32 %v7836_v58, %v7794_v60  ;;  %v7839_v40 = vadd.f32 %v7838_v47, %v7837_v53 }
 0x91a   : > { %6680 = vst [vmem:[%s577_s23] sm:$0xff] %v6674_v63  ;;  %v6677_v36 = vadd.f32 %v7839_v40, %v7794_v60 }
 0x91c   : > { %6681 = vst [vmem:[%s577_s23 + $0x8] sm:$0xff] %v6677_v36 }
 0x91d PF: > { %s28_s24 = sadd.s32 1, %s8931_s24  }
 0x91e   : > { %p25_p4 = scmp.ge.s32.totalorder %s28_s24, 4  }
 0x920   :  { %27 = sbr.rel (!%p25_p4) target bundleno = 3 (0x3), region = 165 }

</bundles_post_ra>
